<compile_context>
chip_gen: v7x
topology: tpu7x:2x2x1
jax: 0.10.0
libtpu: 0.0.40
codegen_flags: <defaults>
</compile_context>

<pallas_src>
import functools

import jax
import jax.numpy as jnp
from jax.experimental import pallas as pl
from jax.experimental.pallas import tpu as pltpu


# ---------------------------------------------------------------------------
# Fused conv-as-GEMM Pallas kernel
#   out[h] = epilogue( prologue(a[h]) @ w[h] + b[h] )
#     prologue : optional ReLU (decoder blocks' leading ReLU)
#     epilogue : optional BatchNorm (batch stats over M) + optional LeakyReLU
# ---------------------------------------------------------------------------
def _fused_conv_kernel(a_ref, w_ref, b_ref, g_ref, bt_ref, o_ref, *,
                       prologue_relu, bn, act, eps=1e-5):
    a = a_ref[0]                                    # (M, K) bf16
    if prologue_relu:
        a = jnp.maximum(a, 0)                       # ReLU commutes with im2col
    y = jnp.dot(a, w_ref[0], preferred_element_type=jnp.float32)
    y = y + b_ref[0]                                # (1, N) broadcast bias
    if bn:                                          # training-mode batch stats
        mean = jnp.mean(y, axis=0, keepdims=True)
        var = jnp.mean(jnp.square(y - mean), axis=0, keepdims=True)
        y = (y - mean) * (g_ref[0] * jax.lax.rsqrt(var + eps)) + bt_ref[0]
    if act == "leaky":
        y = jnp.where(y >= 0.0, y, 0.2 * y)
    o_ref[0] = y


def fused_conv_gemm(a, w, b, gamma, beta, *, prologue_relu, bn, act):
    """a: (Ga, M, K) bf16 with Ga in {1, G}; w: (G, K, N) bf16;
    b / gamma / beta: (G, 1, N) f32.  Returns (G, M, N) f32."""
    Ga, M, K = a.shape
    G, _, N = w.shape
    a_map = (lambda h: (h, 0, 0)) if Ga == G else (lambda h: (0, 0, 0))
    kern = functools.partial(_fused_conv_kernel,
                             prologue_relu=prologue_relu, bn=bn, act=act)
    return pl.pallas_call(
        kern,
        out_shape=jax.ShapeDtypeStruct((G, M, N), jnp.float32),
        grid=(G,),
        in_specs=[
            pl.BlockSpec((1, M, K), a_map),
            pl.BlockSpec((1, K, N), lambda h: (h, 0, 0)),
            pl.BlockSpec((1, 1, N), lambda h: (h, 0, 0)),
            pl.BlockSpec((1, 1, N), lambda h: (h, 0, 0)),
            pl.BlockSpec((1, 1, N), lambda h: (h, 0, 0)),
        ],
        out_specs=pl.BlockSpec((1, M, N), lambda h: (h, 0, 0)),
        compiler_params=pltpu.CompilerParams(
            dimension_semantics=("parallel",)),
    )(a, w, b, gamma, beta)


# ---------------------------------------------------------------------------
# im2col helpers (host-side glue; patches are emitted in bf16)
# ---------------------------------------------------------------------------
def im2col_conv4x4_s2(x):
    """x: (B,H,W,C) -> bf16 patches (B*Ho*Wo, 16*C) for Conv2d(4, s=2, p=1)."""
    B, H, W, C = x.shape
    Ho, Wo = H // 2, W // 2
    xp = jnp.pad(x, ((0, 0), (1, 1), (1, 1), (0, 0)))
    cols = [xp[:, kh:kh + 2 * Ho:2, kw:kw + 2 * Wo:2, :]
            for kh in range(4) for kw in range(4)]
    p = jnp.stack(cols, axis=3).reshape(B * Ho * Wo, 16 * C)
    return p.astype(jnp.bfloat16), Ho, Wo


def im2col_convT4x4_s2(x):
    """x: (B,H,W,C) -> bf16 patches (B*Ho*Wo, 16*C) for ConvTranspose2d(4, s=2, p=1)."""
    B, H, W, C = x.shape
    Ho, Wo = 2 * H, 2 * W
    xu = jnp.zeros((B, 2 * H - 1, 2 * W - 1, C), x.dtype).at[:, ::2, ::2, :].set(x)
    xp = jnp.pad(xu, ((0, 0), (2, 2), (2, 2), (0, 0)))
    cols = [xp[:, kh:kh + Ho, kw:kw + Wo, :] for kh in range(4) for kw in range(4)]
    p = jnp.stack(cols, axis=3).reshape(B * Ho * Wo, 16 * C)
    return p.astype(jnp.bfloat16), Ho, Wo


# ---------------------------------------------------------------------------
# Parameter initialization: weights are stored ONCE in the GEMM layout
# (16*Cin, Cout), bf16, with the ConvTranspose spatial flip already applied.
# ---------------------------------------------------------------------------
def init_params(key, input_nc, output_nc, num_downs, ngf, num_heads=3):
    kit = iter(jax.random.split(key, 12 * num_downs + 4))

    encoder = []
    cin = input_nc
    for i in range(num_downs):
        cout = ngf * min(2 ** i, 8)
        w = 0.05 * jax.random.normal(next(kit), (cout, cin, 4, 4), jnp.float32)
        # torch Conv2d (Cout,Cin,kh,kw) -> GEMM (kh*kw*Cin, Cout)
        wf = jnp.transpose(w, (2, 3, 1, 0)).reshape(16 * cin, cout)
        encoder.append({
            "w": wf.astype(jnp.bfloat16)[None],                     # (1,K,Cout)
            "b": jnp.zeros((1, 1, cout), jnp.float32),              # bias=False (BN)
            "gamma": (1.0 + 0.1 * jax.random.normal(
                next(kit), (cout,), jnp.float32)).reshape(1, 1, cout),
            "beta": (0.1 * jax.random.normal(
                next(kit), (cout,), jnp.float32)).reshape(1, 1, cout),
        })
        cin = cout

    decoder = []
    for i in range(num_downs):
        inner = ngf * min(2 ** (num_downs - i - 1), 8)
        outer = (ngf * min(2 ** (num_downs - i - 2), 8)
                 if i < num_downs - 1 else output_nc)
        outermost = (i == num_downs - 1)
        in_ch = inner if i == 0 else inner * 2
        ws, bs, gs, bts = [], [], [], []
        for _h in range(num_heads):
            w = 0.05 * jax.random.normal(next(kit), (in_ch, outer, 4, 4),
                                         jnp.float32)
            # torch ConvTranspose2d (Cin,Cout,kh,kw): flip spatial, -> GEMM layout
            wf = jnp.transpose(w[:, :, ::-1, ::-1],
                               (2, 3, 0, 1)).reshape(16 * in_ch, outer)
            ws.append(wf.astype(jnp.bfloat16))
            if outermost:
                bs.append(0.1 * jax.random.normal(next(kit), (outer,), jnp.float32))
                gs.append(jnp.ones((outer,), jnp.float32))
                bts.append(jnp.zeros((outer,), jnp.float32))
            else:
                bs.append(jnp.zeros((outer,), jnp.float32))
                gs.append(1.0 + 0.1 * jax.random.normal(next(kit), (outer,),
                                                        jnp.float32))
                bts.append(0.1 * jax.random.normal(next(kit), (outer,),
                                                   jnp.float32))
        decoder.append({
            "w": jnp.stack(ws),                                     # (3,K,Cout) bf16
            "b": jnp.stack(bs).reshape(num_heads, 1, outer),
            "gamma": jnp.stack(gs).reshape(num_heads, 1, outer),
            "beta": jnp.stack(bts).reshape(num_heads, 1, outer),
        })
    return {"encoder": encoder, "decoder": decoder}


# ---------------------------------------------------------------------------
# Forward pass (NHWC inside)
# ---------------------------------------------------------------------------
def encoder_forward(enc_params, x):
    feats = []
    B = x.shape[0]
    for p in enc_params:
        patches, Ho, Wo = im2col_conv4x4_s2(x)
        # Conv(bias=False) + BatchNorm(batch stats) + LeakyReLU(0.2), fused.
        y = fused_conv_gemm(patches[None], p["w"], p["b"], p["gamma"], p["beta"],
                            prologue_relu=False, bn=True, act="leaky")
        x = y[0].reshape(B, Ho, Wo, -1)
        feats.append(x)
    return feats


def decoders_forward(dec_params, feats, num_heads=3):
    n_blocks = len(dec_params)
    B = feats[0].shape[0]
    x = None                                        # (heads, B, H, W, C)
    for i, (p, skip) in enumerate(zip(dec_params, feats)):
        outermost = (i == n_blocks - 1)
        if i == 0:
            inp = skip[None]                        # shared innermost feature
        else:
            skip_b = jnp.broadcast_to(skip[None], (num_heads,) + skip.shape)
            inp = jnp.concatenate([x, skip_b], axis=-1)   # cat([x, skip], C)
        Gi, _, H, W, C = inp.shape
        patches, Ho, Wo = im2col_convT4x4_s2(inp.reshape(Gi * B, H, W, C))
        patches = patches.reshape(Gi, B * Ho * Wo, 16 * C)
        # ReLU (prologue) + ConvTranspose + [BatchNorm if not outermost], fused;
        # all 3 heads run in one pallas_call via the head grid axis.
        y = fused_conv_gemm(patches, p["w"], p["b"], p["gamma"], p["beta"],
                            prologue_relu=True, bn=not outermost, act="none")
        x = y.reshape(num_heads, B, Ho, Wo, -1)
    return x                                        # (heads, B, H, W, output_nc)


def forward_nchw(params, x_nchw):
    x = jnp.transpose(x_nchw, (0, 2, 3, 1))         # NCHW -> NHWC
    feats = encoder_forward(params["encoder"], x)
    feats = feats[::-1]
    y = decoders_forward(params["decoder"], feats)  # (3, B, H, W, Cout)
    y = jnp.transpose(y, (0, 1, 4, 2, 3))           # -> (3, B, Cout, H, W)
    return y[0], y[1], y[2]


# ---------------------------------------------------------------------------
if __name__ == "__main__":
    key = jax.random.PRNGKey(0)
    kp, kx = jax.random.split(key)

    # Small config consistent with the module: UnetGeneratoNOCSBinHead(3, 2, 3, ngf=8)
    input_nc, output_nc, num_downs, ngf = 3, 2, 3, 8
    B, H, W = 2, 16, 16

    params = init_params(kp, input_nc, output_nc, num_downs, ngf)
    x = jax.random.normal(kx, (B, input_nc, H, W), jnp.float32)

    fwd = jax.jit(forward_nchw)
    x_logits, y_logits, z_logits = fwd(params, x)
    jax.block_until_ready((x_logits, y_logits, z_logits))

    for out in (x_logits, y_logits, z_logits):
        assert out.shape == (B, output_nc, H, W), out.shape
        assert jnp.all(jnp.isfinite(out))

    print("KERNEL_OK")
</pallas_src>

<mosaic_0001>
module attributes {stable_mosaic.version = 11 : i64} {
  func.func @_fused_conv_kernel(%arg0: i32, %arg1: memref<1x128x48xbf16, #tpu.memory_space<vmem>>, %arg2: memref<1x48x8xbf16, #tpu.memory_space<vmem>>, %arg3: memref<1x1x8xf32, #tpu.memory_space<vmem>>, %arg4: memref<1x1x8xf32, #tpu.memory_space<vmem>>, %arg5: memref<1x1x8xf32, #tpu.memory_space<vmem>>, %arg6: memref<1x128x8xf32, #tpu.memory_space<vmem>>) attributes {dimension_semantics = [#tpu.dimension_semantics<parallel>], iteration_bounds = array<i64: 1>, scalar_prefetch = 0 : i64, scratch_operands = 0 : i64, tpu.core_type = #tpu.core_type<tc>, window_params = [{transform_indices = @transform_0, window_bounds = array<i64: 1, 128, 48>}, {transform_indices = @transform_1, window_bounds = array<i64: 1, 48, 8>}, {transform_indices = @transform_2, window_bounds = array<i64: 1, 1, 8>}, {transform_indices = @transform_3, window_bounds = array<i64: 1, 1, 8>}, {transform_indices = @transform_4, window_bounds = array<i64: 1, 1, 8>}, {transform_indices = @transform_5, window_bounds = array<i64: 1, 128, 8>}]} {
    %c0 = arith.constant 0 : index
    %c0_0 = arith.constant 0 : index
    %c0_1 = arith.constant 0 : index
    %0 = vector.load %arg1[%c0, %c0_0, %c0_1] : memref<1x128x48xbf16, #tpu.memory_space<vmem>>, vector<1x128x48xbf16>
    %1 = vector.shape_cast %0 : vector<1x128x48xbf16> to vector<128x48xbf16>
    %c0_2 = arith.constant 0 : index
    %c0_3 = arith.constant 0 : index
    %c0_4 = arith.constant 0 : index
    %2 = vector.load %arg2[%c0_2, %c0_3, %c0_4] : memref<1x48x8xbf16, #tpu.memory_space<vmem>>, vector<1x48x8xbf16>
    %3 = vector.shape_cast %2 : vector<1x48x8xbf16> to vector<48x8xbf16>
    %cst = arith.constant dense<0.000000e+00> : vector<128x8xf32>
    %4 = tpu.matmul %1, %3, %cst {dimension_numbers = #tpu.dot_dimension_numbers<[1], [0], [0], [1], [0, 0, 1, 1], [], []>} : vector<128x48xbf16>, vector<48x8xbf16>, vector<128x8xf32> -> vector<128x8xf32>
    %c0_5 = arith.constant 0 : index
    %c0_6 = arith.constant 0 : index
    %c0_7 = arith.constant 0 : index
    %5 = vector.load %arg3[%c0_5, %c0_6, %c0_7] : memref<1x1x8xf32, #tpu.memory_space<vmem>>, vector<1x1x8xf32>
    %6 = vector.shape_cast %5 : vector<1x1x8xf32> to vector<1x8xf32>
    %7 = vector.broadcast %6 : vector<1x8xf32> to vector<128x8xf32>
    %8 = arith.addf %4, %7 : vector<128x8xf32>
    %cst_8 = arith.constant dense<0.000000e+00> : vector<8xf32>
    %9 = vector.multi_reduction <add>, %8, %cst_8 [0] : vector<128x8xf32> to vector<8xf32>
    %10 = vector.shape_cast %9 : vector<8xf32> to vector<1x8xf32>
    %cst_9 = arith.constant 1.280000e+02 : f32
    %11 = vector.broadcast %cst_9 : f32 to vector<1x8xf32>
    %12 = arith.divf %10, %11 : vector<1x8xf32>
    %13 = vector.broadcast %12 : vector<1x8xf32> to vector<128x8xf32>
    %14 = arith.subf %8, %13 : vector<128x8xf32>
    %15 = arith.mulf %14, %14 : vector<128x8xf32>
    %cst_10 = arith.constant dense<0.000000e+00> : vector<8xf32>
    %16 = vector.multi_reduction <add>, %15, %cst_10 [0] : vector<128x8xf32> to vector<8xf32>
    %17 = vector.shape_cast %16 : vector<8xf32> to vector<1x8xf32>
    %cst_11 = arith.constant 1.280000e+02 : f32
    %18 = vector.broadcast %cst_11 : f32 to vector<1x8xf32>
    %19 = arith.divf %17, %18 : vector<1x8xf32>
    %20 = vector.broadcast %12 : vector<1x8xf32> to vector<128x8xf32>
    %21 = arith.subf %8, %20 : vector<128x8xf32>
    %c0_12 = arith.constant 0 : index
    %c0_13 = arith.constant 0 : index
    %c0_14 = arith.constant 0 : index
    %22 = vector.load %arg4[%c0_12, %c0_13, %c0_14] : memref<1x1x8xf32, #tpu.memory_space<vmem>>, vector<1x1x8xf32>
    %23 = vector.shape_cast %22 : vector<1x1x8xf32> to vector<1x8xf32>
    %cst_15 = arith.constant 9.99999974E-6 : f32
    %24 = vector.broadcast %cst_15 : f32 to vector<1x8xf32>
    %25 = arith.addf %19, %24 : vector<1x8xf32>
    %26 = math.rsqrt %25 : vector<1x8xf32>
    %27 = arith.mulf %23, %26 : vector<1x8xf32>
    %28 = vector.broadcast %27 : vector<1x8xf32> to vector<128x8xf32>
    %29 = arith.mulf %21, %28 : vector<128x8xf32>
    %c0_16 = arith.constant 0 : index
    %c0_17 = arith.constant 0 : index
    %c0_18 = arith.constant 0 : index
    %30 = vector.load %arg5[%c0_16, %c0_17, %c0_18] : memref<1x1x8xf32, #tpu.memory_space<vmem>>, vector<1x1x8xf32>
    %31 = vector.shape_cast %30 : vector<1x1x8xf32> to vector<1x8xf32>
    %32 = vector.broadcast %31 : vector<1x8xf32> to vector<128x8xf32>
    %33 = arith.addf %29, %32 : vector<128x8xf32>
    %cst_19 = arith.constant 0.000000e+00 : f32
    %34 = vector.broadcast %cst_19 : f32 to vector<128x8xf32>
    %35 = arith.cmpf oge, %33, %34 : vector<128x8xf32>
    %cst_20 = arith.constant 2.000000e-01 : f32
    %36 = vector.broadcast %cst_20 : f32 to vector<128x8xf32>
    %37 = arith.mulf %36, %33 : vector<128x8xf32>
    %38 = arith.select %35, %33, %37 : vector<128x8xi1>, vector<128x8xf32>
    %c0_21 = arith.constant 0 : index
    %c0_22 = arith.constant 0 : index
    %c0_23 = arith.constant 0 : index
    %39 = vector.load %arg6[%c0_21, %c0_22, %c0_23] : memref<1x128x8xf32, #tpu.memory_space<vmem>>, vector<1x128x8xf32>
    %40 = vector.shape_cast %39 : vector<1x128x8xf32> to vector<128x8xf32>
    %41 = vector.shape_cast %38 : vector<128x8xf32> to vector<1x128x8xf32>
    tpu.vector_store %arg6[%c0_21, %c0_22, %c0_23], %41 {strides = array<i32>} : memref<1x128x8xf32, #tpu.memory_space<vmem>>, vector<1x128x8xf32>,
    return
  }
  func.func @transform_0(%arg0: i32) -> (i32, i32, i32) {
    %c0_i32 = arith.constant 0 : i32
    %c0_i32_0 = arith.constant 0 : i32
    %c0_i32_1 = arith.constant 0 : i32
    return %arg0, %c0_i32, %c0_i32_0 : i32, i32, i32
  }
  func.func @transform_1(%arg0: i32) -> (i32, i32, i32) {
    %c0_i32 = arith.constant 0 : i32
    %c0_i32_0 = arith.constant 0 : i32
    %c0_i32_1 = arith.constant 0 : i32
    return %arg0, %c0_i32, %c0_i32_0 : i32, i32, i32
  }
  func.func @transform_2(%arg0: i32) -> (i32, i32, i32) {
    %c0_i32 = arith.constant 0 : i32
    %c0_i32_0 = arith.constant 0 : i32
    %c0_i32_1 = arith.constant 0 : i32
    return %arg0, %c0_i32, %c0_i32_0 : i32, i32, i32
  }
  func.func @transform_3(%arg0: i32) -> (i32, i32, i32) {
    %c0_i32 = arith.constant 0 : i32
    %c0_i32_0 = arith.constant 0 : i32
    %c0_i32_1 = arith.constant 0 : i32
    return %arg0, %c0_i32, %c0_i32_0 : i32, i32, i32
  }
  func.func @transform_4(%arg0: i32) -> (i32, i32, i32) {
    %c0_i32 = arith.constant 0 : i32
    %c0_i32_0 = arith.constant 0 : i32
    %c0_i32_1 = arith.constant 0 : i32
    return %arg0, %c0_i32, %c0_i32_0 : i32, i32, i32
  }
  func.func @transform_5(%arg0: i32) -> (i32, i32, i32) {
    %c0_i32 = arith.constant 0 : i32
    %c0_i32_0 = arith.constant 0 : i32
    %c0_i32_1 = arith.constant 0 : i32
    return %arg0, %c0_i32, %c0_i32_0 : i32, i32, i32
  }
}

module attributes {stable_mosaic.version = 11 : i64} {
  func.func @_fused_conv_kernel(%arg0: i32, %arg1: memref<1x32x128xbf16, #tpu.memory_space<vmem>>, %arg2: memref<1x128x16xbf16, #tpu.memory_space<vmem>>, %arg3: memref<1x1x16xf32, #tpu.memory_space<vmem>>, %arg4: memref<1x1x16xf32, #tpu.memory_space<vmem>>, %arg5: memref<1x1x16xf32, #tpu.memory_space<vmem>>, %arg6: memref<1x32x16xf32, #tpu.memory_space<vmem>>) attributes {dimension_semantics = [#tpu.dimension_semantics<parallel>], iteration_bounds = array<i64: 1>, scalar_prefetch = 0 : i64, scratch_operands = 0 : i64, tpu.core_type = #tpu.core_type<tc>, window_params = [{transform_indices = @transform_0, window_bounds = array<i64: 1, 32, 128>}, {transform_indices = @transform_1, window_bounds = array<i64: 1, 128, 16>}, {transform_indices = @transform_2, window_bounds = array<i64: 1, 1, 16>}, {transform_indices = @transform_3, window_bounds = array<i64: 1, 1, 16>}, {transform_indices = @transform_4, window_bounds = array<i64: 1, 1, 16>}, {transform_indices = @transform_5, window_bounds = array<i64: 1, 32, 16>}]} {
    %c0 = arith.constant 0 : index
    %c0_0 = arith.constant 0 : index
    %c0_1 = arith.constant 0 : index
    %0 = vector.load %arg1[%c0, %c0_0, %c0_1] : memref<1x32x128xbf16, #tpu.memory_space<vmem>>, vector<1x32x128xbf16>
    %1 = vector.shape_cast %0 : vector<1x32x128xbf16> to vector<32x128xbf16>
    %c0_2 = arith.constant 0 : index
    %c0_3 = arith.constant 0 : index
    %c0_4 = arith.constant 0 : index
    %2 = vector.load %arg2[%c0_2, %c0_3, %c0_4] : memref<1x128x16xbf16, #tpu.memory_space<vmem>>, vector<1x128x16xbf16>
    %3 = vector.shape_cast %2 : vector<1x128x16xbf16> to vector<128x16xbf16>
    %cst = arith.constant dense<0.000000e+00> : vector<32x16xf32>
    %4 = tpu.matmul %1, %3, %cst {dimension_numbers = #tpu.dot_dimension_numbers<[1], [0], [0], [1], [0, 0, 1, 1], [], []>} : vector<32x128xbf16>, vector<128x16xbf16>, vector<32x16xf32> -> vector<32x16xf32>
    %c0_5 = arith.constant 0 : index
    %c0_6 = arith.constant 0 : index
    %c0_7 = arith.constant 0 : index
    %5 = vector.load %arg3[%c0_5, %c0_6, %c0_7] : memref<1x1x16xf32, #tpu.memory_space<vmem>>, vector<1x1x16xf32>
    %6 = vector.shape_cast %5 : vector<1x1x16xf32> to vector<1x16xf32>
    %7 = vector.broadcast %6 : vector<1x16xf32> to vector<32x16xf32>
    %8 = arith.addf %4, %7 : vector<32x16xf32>
    %cst_8 = arith.constant dense<0.000000e+00> : vector<16xf32>
    %9 = vector.multi_reduction <add>, %8, %cst_8 [0] : vector<32x16xf32> to vector<16xf32>
    %10 = vector.shape_cast %9 : vector<16xf32> to vector<1x16xf32>
    %cst_9 = arith.constant 3.200000e+01 : f32
    %11 = vector.broadcast %cst_9 : f32 to vector<1x16xf32>
    %12 = arith.divf %10, %11 : vector<1x16xf32>
    %13 = vector.broadcast %12 : vector<1x16xf32> to vector<32x16xf32>
    %14 = arith.subf %8, %13 : vector<32x16xf32>
    %15 = arith.mulf %14, %14 : vector<32x16xf32>
    %cst_10 = arith.constant dense<0.000000e+00> : vector<16xf32>
    %16 = vector.multi_reduction <add>, %15, %cst_10 [0] : vector<32x16xf32> to vector<16xf32>
    %17 = vector.shape_cast %16 : vector<16xf32> to vector<1x16xf32>
    %cst_11 = arith.constant 3.200000e+01 : f32
    %18 = vector.broadcast %cst_11 : f32 to vector<1x16xf32>
    %19 = arith.divf %17, %18 : vector<1x16xf32>
    %20 = vector.broadcast %12 : vector<1x16xf32> to vector<32x16xf32>
    %21 = arith.subf %8, %20 : vector<32x16xf32>
    %c0_12 = arith.constant 0 : index
    %c0_13 = arith.constant 0 : index
    %c0_14 = arith.constant 0 : index
    %22 = vector.load %arg4[%c0_12, %c0_13, %c0_14] : memref<1x1x16xf32, #tpu.memory_space<vmem>>, vector<1x1x16xf32>
    %23 = vector.shape_cast %22 : vector<1x1x16xf32> to vector<1x16xf32>
    %cst_15 = arith.constant 9.99999974E-6 : f32
    %24 = vector.broadcast %cst_15 : f32 to vector<1x16xf32>
    %25 = arith.addf %19, %24 : vector<1x16xf32>
    %26 = math.rsqrt %25 : vector<1x16xf32>
    %27 = arith.mulf %23, %26 : vector<1x16xf32>
    %28 = vector.broadcast %27 : vector<1x16xf32> to vector<32x16xf32>
    %29 = arith.mulf %21, %28 : vector<32x16xf32>
    %c0_16 = arith.constant 0 : index
    %c0_17 = arith.constant 0 : index
    %c0_18 = arith.constant 0 : index
    %30 = vector.load %arg5[%c0_16, %c0_17, %c0_18] : memref<1x1x16xf32, #tpu.memory_space<vmem>>, vector<1x1x16xf32>
    %31 = vector.shape_cast %30 : vector<1x1x16xf32> to vector<1x16xf32>
    %32 = vector.broadcast %31 : vector<1x16xf32> to vector<32x16xf32>
    %33 = arith.addf %29, %32 : vector<32x16xf32>
    %cst_19 = arith.constant 0.000000e+00 : f32
    %34 = vector.broadcast %cst_19 : f32 to vector<32x16xf32>
    %35 = arith.cmpf oge, %33, %34 : vector<32x16xf32>
    %cst_20 = arith.constant 2.000000e-01 : f32
    %36 = vector.broadcast %cst_20 : f32 to vector<32x16xf32>
    %37 = arith.mulf %36, %33 : vector<32x16xf32>
    %38 = arith.select %35, %33, %37 : vector<32x16xi1>, vector<32x16xf32>
    %c0_21 = arith.constant 0 : index
    %c0_22 = arith.constant 0 : index
    %c0_23 = arith.constant 0 : index
    %39 = vector.load %arg6[%c0_21, %c0_22, %c0_23] : memref<1x32x16xf32, #tpu.memory_space<vmem>>, vector<1x32x16xf32>
    %40 = vector.shape_cast %39 : vector<1x32x16xf32> to vector<32x16xf32>
    %41 = vector.shape_cast %38 : vector<32x16xf32> to vector<1x32x16xf32>
    tpu.vector_store %arg6[%c0_21, %c0_22, %c0_23], %41 {strides = array<i32>} : memref<1x32x16xf32, #tpu.memory_space<vmem>>, vector<1x32x16xf32>,
    return
  }
  func.func @transform_0(%arg0: i32) -> (i32, i32, i32) {
    %c0_i32 = arith.constant 0 : i32
    %c0_i32_0 = arith.constant 0 : i32
    %c0_i32_1 = arith.constant 0 : i32
    return %arg0, %c0_i32, %c0_i32_0 : i32, i32, i32
  }
  func.func @transform_1(%arg0: i32) -> (i32, i32, i32) {
    %c0_i32 = arith.constant 0 : i32
    %c0_i32_0 = arith.constant 0 : i32
    %c0_i32_1 = arith.constant 0 : i32
    return %arg0, %c0_i32, %c0_i32_0 : i32, i32, i32
  }
  func.func @transform_2(%arg0: i32) -> (i32, i32, i32) {
    %c0_i32 = arith.constant 0 : i32
    %c0_i32_0 = arith.constant 0 : i32
    %c0_i32_1 = arith.constant 0 : i32
    return %arg0, %c0_i32, %c0_i32_0 : i32, i32, i32
  }
  func.func @transform_3(%arg0: i32) -> (i32, i32, i32) {
    %c0_i32 = arith.constant 0 : i32
    %c0_i32_0 = arith.constant 0 : i32
    %c0_i32_1 = arith.constant 0 : i32
    return %arg0, %c0_i32, %c0_i32_0 : i32, i32, i32
  }
  func.func @transform_4(%arg0: i32) -> (i32, i32, i32) {
    %c0_i32 = arith.constant 0 : i32
    %c0_i32_0 = arith.constant 0 : i32
    %c0_i32_1 = arith.constant 0 : i32
    return %arg0, %c0_i32, %c0_i32_0 : i32, i32, i32
  }
  func.func @transform_5(%arg0: i32) -> (i32, i32, i32) {
    %c0_i32 = arith.constant 0 : i32
    %c0_i32_0 = arith.constant 0 : i32
    %c0_i32_1 = arith.constant 0 : i32
    return %arg0, %c0_i32, %c0_i32_0 : i32, i32, i32
  }
}

module attributes {stable_mosaic.version = 11 : i64} {
  func.func @_fused_conv_kernel(%arg0: i32, %arg1: memref<1x8x256xbf16, #tpu.memory_space<vmem>>, %arg2: memref<1x256x32xbf16, #tpu.memory_space<vmem>>, %arg3: memref<1x1x32xf32, #tpu.memory_space<vmem>>, %arg4: memref<1x1x32xf32, #tpu.memory_space<vmem>>, %arg5: memref<1x1x32xf32, #tpu.memory_space<vmem>>, %arg6: memref<1x8x32xf32, #tpu.memory_space<vmem>>) attributes {dimension_semantics = [#tpu.dimension_semantics<parallel>], iteration_bounds = array<i64: 1>, scalar_prefetch = 0 : i64, scratch_operands = 0 : i64, tpu.core_type = #tpu.core_type<tc>, window_params = [{transform_indices = @transform_0, window_bounds = array<i64: 1, 8, 256>}, {transform_indices = @transform_1, window_bounds = array<i64: 1, 256, 32>}, {transform_indices = @transform_2, window_bounds = array<i64: 1, 1, 32>}, {transform_indices = @transform_3, window_bounds = array<i64: 1, 1, 32>}, {transform_indices = @transform_4, window_bounds = array<i64: 1, 1, 32>}, {transform_indices = @transform_5, window_bounds = array<i64: 1, 8, 32>}]} {
    %c0 = arith.constant 0 : index
    %c0_0 = arith.constant 0 : index
    %c0_1 = arith.constant 0 : index
    %0 = vector.load %arg1[%c0, %c0_0, %c0_1] : memref<1x8x256xbf16, #tpu.memory_space<vmem>>, vector<1x8x256xbf16>
    %1 = vector.shape_cast %0 : vector<1x8x256xbf16> to vector<8x256xbf16>
    %c0_2 = arith.constant 0 : index
    %c0_3 = arith.constant 0 : index
    %c0_4 = arith.constant 0 : index
    %2 = vector.load %arg2[%c0_2, %c0_3, %c0_4] : memref<1x256x32xbf16, #tpu.memory_space<vmem>>, vector<1x256x32xbf16>
    %3 = vector.shape_cast %2 : vector<1x256x32xbf16> to vector<256x32xbf16>
    %cst = arith.constant dense<0.000000e+00> : vector<8x32xf32>
    %4 = tpu.matmul %1, %3, %cst {dimension_numbers = #tpu.dot_dimension_numbers<[1], [0], [0], [1], [0, 0, 1, 1], [], []>} : vector<8x256xbf16>, vector<256x32xbf16>, vector<8x32xf32> -> vector<8x32xf32>
    %c0_5 = arith.constant 0 : index
    %c0_6 = arith.constant 0 : index
    %c0_7 = arith.constant 0 : index
    %5 = vector.load %arg3[%c0_5, %c0_6, %c0_7] : memref<1x1x32xf32, #tpu.memory_space<vmem>>, vector<1x1x32xf32>
    %6 = vector.shape_cast %5 : vector<1x1x32xf32> to vector<1x32xf32>
    %7 = vector.broadcast %6 : vector<1x32xf32> to vector<8x32xf32>
    %8 = arith.addf %4, %7 : vector<8x32xf32>
    %cst_8 = arith.constant dense<0.000000e+00> : vector<32xf32>
    %9 = vector.multi_reduction <add>, %8, %cst_8 [0] : vector<8x32xf32> to vector<32xf32>
    %10 = vector.shape_cast %9 : vector<32xf32> to vector<1x32xf32>
    %cst_9 = arith.constant 8.000000e+00 : f32
    %11 = vector.broadcast %cst_9 : f32 to vector<1x32xf32>
    %12 = arith.divf %10, %11 : vector<1x32xf32>
    %13 = vector.broadcast %12 : vector<1x32xf32> to vector<8x32xf32>
    %14 = arith.subf %8, %13 : vector<8x32xf32>
    %15 = arith.mulf %14, %14 : vector<8x32xf32>
    %cst_10 = arith.constant dense<0.000000e+00> : vector<32xf32>
    %16 = vector.multi_reduction <add>, %15, %cst_10 [0] : vector<8x32xf32> to vector<32xf32>
    %17 = vector.shape_cast %16 : vector<32xf32> to vector<1x32xf32>
    %cst_11 = arith.constant 8.000000e+00 : f32
    %18 = vector.broadcast %cst_11 : f32 to vector<1x32xf32>
    %19 = arith.divf %17, %18 : vector<1x32xf32>
    %20 = vector.broadcast %12 : vector<1x32xf32> to vector<8x32xf32>
    %21 = arith.subf %8, %20 : vector<8x32xf32>
    %c0_12 = arith.constant 0 : index
    %c0_13 = arith.constant 0 : index
    %c0_14 = arith.constant 0 : index
    %22 = vector.load %arg4[%c0_12, %c0_13, %c0_14] : memref<1x1x32xf32, #tpu.memory_space<vmem>>, vector<1x1x32xf32>
    %23 = vector.shape_cast %22 : vector<1x1x32xf32> to vector<1x32xf32>
    %cst_15 = arith.constant 9.99999974E-6 : f32
    %24 = vector.broadcast %cst_15 : f32 to vector<1x32xf32>
    %25 = arith.addf %19, %24 : vector<1x32xf32>
    %26 = math.rsqrt %25 : vector<1x32xf32>
    %27 = arith.mulf %23, %26 : vector<1x32xf32>
    %28 = vector.broadcast %27 : vector<1x32xf32> to vector<8x32xf32>
    %29 = arith.mulf %21, %28 : vector<8x32xf32>
    %c0_16 = arith.constant 0 : index
    %c0_17 = arith.constant 0 : index
    %c0_18 = arith.constant 0 : index
    %30 = vector.load %arg5[%c0_16, %c0_17, %c0_18] : memref<1x1x32xf32, #tpu.memory_space<vmem>>, vector<1x1x32xf32>
    %31 = vector.shape_cast %30 : vector<1x1x32xf32> to vector<1x32xf32>
    %32 = vector.broadcast %31 : vector<1x32xf32> to vector<8x32xf32>
    %33 = arith.addf %29, %32 : vector<8x32xf32>
    %cst_19 = arith.constant 0.000000e+00 : f32
    %34 = vector.broadcast %cst_19 : f32 to vector<8x32xf32>
    %35 = arith.cmpf oge, %33, %34 : vector<8x32xf32>
    %cst_20 = arith.constant 2.000000e-01 : f32
    %36 = vector.broadcast %cst_20 : f32 to vector<8x32xf32>
    %37 = arith.mulf %36, %33 : vector<8x32xf32>
    %38 = arith.select %35, %33, %37 : vector<8x32xi1>, vector<8x32xf32>
    %c0_21 = arith.constant 0 : index
    %c0_22 = arith.constant 0 : index
    %c0_23 = arith.constant 0 : index
    %39 = vector.load %arg6[%c0_21, %c0_22, %c0_23] : memref<1x8x32xf32, #tpu.memory_space<vmem>>, vector<1x8x32xf32>
    %40 = vector.shape_cast %39 : vector<1x8x32xf32> to vector<8x32xf32>
    %41 = vector.shape_cast %38 : vector<8x32xf32> to vector<1x8x32xf32>
    tpu.vector_store %arg6[%c0_21, %c0_22, %c0_23], %41 {strides = array<i32>} : memref<1x8x32xf32, #tpu.memory_space<vmem>>, vector<1x8x32xf32>,
    return
  }
  func.func @transform_0(%arg0: i32) -> (i32, i32, i32) {
    %c0_i32 = arith.constant 0 : i32
    %c0_i32_0 = arith.constant 0 : i32
    %c0_i32_1 = arith.constant 0 : i32
    return %arg0, %c0_i32, %c0_i32_0 : i32, i32, i32
  }
  func.func @transform_1(%arg0: i32) -> (i32, i32, i32) {
    %c0_i32 = arith.constant 0 : i32
    %c0_i32_0 = arith.constant 0 : i32
    %c0_i32_1 = arith.constant 0 : i32
    return %arg0, %c0_i32, %c0_i32_0 : i32, i32, i32
  }
  func.func @transform_2(%arg0: i32) -> (i32, i32, i32) {
    %c0_i32 = arith.constant 0 : i32
    %c0_i32_0 = arith.constant 0 : i32
    %c0_i32_1 = arith.constant 0 : i32
    return %arg0, %c0_i32, %c0_i32_0 : i32, i32, i32
  }
  func.func @transform_3(%arg0: i32) -> (i32, i32, i32) {
    %c0_i32 = arith.constant 0 : i32
    %c0_i32_0 = arith.constant 0 : i32
    %c0_i32_1 = arith.constant 0 : i32
    return %arg0, %c0_i32, %c0_i32_0 : i32, i32, i32
  }
  func.func @transform_4(%arg0: i32) -> (i32, i32, i32) {
    %c0_i32 = arith.constant 0 : i32
    %c0_i32_0 = arith.constant 0 : i32
    %c0_i32_1 = arith.constant 0 : i32
    return %arg0, %c0_i32, %c0_i32_0 : i32, i32, i32
  }
  func.func @transform_5(%arg0: i32) -> (i32, i32, i32) {
    %c0_i32 = arith.constant 0 : i32
    %c0_i32_0 = arith.constant 0 : i32
    %c0_i32_1 = arith.constant 0 : i32
    return %arg0, %c0_i32, %c0_i32_0 : i32, i32, i32
  }
}

module attributes {stable_mosaic.version = 11 : i64} {
  func.func @_fused_conv_kernel(%arg0: i32, %arg1: memref<1x32x512xbf16, #tpu.memory_space<vmem>>, %arg2: memref<1x512x16xbf16, #tpu.memory_space<vmem>>, %arg3: memref<1x1x16xf32, #tpu.memory_space<vmem>>, %arg4: memref<1x1x16xf32, #tpu.memory_space<vmem>>, %arg5: memref<1x1x16xf32, #tpu.memory_space<vmem>>, %arg6: memref<1x32x16xf32, #tpu.memory_space<vmem>>) attributes {dimension_semantics = [#tpu.dimension_semantics<parallel>], iteration_bounds = array<i64: 3>, scalar_prefetch = 0 : i64, scratch_operands = 0 : i64, tpu.core_type = #tpu.core_type<tc>, window_params = [{pipeline_mode = #tpu.pipeline_mode<synchronous>, transform_indices = @transform_0, window_bounds = array<i64: 1, 32, 512>}, {transform_indices = @transform_1, window_bounds = array<i64: 1, 512, 16>}, {transform_indices = @transform_2, window_bounds = array<i64: 1, 1, 16>}, {transform_indices = @transform_3, window_bounds = array<i64: 1, 1, 16>}, {transform_indices = @transform_4, window_bounds = array<i64: 1, 1, 16>}, {transform_indices = @transform_5, window_bounds = array<i64: 1, 32, 16>}]} {
    %c0 = arith.constant 0 : index
    %c0_0 = arith.constant 0 : index
    %c0_1 = arith.constant 0 : index
    %0 = vector.load %arg1[%c0, %c0_0, %c0_1] : memref<1x32x512xbf16, #tpu.memory_space<vmem>>, vector<1x32x512xbf16>
    %1 = vector.shape_cast %0 : vector<1x32x512xbf16> to vector<32x512xbf16>
    %cst = arith.constant 0.000000e+00 : bf16
    %2 = vector.broadcast %cst : bf16 to vector<32x512xbf16>
    %3 = arith.maximumf %1, %2 : vector<32x512xbf16>
    %c0_2 = arith.constant 0 : index
    %c0_3 = arith.constant 0 : index
    %c0_4 = arith.constant 0 : index
    %4 = vector.load %arg2[%c0_2, %c0_3, %c0_4] : memref<1x512x16xbf16, #tpu.memory_space<vmem>>, vector<1x512x16xbf16>
    %5 = vector.shape_cast %4 : vector<1x512x16xbf16> to vector<512x16xbf16>
    %cst_5 = arith.constant dense<0.000000e+00> : vector<32x16xf32>
    %6 = tpu.matmul %3, %5, %cst_5 {dimension_numbers = #tpu.dot_dimension_numbers<[1], [0], [0], [1], [0, 0, 1, 1], [], []>} : vector<32x512xbf16>, vector<512x16xbf16>, vector<32x16xf32> -> vector<32x16xf32>
    %c0_6 = arith.constant 0 : index
    %c0_7 = arith.constant 0 : index
    %c0_8 = arith.constant 0 : index
    %7 = vector.load %arg3[%c0_6, %c0_7, %c0_8] : memref<1x1x16xf32, #tpu.memory_space<vmem>>, vector<1x1x16xf32>
    %8 = vector.shape_cast %7 : vector<1x1x16xf32> to vector<1x16xf32>
    %9 = vector.broadcast %8 : vector<1x16xf32> to vector<32x16xf32>
    %10 = arith.addf %6, %9 : vector<32x16xf32>
    %cst_9 = arith.constant dense<0.000000e+00> : vector<16xf32>
    %11 = vector.multi_reduction <add>, %10, %cst_9 [0] : vector<32x16xf32> to vector<16xf32>
    %12 = vector.shape_cast %11 : vector<16xf32> to vector<1x16xf32>
    %cst_10 = arith.constant 3.200000e+01 : f32
    %13 = vector.broadcast %cst_10 : f32 to vector<1x16xf32>
    %14 = arith.divf %12, %13 : vector<1x16xf32>
    %15 = vector.broadcast %14 : vector<1x16xf32> to vector<32x16xf32>
    %16 = arith.subf %10, %15 : vector<32x16xf32>
    %17 = arith.mulf %16, %16 : vector<32x16xf32>
    %cst_11 = arith.constant dense<0.000000e+00> : vector<16xf32>
    %18 = vector.multi_reduction <add>, %17, %cst_11 [0] : vector<32x16xf32> to vector<16xf32>
    %19 = vector.shape_cast %18 : vector<16xf32> to vector<1x16xf32>
    %cst_12 = arith.constant 3.200000e+01 : f32
    %20 = vector.broadcast %cst_12 : f32 to vector<1x16xf32>
    %21 = arith.divf %19, %20 : vector<1x16xf32>
    %22 = vector.broadcast %14 : vector<1x16xf32> to vector<32x16xf32>
    %23 = arith.subf %10, %22 : vector<32x16xf32>
    %c0_13 = arith.constant 0 : index
    %c0_14 = arith.constant 0 : index
    %c0_15 = arith.constant 0 : index
    %24 = vector.load %arg4[%c0_13, %c0_14, %c0_15] : memref<1x1x16xf32, #tpu.memory_space<vmem>>, vector<1x1x16xf32>
    %25 = vector.shape_cast %24 : vector<1x1x16xf32> to vector<1x16xf32>
    %cst_16 = arith.constant 9.99999974E-6 : f32
    %26 = vector.broadcast %cst_16 : f32 to vector<1x16xf32>
    %27 = arith.addf %21, %26 : vector<1x16xf32>
    %28 = math.rsqrt %27 : vector<1x16xf32>
    %29 = arith.mulf %25, %28 : vector<1x16xf32>
    %30 = vector.broadcast %29 : vector<1x16xf32> to vector<32x16xf32>
    %31 = arith.mulf %23, %30 : vector<32x16xf32>
    %c0_17 = arith.constant 0 : index
    %c0_18 = arith.constant 0 : index
    %c0_19 = arith.constant 0 : index
    %32 = vector.load %arg5[%c0_17, %c0_18, %c0_19] : memref<1x1x16xf32, #tpu.memory_space<vmem>>, vector<1x1x16xf32>
    %33 = vector.shape_cast %32 : vector<1x1x16xf32> to vector<1x16xf32>
    %34 = vector.broadcast %33 : vector<1x16xf32> to vector<32x16xf32>
    %35 = arith.addf %31, %34 : vector<32x16xf32>
    %c0_20 = arith.constant 0 : index
    %c0_21 = arith.constant 0 : index
    %c0_22 = arith.constant 0 : index
    %36 = vector.load %arg6[%c0_20, %c0_21, %c0_22] : memref<1x32x16xf32, #tpu.memory_space<vmem>>, vector<1x32x16xf32>
    %37 = vector.shape_cast %36 : vector<1x32x16xf32> to vector<32x16xf32>
    %38 = vector.shape_cast %35 : vector<32x16xf32> to vector<1x32x16xf32>
    tpu.vector_store %arg6[%c0_20, %c0_21, %c0_22], %38 {strides = array<i32>} : memref<1x32x16xf32, #tpu.memory_space<vmem>>, vector<1x32x16xf32>,
    return
  }
  func.func @transform_0(%arg0: i32) -> (i32, i32, i32) {
    %c0_i32 = arith.constant 0 : i32
    %c0_i32_0 = arith.constant 0 : i32
    %c0_i32_1 = arith.constant 0 : i32
    %c0_i32_2 = arith.constant 0 : i32
    return %c0_i32, %c0_i32_0, %c0_i32_1 : i32, i32, i32
  }
  func.func @transform_1(%arg0: i32) -> (i32, i32, i32) {
    %c0_i32 = arith.constant 0 : i32
    %c0_i32_0 = arith.constant 0 : i32
    %c0_i32_1 = arith.constant 0 : i32
    return %arg0, %c0_i32, %c0_i32_0 : i32, i32, i32
  }
  func.func @transform_2(%arg0: i32) -> (i32, i32, i32) {
    %c0_i32 = arith.constant 0 : i32
    %c0_i32_0 = arith.constant 0 : i32
    %c0_i32_1 = arith.constant 0 : i32
    return %arg0, %c0_i32, %c0_i32_0 : i32, i32, i32
  }
  func.func @transform_3(%arg0: i32) -> (i32, i32, i32) {
    %c0_i32 = arith.constant 0 : i32
    %c0_i32_0 = arith.constant 0 : i32
    %c0_i32_1 = arith.constant 0 : i32
    return %arg0, %c0_i32, %c0_i32_0 : i32, i32, i32
  }
  func.func @transform_4(%arg0: i32) -> (i32, i32, i32) {
    %c0_i32 = arith.constant 0 : i32
    %c0_i32_0 = arith.constant 0 : i32
    %c0_i32_1 = arith.constant 0 : i32
    return %arg0, %c0_i32, %c0_i32_0 : i32, i32, i32
  }
  func.func @transform_5(%arg0: i32) -> (i32, i32, i32) {
    %c0_i32 = arith.constant 0 : i32
    %c0_i32_0 = arith.constant 0 : i32
    %c0_i32_1 = arith.constant 0 : i32
    return %arg0, %c0_i32, %c0_i32_0 : i32, i32, i32
  }
}

module attributes {stable_mosaic.version = 11 : i64} {
  func.func @_fused_conv_kernel(%arg0: i32, %arg1: memref<1x128x512xbf16, #tpu.memory_space<vmem>>, %arg2: memref<1x512x8xbf16, #tpu.memory_space<vmem>>, %arg3: memref<1x1x8xf32, #tpu.memory_space<vmem>>, %arg4: memref<1x1x8xf32, #tpu.memory_space<vmem>>, %arg5: memref<1x1x8xf32, #tpu.memory_space<vmem>>, %arg6: memref<1x128x8xf32, #tpu.memory_space<vmem>>) attributes {dimension_semantics = [#tpu.dimension_semantics<parallel>], iteration_bounds = array<i64: 3>, scalar_prefetch = 0 : i64, scratch_operands = 0 : i64, tpu.core_type = #tpu.core_type<tc>, window_params = [{transform_indices = @transform_0, window_bounds = array<i64: 1, 128, 512>}, {transform_indices = @transform_1, window_bounds = array<i64: 1, 512, 8>}, {transform_indices = @transform_2, window_bounds = array<i64: 1, 1, 8>}, {transform_indices = @transform_3, window_bounds = array<i64: 1, 1, 8>}, {transform_indices = @transform_4, window_bounds = array<i64: 1, 1, 8>}, {transform_indices = @transform_5, window_bounds = array<i64: 1, 128, 8>}]} {
    %c0 = arith.constant 0 : index
    %c0_0 = arith.constant 0 : index
    %c0_1 = arith.constant 0 : index
    %0 = vector.load %arg1[%c0, %c0_0, %c0_1] : memref<1x128x512xbf16, #tpu.memory_space<vmem>>, vector<1x128x512xbf16>
    %1 = vector.shape_cast %0 : vector<1x128x512xbf16> to vector<128x512xbf16>
    %cst = arith.constant 0.000000e+00 : bf16
    %2 = vector.broadcast %cst : bf16 to vector<128x512xbf16>
    %3 = arith.maximumf %1, %2 : vector<128x512xbf16>
    %c0_2 = arith.constant 0 : index
    %c0_3 = arith.constant 0 : index
    %c0_4 = arith.constant 0 : index
    %4 = vector.load %arg2[%c0_2, %c0_3, %c0_4] : memref<1x512x8xbf16, #tpu.memory_space<vmem>>, vector<1x512x8xbf16>
    %5 = vector.shape_cast %4 : vector<1x512x8xbf16> to vector<512x8xbf16>
    %cst_5 = arith.constant dense<0.000000e+00> : vector<128x8xf32>
    %6 = tpu.matmul %3, %5, %cst_5 {dimension_numbers = #tpu.dot_dimension_numbers<[1], [0], [0], [1], [0, 0, 1, 1], [], []>} : vector<128x512xbf16>, vector<512x8xbf16>, vector<128x8xf32> -> vector<128x8xf32>
    %c0_6 = arith.constant 0 : index
    %c0_7 = arith.constant 0 : index
    %c0_8 = arith.constant 0 : index
    %7 = vector.load %arg3[%c0_6, %c0_7, %c0_8] : memref<1x1x8xf32, #tpu.memory_space<vmem>>, vector<1x1x8xf32>
    %8 = vector.shape_cast %7 : vector<1x1x8xf32> to vector<1x8xf32>
    %9 = vector.broadcast %8 : vector<1x8xf32> to vector<128x8xf32>
    %10 = arith.addf %6, %9 : vector<128x8xf32>
    %cst_9 = arith.constant dense<0.000000e+00> : vector<8xf32>
    %11 = vector.multi_reduction <add>, %10, %cst_9 [0] : vector<128x8xf32> to vector<8xf32>
    %12 = vector.shape_cast %11 : vector<8xf32> to vector<1x8xf32>
    %cst_10 = arith.constant 1.280000e+02 : f32
    %13 = vector.broadcast %cst_10 : f32 to vector<1x8xf32>
    %14 = arith.divf %12, %13 : vector<1x8xf32>
    %15 = vector.broadcast %14 : vector<1x8xf32> to vector<128x8xf32>
    %16 = arith.subf %10, %15 : vector<128x8xf32>
    %17 = arith.mulf %16, %16 : vector<128x8xf32>
    %cst_11 = arith.constant dense<0.000000e+00> : vector<8xf32>
    %18 = vector.multi_reduction <add>, %17, %cst_11 [0] : vector<128x8xf32> to vector<8xf32>
    %19 = vector.shape_cast %18 : vector<8xf32> to vector<1x8xf32>
    %cst_12 = arith.constant 1.280000e+02 : f32
    %20 = vector.broadcast %cst_12 : f32 to vector<1x8xf32>
    %21 = arith.divf %19, %20 : vector<1x8xf32>
    %22 = vector.broadcast %14 : vector<1x8xf32> to vector<128x8xf32>
    %23 = arith.subf %10, %22 : vector<128x8xf32>
    %c0_13 = arith.constant 0 : index
    %c0_14 = arith.constant 0 : index
    %c0_15 = arith.constant 0 : index
    %24 = vector.load %arg4[%c0_13, %c0_14, %c0_15] : memref<1x1x8xf32, #tpu.memory_space<vmem>>, vector<1x1x8xf32>
    %25 = vector.shape_cast %24 : vector<1x1x8xf32> to vector<1x8xf32>
    %cst_16 = arith.constant 9.99999974E-6 : f32
    %26 = vector.broadcast %cst_16 : f32 to vector<1x8xf32>
    %27 = arith.addf %21, %26 : vector<1x8xf32>
    %28 = math.rsqrt %27 : vector<1x8xf32>
    %29 = arith.mulf %25, %28 : vector<1x8xf32>
    %30 = vector.broadcast %29 : vector<1x8xf32> to vector<128x8xf32>
    %31 = arith.mulf %23, %30 : vector<128x8xf32>
    %c0_17 = arith.constant 0 : index
    %c0_18 = arith.constant 0 : index
    %c0_19 = arith.constant 0 : index
    %32 = vector.load %arg5[%c0_17, %c0_18, %c0_19] : memref<1x1x8xf32, #tpu.memory_space<vmem>>, vector<1x1x8xf32>
    %33 = vector.shape_cast %32 : vector<1x1x8xf32> to vector<1x8xf32>
    %34 = vector.broadcast %33 : vector<1x8xf32> to vector<128x8xf32>
    %35 = arith.addf %31, %34 : vector<128x8xf32>
    %c0_20 = arith.constant 0 : index
    %c0_21 = arith.constant 0 : index
    %c0_22 = arith.constant 0 : index
    %36 = vector.load %arg6[%c0_20, %c0_21, %c0_22] : memref<1x128x8xf32, #tpu.memory_space<vmem>>, vector<1x128x8xf32>
    %37 = vector.shape_cast %36 : vector<1x128x8xf32> to vector<128x8xf32>
    %38 = vector.shape_cast %35 : vector<128x8xf32> to vector<1x128x8xf32>
    tpu.vector_store %arg6[%c0_20, %c0_21, %c0_22], %38 {strides = array<i32>} : memref<1x128x8xf32, #tpu.memory_space<vmem>>, vector<1x128x8xf32>,
    return
  }
  func.func @transform_0(%arg0: i32) -> (i32, i32, i32) {
    %c0_i32 = arith.constant 0 : i32
    %c0_i32_0 = arith.constant 0 : i32
    %c0_i32_1 = arith.constant 0 : i32
    return %arg0, %c0_i32, %c0_i32_0 : i32, i32, i32
  }
  func.func @transform_1(%arg0: i32) -> (i32, i32, i32) {
    %c0_i32 = arith.constant 0 : i32
    %c0_i32_0 = arith.constant 0 : i32
    %c0_i32_1 = arith.constant 0 : i32
    return %arg0, %c0_i32, %c0_i32_0 : i32, i32, i32
  }
  func.func @transform_2(%arg0: i32) -> (i32, i32, i32) {
    %c0_i32 = arith.constant 0 : i32
    %c0_i32_0 = arith.constant 0 : i32
    %c0_i32_1 = arith.constant 0 : i32
    return %arg0, %c0_i32, %c0_i32_0 : i32, i32, i32
  }
  func.func @transform_3(%arg0: i32) -> (i32, i32, i32) {
    %c0_i32 = arith.constant 0 : i32
    %c0_i32_0 = arith.constant 0 : i32
    %c0_i32_1 = arith.constant 0 : i32
    return %arg0, %c0_i32, %c0_i32_0 : i32, i32, i32
  }
  func.func @transform_4(%arg0: i32) -> (i32, i32, i32) {
    %c0_i32 = arith.constant 0 : i32
    %c0_i32_0 = arith.constant 0 : i32
    %c0_i32_1 = arith.constant 0 : i32
    return %arg0, %c0_i32, %c0_i32_0 : i32, i32, i32
  }
  func.func @transform_5(%arg0: i32) -> (i32, i32, i32) {
    %c0_i32 = arith.constant 0 : i32
    %c0_i32_0 = arith.constant 0 : i32
    %c0_i32_1 = arith.constant 0 : i32
    return %arg0, %c0_i32, %c0_i32_0 : i32, i32, i32
  }
}

module attributes {stable_mosaic.version = 11 : i64} {
  func.func @_fused_conv_kernel(%arg0: i32, %arg1: memref<1x512x256xbf16, #tpu.memory_space<vmem>>, %arg2: memref<1x256x2xbf16, #tpu.memory_space<vmem>>, %arg3: memref<1x1x2xf32, #tpu.memory_space<vmem>>, %arg4: memref<1x1x2xf32, #tpu.memory_space<vmem>>, %arg5: memref<1x1x2xf32, #tpu.memory_space<vmem>>, %arg6: memref<1x512x2xf32, #tpu.memory_space<vmem>>) attributes {dimension_semantics = [#tpu.dimension_semantics<parallel>], iteration_bounds = array<i64: 3>, scalar_prefetch = 0 : i64, scratch_operands = 0 : i64, tpu.core_type = #tpu.core_type<tc>, window_params = [{transform_indices = @transform_0, window_bounds = array<i64: 1, 512, 256>}, {transform_indices = @transform_1, window_bounds = array<i64: 1, 256, 2>}, {transform_indices = @transform_2, window_bounds = array<i64: 1, 1, 2>}, {transform_indices = @transform_3, window_bounds = array<i64: 1, 1, 2>}, {transform_indices = @transform_4, window_bounds = array<i64: 1, 1, 2>}, {transform_indices = @transform_5, window_bounds = array<i64: 1, 512, 2>}]} {
    %c0 = arith.constant 0 : index
    %c0_0 = arith.constant 0 : index
    %c0_1 = arith.constant 0 : index
    %0 = vector.load %arg1[%c0, %c0_0, %c0_1] : memref<1x512x256xbf16, #tpu.memory_space<vmem>>, vector<1x512x256xbf16>
    %1 = vector.shape_cast %0 : vector<1x512x256xbf16> to vector<512x256xbf16>
    %cst = arith.constant 0.000000e+00 : bf16
    %2 = vector.broadcast %cst : bf16 to vector<512x256xbf16>
    %3 = arith.maximumf %1, %2 : vector<512x256xbf16>
    %c0_2 = arith.constant 0 : index
    %c0_3 = arith.constant 0 : index
    %c0_4 = arith.constant 0 : index
    %4 = vector.load %arg2[%c0_2, %c0_3, %c0_4] : memref<1x256x2xbf16, #tpu.memory_space<vmem>>, vector<1x256x2xbf16>
    %5 = vector.shape_cast %4 : vector<1x256x2xbf16> to vector<256x2xbf16>
    %cst_5 = arith.constant dense<0.000000e+00> : vector<512x2xf32>
    %6 = tpu.matmul %3, %5, %cst_5 {dimension_numbers = #tpu.dot_dimension_numbers<[1], [0], [0], [1], [0, 0, 1, 1], [], []>} : vector<512x256xbf16>, vector<256x2xbf16>, vector<512x2xf32> -> vector<512x2xf32>
    %c0_6 = arith.constant 0 : index
    %c0_7 = arith.constant 0 : index
    %c0_8 = arith.constant 0 : index
    %7 = vector.load %arg3[%c0_6, %c0_7, %c0_8] : memref<1x1x2xf32, #tpu.memory_space<vmem>>, vector<1x1x2xf32>
    %8 = vector.shape_cast %7 : vector<1x1x2xf32> to vector<1x2xf32>
    %9 = vector.broadcast %8 : vector<1x2xf32> to vector<512x2xf32>
    %10 = arith.addf %6, %9 : vector<512x2xf32>
    %c0_9 = arith.constant 0 : index
    %c0_10 = arith.constant 0 : index
    %c0_11 = arith.constant 0 : index
    %11 = vector.load %arg6[%c0_9, %c0_10, %c0_11] : memref<1x512x2xf32, #tpu.memory_space<vmem>>, vector<1x512x2xf32>
    %12 = vector.shape_cast %11 : vector<1x512x2xf32> to vector<512x2xf32>
    %13 = vector.shape_cast %10 : vector<512x2xf32> to vector<1x512x2xf32>
    tpu.vector_store %arg6[%c0_9, %c0_10, %c0_11], %13 {strides = array<i32>} : memref<1x512x2xf32, #tpu.memory_space<vmem>>, vector<1x512x2xf32>,
    return
  }
  func.func @transform_0(%arg0: i32) -> (i32, i32, i32) {
    %c0_i32 = arith.constant 0 : i32
    %c0_i32_0 = arith.constant 0 : i32
    %c0_i32_1 = arith.constant 0 : i32
    return %arg0, %c0_i32, %c0_i32_0 : i32, i32, i32
  }
  func.func @transform_1(%arg0: i32) -> (i32, i32, i32) {
    %c0_i32 = arith.constant 0 : i32
    %c0_i32_0 = arith.constant 0 : i32
    %c0_i32_1 = arith.constant 0 : i32
    return %arg0, %c0_i32, %c0_i32_0 : i32, i32, i32
  }
  func.func @transform_2(%arg0: i32) -> (i32, i32, i32) {
    %c0_i32 = arith.constant 0 : i32
    %c0_i32_0 = arith.constant 0 : i32
    %c0_i32_1 = arith.constant 0 : i32
    return %arg0, %c0_i32, %c0_i32_0 : i32, i32, i32
  }
  func.func @transform_3(%arg0: i32) -> (i32, i32, i32) {
    %c0_i32 = arith.constant 0 : i32
    %c0_i32_0 = arith.constant 0 : i32
    %c0_i32_1 = arith.constant 0 : i32
    return %arg0, %c0_i32, %c0_i32_0 : i32, i32, i32
  }
  func.func @transform_4(%arg0: i32) -> (i32, i32, i32) {
    %c0_i32 = arith.constant 0 : i32
    %c0_i32_0 = arith.constant 0 : i32
    %c0_i32_1 = arith.constant 0 : i32
    return %arg0, %c0_i32, %c0_i32_0 : i32, i32, i32
  }
  func.func @transform_5(%arg0: i32) -> (i32, i32, i32) {
    %c0_i32 = arith.constant 0 : i32
    %c0_i32_0 = arith.constant 0 : i32
    %c0_i32_1 = arith.constant 0 : i32
    return %arg0, %c0_i32, %c0_i32_0 : i32, i32, i32
  }
}

</mosaic_0001>

<bundles_post_ra>
// kernel: forward_nchw.6
= control target key start
LH: loop header
LB: loop body
LE: loop exit
PB: predicated region body
PF: predicated region fallthrough
CT: control target
= control target key end

     0   :  { %10 = vsyncpa [#allocation3], 0  ;;  %s950_s0 = inlined_call_operand.vmem [shape: bf16[1,128,48], index: 0, kind: input, shape index: {}]   ;;  %s951_s1 = inlined_call_operand.vmem [shape: bf16[1,48,8], index: 1, kind: input, shape index: {}]   ;;  %s952_s2 = inlined_call_operand.hbm [shape: f32[1,1,8], index: 2, kind: input, shape index: {}]   ;;  %s953_s3 = inlined_call_operand.hbm [shape: f32[1,1,8], index: 3, kind: input, shape index: {}]   ;;  %s954_s4 = inlined_call_operand.hbm [shape: f32[1,1,8], index: 4, kind: input, shape index: {}]   ;;  %s955_s5 = inlined_call_operand.vmem [shape: f32[1,128,8], index: 5, kind: output, shape index: {}]  }
   0x1   :  { %11 = vsyncpa [#allocation5], 0  ;;  %s640_s18 = smov [#allocation4]   ;;  %s641_s20 = smov [#allocation2]  }
   0x2   :  { %s32_s19 = sshll.u32 %s640_s18, 4  ;;  %s22_s21 = sshll.u32 %s641_s20, 4  ;;  %s33_s19 = int_to_ptr.vmem [resolvable:$true] %s32_s19  ;;  %s23_s21 = int_to_ptr.vmem [resolvable:$true] %s22_s21 }
   0x3   :  { %s570_s24 = scalar_lea.hbm %s953_s3, 16 }
   0x4   :  { %p571_p0 = scmp.ne.s32.totalorder %s953_s3, %s570_s24  ;;  %p574_p1 = scmp.lt.u32.totalorder %s570_s24, %s953_s3 }
   0x6   :  { %p576_p2 = pnand %p574_p1, %p571_p0 }
   0x8   :  { %579 = shalt.err (!%p576_p2)
}
   0x9   :  { %s580_s29 = scalar_lea.vmem %s33_s19, 16  ;;  %s584_s30 = scalar_lea.vmem %s33_s19, 32 }
   0xa   :  { %p581_p3 = scmp.ne.s32.totalorder %s33_s19, %s580_s29  ;;  %p585_p4 = scmp.lt.s32.totalorder %s33_s19, %s33_s19 }
   0xb   :  { %p586_p5 = scmp.lt.s32.totalorder %s584_s30, %s580_s29 }
   0xd   :  { %p587_p6 = por %p586_p5, %p585_p4 }
   0xf   :  { %p588_p7 = pnand %p587_p6, %p581_p3 }
  0x11   :  { %591 = shalt.err (!%p588_p7)
}
  0x12   :  { %35 = dma.hbm_to_vmem [thread:$0]  %s953_s3, 16, %s33_s19, [#allocation5]  }
  0x13   :  { %s592_s10 = scalar_lea.hbm %s952_s2, 16 }
  0x14   :  { %p593_p8 = scmp.ne.s32.totalorder %s952_s2, %s592_s10  ;;  %p596_p9 = scmp.lt.u32.totalorder %s592_s10, %s952_s2 }
  0x16   :  { %p598_p10 = pnand %p596_p9, %p593_p8 }
  0x18   :  { %601 = shalt.err (!%p598_p10)
}
  0x19   :  { %s602_s15 = scalar_lea.vmem %s23_s21, 16  ;;  %s606_s16 = scalar_lea.vmem %s23_s21, 32 }
  0x1a   :  { %p603_p11 = scmp.ne.s32.totalorder %s23_s21, %s602_s15  ;;  %p607_p12 = scmp.lt.s32.totalorder %s23_s21, %s23_s21 }
  0x1b   :  { %p608_p13 = scmp.lt.s32.totalorder %s606_s16, %s602_s15 }
  0x1d   :  { %p609_p0 = por %p608_p13, %p607_p12 }
  0x1f   :  { %p610_p1 = pnand %p609_p0, %p603_p11 }
  0x21   :  { %613 = shalt.err (!%p610_p1)
}
  0x22   :  { %25 = dma.hbm_to_vmem [thread:$0]  %s952_s2, 16, %s23_s21, [#allocation3]  }
  0x23   :  { %s642_s18 = smov [#allocation6]   ;;  %s614_s23 = scalar_lea.hbm %s954_s4, 16 }
  0x24   :  { %s42_s19 = sshll.u32 %s642_s18, 4  ;;  %p615_p2 = scmp.ne.s32.totalorder %s954_s4, %s614_s23  ;;  %s43_s19 = int_to_ptr.vmem [resolvable:$true] %s42_s19 }
  0x25   :  { %p618_p3 = scmp.lt.u32.totalorder %s614_s23, %s954_s4 }
  0x27   :  { %p620_p4 = pnand %p618_p3, %p615_p2 }
  0x29   :  { %623 = shalt.err (!%p620_p4)
}
  0x2a   :  { %s624_s28 = scalar_lea.vmem %s43_s19, 16  ;;  %s628_s2 = scalar_lea.vmem %s43_s19, 32 }
  0x2b   :  { %p625_p5 = scmp.ne.s32.totalorder %s43_s19, %s624_s28  ;;  %p629_p6 = scmp.lt.s32.totalorder %s43_s19, %s43_s19 }
  0x2c   :  { %p630_p7 = scmp.lt.s32.totalorder %s628_s2, %s624_s28 }
  0x2e   :  { %p631_p8 = por %p630_p7, %p629_p6 }
  0x30   :  { %p632_p9 = pnand %p631_p8, %p625_p5 }
  0x32   :  { %635 = shalt.err (!%p632_p9)
}
  0x33   :  { %45 = dma.hbm_to_vmem [thread:$0]  %s954_s4, 16, %s43_s19, [#allocation5]  }
  0x34   :  { %636 = dma.done.wait [#allocation3], 16  }
  0x35   :  { %637 = vsyncadd [#allocation3], 4294967280 }
  0x36   :  { %638 = dma.done.wait [#allocation5], 32  }
  0x37   :  { %639 = vsyncadd [#allocation5], 4294967264  ;;  %v557_v0 = vld [vmem:[%s951_s1] sm:$0xff]   ;;  %v558_v1 = vld [vmem:[%s951_s1 + $0x8] sm:$0xff]   ;;  %vm143_vm0 = vcmask 392192   ;;  %vm956_vm1 = vcmask 64512  }
  0x38   :  { %526 = vmatprep.subr.bf16.mxu0 %v557_v0  ;;  %548 = vmatprep.subr.bf16.mxu1 %v557_v0  ;;  %v560_v2 = vld [vmem:[%s950_s0] sm:$0xff]   ;;  %v559_v3 = vld [vmem:[%s951_s1 + $0x10] sm:$0xff]   ;;  %v561_v5 = vld [vmem:[%s950_s0 + $0x8] sm:$0xff]   ;;  %vm957_vm14 = vcmask 64512  }
  0x39   :  { %527 = vmatpush3.bf16.msra.mxu0 %v557_v0  ;;  %551 = vmatpush3.bf16.msra.mxu1 %v557_v0  ;;  %v564_v4 = vld [vmem:[%s950_s0 + $0x20] sm:$0xff]   ;;  %v565_v6 = vld [vmem:[%s950_s0 + $0x28] sm:$0xff]   ;;  %v562_v7 = vld [vmem:[%s950_s0 + $0x10] sm:$0xff]  }
  0x3a   :  { %528 = vmatprep.subr.bf16.mxu0 %v558_v1  ;;  %549 = vmatprep.subr.bf16.mxu1 %v558_v1  ;;  %v566_v8 = vld [vmem:[%s950_s0 + $0x30] sm:$0xff]   ;;  %v563_v9 = vld [vmem:[%s950_s0 + $0x18] sm:$0xff]   ;;  %v494_v11 = vld [vmem:[#allocation2] ss:$0 sm:$0xff] }
  0x3b   :  { %532 = vmatprep.mubr.msk.bf16.mxu0 %vm143_vm0, %v560_v2  ;;  %540 = vmatprep.mubr.msk.bf16.mxu1 %vm143_vm0, %v564_v4  ;;  %v567_v10 = vld [vmem:[%s950_s0 + $0x38] sm:$0xff]  }
  0x3d   :  { %529 = vmatpush3.bf16.msra.mxu0 %v558_v1  ;;  %552 = vmatpush3.bf16.msra.mxu1 %v558_v1 }
  0x3e   :  { %530 = vmatprep.subr.bf16.mxu0 %v559_v3  ;;  %550 = vmatprep.subr.bf16.mxu1 %v559_v3 }
  0x41   :  { %531 = vmatpush3.bf16.msra.mxu0 %v559_v3  ;;  %553 = vmatpush3.bf16.msra.mxu1 %v559_v3 }
  0x44   :  { %533 = vmatmul.mubr.msk.bf16.vlgmr.msra.gmra.mrb[0].mxu0 %vm143_vm0, %v561_v5  ;;  %541 = vmatmul.mubr.msk.bf16.vlgmr.msra.gmra.mrb[0].mxu1 %vm143_vm0, %v565_v6 }
  0x45   :  { %536 = vmatprep.mubr.msk.bf16.mxu0 %vm143_vm0, %v562_v7  ;;  %544 = vmatprep.mubr.msk.bf16.mxu1 %vm143_vm0, %v566_v8 }
  0x4c   :  { %537 = vmatmul.mubr.msk.bf16.gmra.mrb[4].mxu0 %vm143_vm0, %v563_v9  ;;  %545 = vmatmul.mubr.msk.bf16.gmra.mrb[4].mxu1 %vm143_vm0, %v567_v10 }
 0x117   :  { %v534_v12 = vpop.f32.mrb[0].mxu0  ;;  %v542_v13 = vpop.f32.mrb[0].mxu1 }
 0x118   :  { %v202_v14 = vpop.f32.mrb[1].mxu0  ;;  %v234_v15 = vpop.f32.mrb[1].mxu1  ;;  %v752_v21 = vadd.f32 %v534_v12, %v494_v11  ;;  %v243_v54 = vadd.f32 %v542_v13, %v494_v11 }
 0x119   :  { %v750_v16 = vadd.f32 %v494_v11, %v202_v14  ;;  %v535_v17 = vpop.f32.mrb[2].mxu0  ;;  %v543_v18 = vpop.f32.mrb[2].mxu1  ;;  %v235_v46 = vadd.f32 %v494_v11, %v234_v15 }
 0x11a   :  { %v205_v19 = vpop.f32.mrb[3].mxu0  ;;  %v237_v20 = vpop.f32.mrb[3].mxu1  ;;  %v214_v24 = vadd.f32 %v535_v17, %v494_v11  ;;  %v269_v27 = vsel %vm956_vm1, %v752_v21, 0.0  ;;  %v246_v56 = vadd.f32 %v543_v18, %v494_v11  ;;  %v285_v60 = vsel %vm956_vm1, %v243_v54, 0.0 }
 0x11b   :  { %v206_v22 = vadd.f32 %v494_v11, %v205_v19  ;;  %v266_v23 = vsel %vm956_vm1, %v750_v16, 0.0  ;;  %v281_v51 = vsel %vm956_vm1, %v235_v46, 0.0  ;;  %v238_v52 = vadd.f32 %v494_v11, %v237_v20 }
 0x11c   :  { %v271_v33 = vsel %vm956_vm1, %v214_v24, 0.0  ;;  %v287_v62 = vsel %vm956_vm1, %v246_v56, 0.0 }
 0x11d   :  { %v267_v25 = vsel %vm956_vm1, %v206_v22, 0.0  ;;  %v283_v57 = vsel %vm956_vm1, %v238_v52, 0.0 }
 0x11e   :  { %v268_v26 = vadd.f32 %v267_v25, %v266_v23 }
 0x11f   :  { %v538_v28 = vpop.f32.mrb[4].mxu0  ;;  %v546_v29 = vpop.f32.mrb[4].mxu1 }
 0x120   :  { %v270_v30 = vadd.f32 %v269_v27, %v268_v26  ;;  %v218_v31 = vpop.f32.mrb[5].mxu0  ;;  %v250_v32 = vpop.f32.mrb[5].mxu1  ;;  %v227_v40 = vadd.f32 %v538_v28, %v494_v11  ;;  %v259_v2 = vadd.f32 %v546_v29, %v494_v11 }
 0x121   :  { %v219_v34 = vadd.f32 %v494_v11, %v218_v31  ;;  %v539_v35 = vpop.f32.mrb[6].mxu0  ;;  %v547_v36 = vpop.f32.mrb[6].mxu1  ;;  %v251_v58 = vadd.f32 %v494_v11, %v250_v32 }
 0x122   :  { %v272_v37 = vadd.f32 %v271_v33, %v270_v30  ;;  %v221_v38 = vpop.f32.mrb[7].mxu0  ;;  %v253_v39 = vpop.f32.mrb[7].mxu1  ;;  %v230_v44 = vadd.f32 %v539_v35, %v494_v11  ;;  %v277_v48 = vsel %vm956_vm1, %v227_v40, 0.0  ;;  %v262_v4 = vadd.f32 %v547_v36, %v494_v11 }
 0x123   :  { %v273_v41 = vsel %vm956_vm1, %v219_v34, 0.0  ;;  %v222_v42 = vadd.f32 %v494_v11, %v221_v38  ;;  %v289_v63 = vsel %vm956_vm1, %v251_v58, 0.0  ;;  %v254_v0 = vadd.f32 %v494_v11, %v253_v39 }
 0x124   :  { %v274_v43 = vadd.f32 %v273_v41, %v272_v37  ;;  %v279_v50 = vsel %vm956_vm1, %v230_v44, 0.0  ;;  %v293_v7 = vsel %vm956_vm1, %v259_v2, 0.0  ;;  %v295_v9 = vsel %vm956_vm1, %v262_v4, 0.0 }
 0x125   :  { %v275_v45 = vsel %vm956_vm1, %v222_v42, 0.0  ;;  %v291_v5 = vsel %vm956_vm1, %v254_v0, 0.0 }
 0x126   :  { %v276_v47 = vadd.f32 %v275_v45, %v274_v43 }
 0x128   :  { %v278_v49 = vadd.f32 %v277_v48, %v276_v47 }
 0x12a   :  { %v280_v53 = vadd.f32 %v279_v50, %v278_v49 }
 0x12c   :  { %v282_v55 = vadd.f32 %v281_v51, %v280_v53 }
 0x12e   :  { %v284_v59 = vadd.f32 %v283_v57, %v282_v55 }
 0x130   :  { %v286_v61 = vadd.f32 %v285_v60, %v284_v59 }
 0x132   :  { %v288_v1 = vadd.f32 %v287_v62, %v286_v61 }
 0x134   :  { %v290_v3 = vadd.f32 %v289_v63, %v288_v1 }
 0x136   :  { %v292_v6 = vadd.f32 %v291_v5, %v290_v3 }
 0x138   :  { %v294_v8 = vadd.f32 %v293_v7, %v292_v6 }
 0x13a   :  { %v296_v10 = vadd.f32 %v295_v9, %v294_v8 }
 0x13c   :  { %v297_v12 = vrot.slane %v296_v10, 4 }
 0x13e   :  { %v298_v13 = vadd.f32 %v297_v12, %v296_v10 }
 0x140   :  { %v299_v14 = vrot.slane %v298_v13, 2 }
 0x142   :  { %v300_v15 = vadd.f32 %v299_v14, %v298_v13 }
 0x144   :  { %v301_v17 = vrot.slane %v300_v15, 1 }
 0x146   :  { %v302_v18 = vadd.f32 %v301_v17, %v300_v15 }
 0x148   :  { %v304_v19 = vmul.f32 0.0078125, %v302_v18 }
 0x14a   :  { %v773_v20 = vsub.f32 %v750_v16, %v304_v19  ;;  %v775_v11 = vsub.f32 %v206_v22, %v304_v19  ;;  %v778_v23 = vsub.f32 %v752_v21, %v304_v19  ;;  %v780_v25 = vsub.f32 %v214_v24, %v304_v19 }
 0x14b   :  { %v782_v26 = vsub.f32 %v219_v34, %v304_v19  ;;  %v784_v27 = vsub.f32 %v222_v42, %v304_v19  ;;  %v786_v28 = vsub.f32 %v227_v40, %v304_v19  ;;  %v788_v29 = vsub.f32 %v230_v44, %v304_v19 }
 0x14c   :  { %v790_v30 = vsub.f32 %v235_v46, %v304_v19  ;;  %v792_v31 = vsub.f32 %v238_v52, %v304_v19  ;;  %v794_v16 = vsub.f32 %v243_v54, %v304_v19  ;;  %v796_v22 = vsub.f32 %v246_v56, %v304_v19 }
 0x14d   :  { %v798_v21 = vsub.f32 %v251_v58, %v304_v19  ;;  %v800_v24 = vsub.f32 %v254_v0, %v304_v19  ;;  %v802_v32 = vsub.f32 %v259_v2, %v304_v19  ;;  %v804_v33 = vsub.f32 %v262_v4, %v304_v19 }
 0x14e   :  { %v321_v34 = vmul.f32 %v773_v20, %v773_v20  ;;  %v322_v35 = vmul.f32 %v775_v11, %v775_v11  ;;  %v323_v36 = vmul.f32 %v778_v23, %v778_v23  ;;  %v324_v37 = vmul.f32 %v780_v25, %v780_v25 }
 0x14f   :  { %v325_v41 = vmul.f32 %v782_v26, %v782_v26  ;;  %v326_v44 = vmul.f32 %v784_v27, %v784_v27  ;;  %v327_v47 = vmul.f32 %v786_v28, %v786_v28  ;;  %v328_v50 = vmul.f32 %v788_v29, %v788_v29 }
 0x150   :  { %v337_v38 = vsel %vm956_vm1, %v321_v34, 0.0  ;;  %v338_v39 = vsel %vm956_vm1, %v322_v35, 0.0  ;;  %v340_v42 = vsel %vm956_vm1, %v323_v36, 0.0  ;;  %v342_v45 = vsel %vm956_vm1, %v324_v37, 0.0 }
 0x151   :  { %v339_v40 = vadd.f32 %v338_v39, %v337_v38  ;;  %v344_v48 = vsel %vm956_vm1, %v325_v41, 0.0  ;;  %v346_v51 = vsel %vm956_vm1, %v326_v44, 0.0  ;;  %v329_v53 = vmul.f32 %v790_v30, %v790_v30 }
 0x152   :  { %v348_v54 = vsel %vm956_vm1, %v327_v47, 0.0  ;;  %v330_v56 = vmul.f32 %v792_v31, %v792_v31  ;;  %v350_v57 = vsel %vm956_vm1, %v328_v50, 0.0  ;;  %v331_v59 = vmul.f32 %v794_v16, %v794_v16 }
 0x153   :  { %v341_v43 = vadd.f32 %v340_v42, %v339_v40  ;;  %v352_v60 = vsel %vm956_vm1, %v329_v53, 0.0  ;;  %v332_v62 = vmul.f32 %v796_v22, %v796_v22  ;;  %v333_v1 = vmul.f32 %v798_v21, %v798_v21 }
 0x154   :  { %v354_v63 = vsel %vm956_vm1, %v330_v56, 0.0  ;;  %v356_v2 = vsel %vm956_vm1, %v331_v59, 0.0  ;;  %v334_v4 = vmul.f32 %v800_v24, %v800_v24  ;;  %v335_v7 = vmul.f32 %v802_v32, %v802_v32  ;;  %v514_v56 = vld [vmem:[#allocation6] ss:$0 sm:$0xff] }
 0x155   :  { %v343_v46 = vadd.f32 %v342_v45, %v341_v43  ;;  %v358_v5 = vsel %vm956_vm1, %v332_v62, 0.0  ;;  %v360_v8 = vsel %vm956_vm1, %v333_v1, 0.0  ;;  %v336_v10 = vmul.f32 %v804_v33, %v804_v33  ;;  %v375_v43 = vld [vmem:[#allocation4] sm:$0x1] }
 0x156   :  { %v362_v12 = vsel %vm956_vm1, %v334_v4, 0.0  ;;  %v364_v14 = vsel %vm956_vm1, %v335_v7, 0.0  ;;  %v380_v41 = vlaneseq }
 0x157   :  { %v345_v49 = vadd.f32 %v344_v48, %v343_v46  ;;  %v366_v17 = vsel %vm956_vm1, %v336_v10, 0.0  ;;  %vm958_vm1 = vmmov %vm957_vm14 }
 0x158   :  { %v381_v42 = vshrl.u32 %v380_v41, 7 }
 0x159   :  { %v347_v52 = vadd.f32 %v346_v51, %v345_v49 }
 0x15a   :  { %v382_v44 = vsub.s32 0, %v381_v42 }
 0x15b   :  { %v349_v55 = vadd.f32 %v348_v54, %v347_v52 }
 0x15d   :  { %v351_v58 = vadd.f32 %v350_v57, %v349_v55 }
 0x15f   :  { %v353_v61 = vadd.f32 %v352_v60, %v351_v58 }
 0x161   :  { %v355_v0 = vadd.f32 %v354_v63, %v353_v61 }
 0x163   :  { %v357_v3 = vadd.f32 %v356_v2, %v355_v0 }
 0x165   :  { %v359_v6 = vadd.f32 %v358_v5, %v357_v3 }
 0x167   :  { %v361_v9 = vadd.f32 %v360_v8, %v359_v6 }
 0x169   :  { %v363_v13 = vadd.f32 %v362_v12, %v361_v9 }
 0x16b   :  { %v365_v15 = vadd.f32 %v364_v14, %v363_v13 }
 0x16d   :  { %v367_v18 = vadd.f32 %v366_v17, %v365_v15 }
 0x16f   :  { %v368_v19 = vrot.slane %v367_v18, 4 }
 0x171   :  { %v369_v34 = vadd.f32 %v368_v19, %v367_v18 }
 0x173   :  { %v370_v35 = vrot.slane %v369_v34, 2 }
 0x175   :  { %v371_v36 = vadd.f32 %v370_v35, %v369_v34 }
 0x177   :  { %v372_v37 = vrot.slane %v371_v36, 1 }
 0x179   :  { %v373_v38 = vadd.f32 %v372_v37, %v371_v36 }
 0x17b   :  { %v374_v39 = vmul.f32 0.0078125, %v373_v38 }
 0x17d   :  { %v376_v40 = vadd.f32 1e-05, %v374_v39 }
 0x17f   :  { %568 = vrsqrt.f32 %v376_v40 }
 0x189   :  { %v569_v45 = vpop.eup %568 }
 0x18a   :  { %v378_v46 = vmul.f32 %v569_v45, %v375_v43 }
 0x18c   :  { %v383_v47 = vrot.slane %v378_v46, %v382_v44 }
 0x18e   :  { %v385_v48 = vmul.f32 %v383_v47, %v773_v20  ;;  %v386_v49 = vmul.f32 %v383_v47, %v775_v11  ;;  %v387_v50 = vmul.f32 %v383_v47, %v778_v23  ;;  %v388_v51 = vmul.f32 %v383_v47, %v780_v25 }
 0x18f   :  { %v389_v52 = vmul.f32 %v383_v47, %v782_v26  ;;  %v390_v53 = vmul.f32 %v383_v47, %v784_v27  ;;  %v391_v54 = vmul.f32 %v383_v47, %v786_v28  ;;  %v392_v55 = vmul.f32 %v383_v47, %v788_v29 }
 0x190   :  { %v393_v57 = vmul.f32 %v383_v47, %v790_v30  ;;  %v394_v58 = vmul.f32 %v383_v47, %v792_v31  ;;  %v395_v20 = vmul.f32 %v383_v47, %v794_v16  ;;  %v396_v11 = vmul.f32 %v383_v47, %v796_v22 }
 0x191   :  { %v397_v23 = vmul.f32 %v383_v47, %v798_v21  ;;  %v398_v25 = vmul.f32 %v383_v47, %v800_v24  ;;  %v399_v26 = vmul.f32 %v383_v47, %v802_v32  ;;  %v400_v27 = vmul.f32 %v383_v47, %v804_v33 }
 0x192   :  { %v408_v28 = vadd.f32 %v514_v56, %v385_v48  ;;  %v409_v59 = vadd.f32 %v514_v56, %v386_v49  ;;  %v410_v29 = vadd.f32 %v514_v56, %v387_v50  ;;  %v411_v60 = vadd.f32 %v514_v56, %v388_v51 }
 0x193   :  { %v412_v61 = vadd.f32 %v514_v56, %v389_v52  ;;  %v413_v30 = vadd.f32 %v514_v56, %v390_v53  ;;  %v414_v62 = vadd.f32 %v514_v56, %v391_v54  ;;  %v415_v31 = vadd.f32 %v514_v56, %v392_v55 }
 0x194   :  { %v416_v63 = vadd.f32 %v514_v56, %v393_v57  ;;  %v417_v16 = vadd.f32 %v514_v56, %v394_v58  ;;  %v418_v0 = vadd.f32 %v514_v56, %v395_v20  ;;  %v419_v22 = vadd.f32 %v514_v56, %v396_v11 }
 0x195   :  { %v420_v1 = vadd.f32 %v514_v56, %v397_v23  ;;  %v421_v21 = vadd.f32 %v514_v56, %v398_v25  ;;  %v422_v2 = vadd.f32 %v514_v56, %v399_v26  ;;  %v423_v24 = vadd.f32 %v514_v56, %v400_v27 }
 0x196   :  { %vm424_vm2 = vcmp.ge.f32.partialorder %v408_v28, 0.0  ;;  %vm425_vm3 = vcmp.ge.f32.partialorder %v409_v59, 0.0  ;;  %vm426_vm4 = vcmp.ge.f32.partialorder %v410_v29, 0.0  ;;  %vm427_vm5 = vcmp.ge.f32.partialorder %v411_v60, 0.0 }
 0x197   :  { %vm428_vm6 = vcmp.ge.f32.partialorder %v412_v61, 0.0  ;;  %vm429_vm7 = vcmp.ge.f32.partialorder %v413_v30, 0.0  ;;  %vm430_vm8 = vcmp.ge.f32.partialorder %v414_v62, 0.0  ;;  %vm431_vm9 = vcmp.ge.f32.partialorder %v415_v31, 0.0 }
 0x198   :  { %vm432_vm10 = vcmp.ge.f32.partialorder %v416_v63, 0.0  ;;  %vm433_vm11 = vcmp.ge.f32.partialorder %v417_v16, 0.0  ;;  %vm434_vm12 = vcmp.ge.f32.partialorder %v418_v0, 0.0  ;;  %vm435_vm13 = vcmp.ge.f32.partialorder %v419_v22, 0.0 }
 0x199   :  { %vm437_vm15 = vcmp.ge.f32.partialorder %v421_v21, 0.0  ;;  %vm438_vm0 = vcmp.ge.f32.partialorder %v422_v2, 0.0  ;;  %v440_v32 = vmul.f32 0.2, %v408_v28  ;;  %v441_v33 = vmul.f32 0.2, %v409_v59 }
 0x19a   :  { %v442_v3 = vmul.f32 0.2, %v410_v29  ;;  %v443_v4 = vmul.f32 0.2, %v411_v60  ;;  %v444_v5 = vmul.f32 0.2, %v412_v61 }
 0x19b   :  { %v445_v6 = vmul.f32 0.2, %v413_v30  ;;  %v446_v7 = vmul.f32 0.2, %v414_v62  ;;  %v447_v8 = vmul.f32 0.2, %v415_v31  ;;  %v456_v10 = vsel %vm424_vm2, %v408_v28, %v440_v32  ;;  %vm959_vm2 = vmmov %vm958_vm1 }
 0x19c   :  { %v448_v9 = vmul.f32 0.2, %v416_v63  ;;  %v449_v12 = vmul.f32 0.2, %v417_v16  ;;  %v450_v13 = vmul.f32 0.2, %v418_v0  ;;  %v457_v15 = vsel %vm425_vm3, %v409_v59, %v441_v33  ;;  %vm960_vm3 = vmmov %vm958_vm1 }
 0x19d   :  { %v451_v14 = vmul.f32 0.2, %v419_v22  ;;  %472 = vst.msk [vmem:[%s955_s5] sm:$0xff] %vm957_vm14, %v456_v10  ;;  %v452_v17 = vmul.f32 0.2, %v420_v1  ;;  %v458_v34 = vsel %vm426_vm4, %v410_v29, %v442_v3  ;;  %v459_v36 = vsel %vm427_vm5, %v411_v60, %v443_v4  ;;  %vm961_vm4 = vmmov %vm958_vm1 }
 0x19e   :  { %v453_v18 = vmul.f32 0.2, %v421_v21  ;;  %v454_v19 = vmul.f32 0.2, %v422_v2  ;;  %473 = vst.msk [vmem:[%s955_s5 + $0x8] sm:$0xff] %vm958_vm1, %v457_v15  ;;  %v460_v37 = vsel %vm428_vm6, %v412_v61, %v444_v5  ;;  %v461_v38 = vsel %vm429_vm7, %v413_v30, %v445_v6  ;;  %475 = vst.msk [vmem:[%s955_s5 + $0x18] sm:$0xff] %vm958_vm1, %v459_v36 }
 0x19f   :  { %v455_v35 = vmul.f32 0.2, %v423_v24  ;;  %474 = vst.msk [vmem:[%s955_s5 + $0x10] sm:$0xff] %vm959_vm2, %v458_v34  ;;  %v462_v39 = vsel %vm430_vm8, %v414_v62, %v446_v7  ;;  %v463_v40 = vsel %vm431_vm9, %v415_v31, %v447_v8  ;;  %v464_v41 = vsel %vm432_vm10, %v416_v63, %v448_v9  ;;  %vm963_vm6 = vmmov %vm958_vm1 }
 0x1a0   :  { %v465_v42 = vsel %vm433_vm11, %v417_v16, %v449_v12  ;;  %476 = vst.msk [vmem:[%s955_s5 + $0x20] sm:$0xff] %vm960_vm3, %v460_v37  ;;  %v466_v43 = vsel %vm434_vm12, %v418_v0, %v450_v13  ;;  %v467_v44 = vsel %vm435_vm13, %v419_v22, %v451_v14  ;;  %vm962_vm5 = vcmp.ge.f32.partialorder %v420_v1, 0.0  ;;  %vm964_vm7 = vmmov %vm958_vm1 }
 0x1a1   :  { %477 = vst.msk [vmem:[%s955_s5 + $0x28] sm:$0xff] %vm961_vm4, %v461_v38  ;;  %v468_v45 = vsel %vm962_vm5, %v420_v1, %v452_v17  ;;  %v469_v46 = vsel %vm437_vm15, %v421_v21, %v453_v18  ;;  %vm965_vm8 = vmmov %vm958_vm1  ;;  %v470_v47 = vsel %vm438_vm0, %v422_v2, %v454_v19  ;;  %vm967_vm10 = vcmp.ge.f32.partialorder %v423_v24, 0.0 }
 0x1a2   :  { %478 = vst.msk [vmem:[%s955_s5 + $0x30] sm:$0xff] %vm963_vm6, %v462_v39  ;;  %vm966_vm9 = vmmov %vm958_vm1  ;;  %v471_v48 = vsel %vm967_vm10, %v423_v24, %v455_v35 }
 0x1a3   :  { %479 = vst.msk [vmem:[%s955_s5 + $0x38] sm:$0xff] %vm964_vm7, %v463_v40  ;;  %vm968_vm11 = vmmov %vm958_vm1 }
 0x1a4   :  { %480 = vst.msk [vmem:[%s955_s5 + $0x40] sm:$0xff] %vm965_vm8, %v464_v41  ;;  %vm969_vm12 = vmmov %vm958_vm1 }
 0x1a5   :  { %481 = vst.msk [vmem:[%s955_s5 + $0x48] sm:$0xff] %vm966_vm9, %v465_v42  ;;  %vm970_vm13 = vmmov %vm958_vm1 }
 0x1a6   :  { %482 = vst.msk [vmem:[%s955_s5 + $0x50] sm:$0xff] %vm968_vm11, %v466_v43  ;;  %vm971_vm14 = vmmov %vm958_vm1 }
 0x1a7   :  { %483 = vst.msk [vmem:[%s955_s5 + $0x58] sm:$0xff] %vm969_vm12, %v467_v44  ;;  %vm972_vm15 = vmmov %vm958_vm1 }
 0x1a8   :  { %484 = vst.msk [vmem:[%s955_s5 + $0x60] sm:$0xff] %vm970_vm13, %v468_v45  ;;  %vm973_vm0 = vmmov %vm958_vm1 }
 0x1a9   :  { %485 = vst.msk [vmem:[%s955_s5 + $0x68] sm:$0xff] %vm971_vm14, %v469_v46 }
 0x1aa   :  { %486 = vst.msk [vmem:[%s955_s5 + $0x70] sm:$0xff] %vm972_vm15, %v470_v47 }
 0x1ab   :  { %487 = vst.msk [vmem:[%s955_s5 + $0x78] sm:$0xff] %vm973_vm0, %v471_v48 }
 0x1ac   :  { %492 = vsyncpa [#allocation3], 1 }
 0x1ad   :  { %493 = vsyncpa [#allocation5], 1 }

// kernel: forward_nchw.7
= control target key start
LH: loop header
LB: loop body
LE: loop exit
PB: predicated region body
PF: predicated region fallthrough
CT: control target
= control target key end

     0   :  { %10 = vsyncpa [#allocation3], 0  ;;  %s527_s0 = inlined_call_operand.vmem [shape: bf16[1,32,128], index: 0, kind: input, shape index: {}]   ;;  %s528_s1 = inlined_call_operand.vmem [shape: bf16[1,128,16], index: 1, kind: input, shape index: {}]   ;;  %s529_s2 = inlined_call_operand.hbm [shape: f32[1,1,16], index: 2, kind: input, shape index: {}]   ;;  %s530_s3 = inlined_call_operand.hbm [shape: f32[1,1,16], index: 3, kind: input, shape index: {}]   ;;  %s531_s4 = inlined_call_operand.hbm [shape: f32[1,1,16], index: 4, kind: input, shape index: {}]   ;;  %s532_s5 = inlined_call_operand.vmem [shape: f32[1,32,16], index: 5, kind: output, shape index: {}]  }
   0x1   :  { %11 = vsyncpa [#allocation5], 0  ;;  %s404_s18 = smov [#allocation4]   ;;  %s405_s20 = smov [#allocation2]  }
   0x2   :  { %s32_s19 = sshll.u32 %s404_s18, 4  ;;  %s22_s21 = sshll.u32 %s405_s20, 4  ;;  %s33_s19 = int_to_ptr.vmem [resolvable:$true] %s32_s19  ;;  %s23_s21 = int_to_ptr.vmem [resolvable:$true] %s22_s21 }
   0x3   :  { %s334_s24 = scalar_lea.hbm %s530_s3, 16 }
   0x4   :  { %p335_p0 = scmp.ne.s32.totalorder %s530_s3, %s334_s24  ;;  %p338_p1 = scmp.lt.u32.totalorder %s334_s24, %s530_s3 }
   0x6   :  { %p340_p2 = pnand %p338_p1, %p335_p0 }
   0x8   :  { %343 = shalt.err (!%p340_p2)
}
   0x9   :  { %s344_s29 = scalar_lea.vmem %s33_s19, 16  ;;  %s348_s30 = scalar_lea.vmem %s33_s19, 32 }
   0xa   :  { %p345_p3 = scmp.ne.s32.totalorder %s33_s19, %s344_s29  ;;  %p349_p4 = scmp.lt.s32.totalorder %s33_s19, %s33_s19 }
   0xb   :  { %p350_p5 = scmp.lt.s32.totalorder %s348_s30, %s344_s29 }
   0xd   :  { %p351_p6 = por %p350_p5, %p349_p4 }
   0xf   :  { %p352_p7 = pnand %p351_p6, %p345_p3 }
  0x11   :  { %355 = shalt.err (!%p352_p7)
}
  0x12   :  { %35 = dma.hbm_to_vmem [thread:$0]  %s530_s3, 16, %s33_s19, [#allocation5]  }
  0x13   :  { %s356_s10 = scalar_lea.hbm %s529_s2, 16 }
  0x14   :  { %p357_p8 = scmp.ne.s32.totalorder %s529_s2, %s356_s10  ;;  %p360_p9 = scmp.lt.u32.totalorder %s356_s10, %s529_s2 }
  0x16   :  { %p362_p10 = pnand %p360_p9, %p357_p8 }
  0x18   :  { %365 = shalt.err (!%p362_p10)
}
  0x19   :  { %s366_s15 = scalar_lea.vmem %s23_s21, 16  ;;  %s370_s16 = scalar_lea.vmem %s23_s21, 32 }
  0x1a   :  { %p367_p11 = scmp.ne.s32.totalorder %s23_s21, %s366_s15  ;;  %p371_p12 = scmp.lt.s32.totalorder %s23_s21, %s23_s21 }
  0x1b   :  { %p372_p13 = scmp.lt.s32.totalorder %s370_s16, %s366_s15 }
  0x1d   :  { %p373_p0 = por %p372_p13, %p371_p12 }
  0x1f   :  { %p374_p1 = pnand %p373_p0, %p367_p11 }
  0x21   :  { %377 = shalt.err (!%p374_p1)
}
  0x22   :  { %25 = dma.hbm_to_vmem [thread:$0]  %s529_s2, 16, %s23_s21, [#allocation3]  }
  0x23   :  { %s406_s18 = smov [#allocation6]   ;;  %s378_s23 = scalar_lea.hbm %s531_s4, 16 }
  0x24   :  { %s42_s19 = sshll.u32 %s406_s18, 4  ;;  %p379_p2 = scmp.ne.s32.totalorder %s531_s4, %s378_s23  ;;  %s43_s19 = int_to_ptr.vmem [resolvable:$true] %s42_s19 }
  0x25   :  { %p382_p3 = scmp.lt.u32.totalorder %s378_s23, %s531_s4 }
  0x27   :  { %p384_p4 = pnand %p382_p3, %p379_p2 }
  0x29   :  { %387 = shalt.err (!%p384_p4)
}
  0x2a   :  { %s388_s28 = scalar_lea.vmem %s43_s19, 16  ;;  %s392_s2 = scalar_lea.vmem %s43_s19, 32 }
  0x2b   :  { %p389_p5 = scmp.ne.s32.totalorder %s43_s19, %s388_s28  ;;  %p393_p6 = scmp.lt.s32.totalorder %s43_s19, %s43_s19 }
  0x2c   :  { %p394_p7 = scmp.lt.s32.totalorder %s392_s2, %s388_s28 }
  0x2e   :  { %p395_p8 = por %p394_p7, %p393_p6 }
  0x30   :  { %p396_p9 = pnand %p395_p8, %p389_p5 }
  0x32   :  { %399 = shalt.err (!%p396_p9)
}
  0x33   :  { %45 = dma.hbm_to_vmem [thread:$0]  %s531_s4, 16, %s43_s19, [#allocation5]  }
  0x34   :  { %400 = dma.done.wait [#allocation3], 16  }
  0x35   :  { %401 = vsyncadd [#allocation3], 4294967280 }
  0x36   :  { %402 = dma.done.wait [#allocation5], 32  }
  0x37   :  { %403 = vsyncadd [#allocation5], 4294967264  ;;  %v322_v0 = vld [vmem:[%s528_s1] sm:$0xff]   ;;  %v323_v1 = vld [vmem:[%s528_s1 + $0x8] sm:$0xff]   ;;  %vm192_vm0 = vcmask 130048   ;;  %v235_v56 = vlaneseq }
  0x38   :  { %299 = vmatprep.subr.bf16.mxu0 %v322_v0  ;;  %v324_v2 = vld [vmem:[%s528_s1 + $0x10] sm:$0xff]   ;;  %v325_v3 = vld [vmem:[%s528_s1 + $0x18] sm:$0xff]   ;;  %v330_v4 = vld [vmem:[%s527_s0] sm:$0xff]  }
  0x39   :  { %300 = vmatpush3.bf16.msra.mxu0 %v322_v0  ;;  %315 = vmatprep.mubr.bf16.mxu0 %v330_v4  ;;  %v326_v5 = vld [vmem:[%s528_s1 + $0x20] sm:$0xff]   ;;  %v327_v6 = vld [vmem:[%s528_s1 + $0x28] sm:$0xff]   ;;  %v328_v7 = vld [vmem:[%s528_s1 + $0x30] sm:$0xff]   ;;  %v236_v57 = vshrl.u32 %v235_v56, 7 }
  0x3a   :  { %301 = vmatprep.subr.bf16.mxu0 %v323_v1  ;;  %v329_v8 = vld [vmem:[%s528_s1 + $0x38] sm:$0xff]   ;;  %v331_v9 = vld [vmem:[%s527_s0 + $0x8] sm:$0xff]   ;;  %v277_v10 = vld [vmem:[#allocation2] ss:$0 sm:$0xff] }
  0x3b   :  { %v230_v58 = vld [vmem:[#allocation4] sm:$0x1]  ;;  %v237_v59 = vsub.s32 0, %v236_v57  ;;  %v288_v63 = vld [vmem:[#allocation6] ss:$0 sm:$0xff] }
  0x3d   :  { %302 = vmatpush3.bf16.msra.mxu0 %v323_v1 }
  0x3e   :  { %303 = vmatprep.subr.bf16.mxu0 %v324_v2 }
  0x41   :  { %304 = vmatpush3.bf16.msra.mxu0 %v324_v2 }
  0x42   :  { %305 = vmatprep.subr.bf16.mxu0 %v325_v3 }
  0x45   :  { %306 = vmatpush3.bf16.msra.mxu0 %v325_v3 }
  0x46   :  { %307 = vmatprep.subr.bf16.mxu0 %v326_v5 }
  0x49   :  { %308 = vmatpush3.bf16.msra.mxu0 %v326_v5 }
  0x4a   :  { %309 = vmatprep.subr.bf16.mxu0 %v327_v6 }
  0x4d   :  { %310 = vmatpush3.bf16.msra.mxu0 %v327_v6 }
  0x4e   :  { %311 = vmatprep.subr.bf16.mxu0 %v328_v7 }
  0x51   :  { %312 = vmatpush3.bf16.msra.mxu0 %v328_v7 }
  0x52   :  { %313 = vmatprep.subr.bf16.mxu0 %v329_v8 }
  0x55   :  { %314 = vmatpush3.bf16.msra.mxu0 %v329_v8 }
  0x58   :  { %316 = vmatmul.mubr.bf16.vlgmr.msra.gmra.mrb[0].mxu0 %v331_v9 }
 0x12b   :  { %v317_v11 = vpop.f32.mrb[0].mxu0 }
 0x12c   :  { %v177_v12 = vpop.f32.mrb[1].mxu0  ;;  %v186_v16 = vadd.f32 %v317_v11, %v277_v10 }
 0x12d   :  { %v178_v13 = vadd.f32 %v277_v10, %v177_v12  ;;  %v318_v14 = vpop.f32.mrb[2].mxu0 }
 0x12e   :  { %v180_v15 = vpop.f32.mrb[3].mxu0  ;;  %v189_v19 = vadd.f32 %v318_v14, %v277_v10  ;;  %v196_v22 = vsel %vm192_vm0, %v186_v16, 0.0 }
 0x12f   :  { %v181_v17 = vadd.f32 %v277_v10, %v180_v15  ;;  %v193_v18 = vsel %vm192_vm0, %v178_v13, 0.0 }
 0x130   :  { %v198_v24 = vsel %vm192_vm0, %v189_v19, 0.0 }
 0x131   :  { %v194_v20 = vsel %vm192_vm0, %v181_v17, 0.0 }
 0x132   :  { %v195_v21 = vadd.f32 %v194_v20, %v193_v18 }
 0x134   :  { %v197_v23 = vadd.f32 %v196_v22, %v195_v21 }
 0x136   :  { %v199_v25 = vadd.f32 %v198_v24, %v197_v23 }
 0x138   :  { %v200_v26 = vrot.slane %v199_v25, 4 }
 0x13a   :  { %v201_v27 = vadd.f32 %v200_v26, %v199_v25 }
 0x13c   :  { %v202_v28 = vrot.slane %v201_v27, 2 }
 0x13e   :  { %v203_v29 = vadd.f32 %v202_v28, %v201_v27 }
 0x140   :  { %v204_v30 = vrot.slane %v203_v29, 1 }
 0x142   :  { %v205_v31 = vadd.f32 %v204_v30, %v203_v29 }
 0x144   :  { %v207_v32 = vmul.f32 0.03125, %v205_v31 }
 0x146   :  { %v208_v33 = vsub.f32 %v178_v13, %v207_v32  ;;  %v209_v34 = vsub.f32 %v181_v17, %v207_v32  ;;  %v210_v35 = vsub.f32 %v186_v16, %v207_v32  ;;  %v211_v36 = vsub.f32 %v189_v19, %v207_v32 }
 0x148   :  { %v212_v37 = vmul.f32 %v208_v33, %v208_v33  ;;  %v213_v38 = vmul.f32 %v209_v34, %v209_v34  ;;  %v214_v39 = vmul.f32 %v210_v35, %v210_v35  ;;  %v215_v40 = vmul.f32 %v211_v36, %v211_v36 }
 0x14a   :  { %v216_v41 = vsel %vm192_vm0, %v212_v37, 0.0  ;;  %v217_v42 = vsel %vm192_vm0, %v213_v38, 0.0  ;;  %v219_v44 = vsel %vm192_vm0, %v214_v39, 0.0  ;;  %v221_v46 = vsel %vm192_vm0, %v215_v40, 0.0 }
 0x14b   :  { %v218_v43 = vadd.f32 %v217_v42, %v216_v41 }
 0x14d   :  { %v220_v45 = vadd.f32 %v219_v44, %v218_v43 }
 0x14f   :  { %v222_v47 = vadd.f32 %v221_v46, %v220_v45 }
 0x151   :  { %v223_v48 = vrot.slane %v222_v47, 4 }
 0x153   :  { %v224_v49 = vadd.f32 %v223_v48, %v222_v47 }
 0x155   :  { %v225_v50 = vrot.slane %v224_v49, 2 }
 0x157   :  { %v226_v51 = vadd.f32 %v225_v50, %v224_v49 }
 0x159   :  { %v227_v52 = vrot.slane %v226_v51, 1 }
 0x15b   :  { %v228_v53 = vadd.f32 %v227_v52, %v226_v51 }
 0x15d   :  { %v229_v54 = vmul.f32 0.03125, %v228_v53 }
 0x15f   :  { %v231_v55 = vadd.f32 1e-05, %v229_v54 }
 0x161   :  { %332 = vrsqrt.f32 %v231_v55 }
 0x16b   :  { %v333_v60 = vpop.eup %332 }
 0x16c   :  { %v233_v61 = vmul.f32 %v333_v60, %v230_v58 }
 0x16e   :  { %v238_v62 = vrot.slane %v233_v61, %v237_v59 }
 0x170   :  { %v240_v0 = vmul.f32 %v238_v62, %v208_v33  ;;  %v241_v1 = vmul.f32 %v238_v62, %v209_v34  ;;  %v242_v2 = vmul.f32 %v238_v62, %v210_v35  ;;  %v243_v3 = vmul.f32 %v238_v62, %v211_v36 }
 0x172   :  { %v251_v4 = vadd.f32 %v288_v63, %v240_v0  ;;  %v252_v5 = vadd.f32 %v288_v63, %v241_v1  ;;  %v253_v6 = vadd.f32 %v288_v63, %v242_v2  ;;  %v254_v7 = vadd.f32 %v288_v63, %v243_v3 }
 0x174   :  { %vm255_vm1 = vcmp.ge.f32.partialorder %v251_v4, 0.0  ;;  %vm256_vm2 = vcmp.ge.f32.partialorder %v252_v5, 0.0  ;;  %vm257_vm3 = vcmp.ge.f32.partialorder %v253_v6, 0.0  ;;  %vm258_vm4 = vcmp.ge.f32.partialorder %v254_v7, 0.0 }
 0x175   :  { %v259_v8 = vmul.f32 0.2, %v251_v4  ;;  %v260_v9 = vmul.f32 0.2, %v252_v5  ;;  %v261_v10 = vmul.f32 0.2, %v253_v6 }
 0x176   :  { %v262_v11 = vmul.f32 0.2, %v254_v7 }
 0x177   :  { %v263_v12 = vsel %vm255_vm1, %v251_v4, %v259_v8  ;;  %v264_v13 = vsel %vm256_vm2, %v252_v5, %v260_v9  ;;  %v265_v14 = vsel %vm257_vm3, %v253_v6, %v261_v10 }
 0x178   :  { %v266_v15 = vsel %vm258_vm4, %v254_v7, %v262_v11  ;;  %267 = vst.msk [vmem:[%s532_s5] sm:$0xff] %vm192_vm0, %v263_v12  ;;  %268 = vst.msk [vmem:[%s532_s5 + $0x8] sm:$0xff] %vm192_vm0, %v264_v13 }
 0x179   :  { %269 = vst.msk [vmem:[%s532_s5 + $0x10] sm:$0xff] %vm192_vm0, %v265_v14  ;;  %270 = vst.msk [vmem:[%s532_s5 + $0x18] sm:$0xff] %vm192_vm0, %v266_v15 }
 0x17a   :  { %275 = vsyncpa [#allocation3], 1 }
 0x17b   :  { %276 = vsyncpa [#allocation5], 1 }

// kernel: forward_nchw.8
= control target key start
LH: loop header
LB: loop body
LE: loop exit
PB: predicated region body
PF: predicated region fallthrough
CT: control target
= control target key end

     0   :  { %10 = vsyncpa [#allocation3], 0  ;;  %s549_s0 = inlined_call_operand.vmem [shape: bf16[1,8,256], index: 0, kind: input, shape index: {}]   ;;  %s550_s1 = inlined_call_operand.vmem [shape: bf16[1,256,32], index: 1, kind: input, shape index: {}]   ;;  %s551_s2 = inlined_call_operand.hbm [shape: f32[1,1,32], index: 2, kind: input, shape index: {}]   ;;  %s552_s3 = inlined_call_operand.hbm [shape: f32[1,1,32], index: 3, kind: input, shape index: {}]   ;;  %s553_s4 = inlined_call_operand.hbm [shape: f32[1,1,32], index: 4, kind: input, shape index: {}]   ;;  %s554_s5 = inlined_call_operand.vmem [shape: f32[1,8,32], index: 5, kind: output, shape index: {}]  }
   0x1   :  { %11 = vsyncpa [#allocation5], 0  ;;  %s423_s18 = smov [#allocation4]   ;;  %s424_s20 = smov [#allocation2]  }
   0x2   :  { %s32_s19 = sshll.u32 %s423_s18, 4  ;;  %s22_s21 = sshll.u32 %s424_s20, 4  ;;  %s33_s19 = int_to_ptr.vmem [resolvable:$true] %s32_s19  ;;  %s23_s21 = int_to_ptr.vmem [resolvable:$true] %s22_s21 }
   0x3   :  { %s353_s24 = scalar_lea.hbm %s552_s3, 16 }
   0x4   :  { %p354_p0 = scmp.ne.s32.totalorder %s552_s3, %s353_s24  ;;  %p357_p1 = scmp.lt.u32.totalorder %s353_s24, %s552_s3 }
   0x6   :  { %p359_p2 = pnand %p357_p1, %p354_p0 }
   0x8   :  { %362 = shalt.err (!%p359_p2)
}
   0x9   :  { %s363_s29 = scalar_lea.vmem %s33_s19, 16  ;;  %s367_s30 = scalar_lea.vmem %s33_s19, 32 }
   0xa   :  { %p364_p3 = scmp.ne.s32.totalorder %s33_s19, %s363_s29  ;;  %p368_p4 = scmp.lt.s32.totalorder %s33_s19, %s33_s19 }
   0xb   :  { %p369_p5 = scmp.lt.s32.totalorder %s367_s30, %s363_s29 }
   0xd   :  { %p370_p6 = por %p369_p5, %p368_p4 }
   0xf   :  { %p371_p7 = pnand %p370_p6, %p364_p3 }
  0x11   :  { %374 = shalt.err (!%p371_p7)
}
  0x12   :  { %35 = dma.hbm_to_vmem [thread:$0]  %s552_s3, 16, %s33_s19, [#allocation5]  }
  0x13   :  { %s375_s10 = scalar_lea.hbm %s551_s2, 16 }
  0x14   :  { %p376_p8 = scmp.ne.s32.totalorder %s551_s2, %s375_s10  ;;  %p379_p9 = scmp.lt.u32.totalorder %s375_s10, %s551_s2 }
  0x16   :  { %p381_p10 = pnand %p379_p9, %p376_p8 }
  0x18   :  { %384 = shalt.err (!%p381_p10)
}
  0x19   :  { %s385_s15 = scalar_lea.vmem %s23_s21, 16  ;;  %s389_s16 = scalar_lea.vmem %s23_s21, 32 }
  0x1a   :  { %p386_p11 = scmp.ne.s32.totalorder %s23_s21, %s385_s15  ;;  %p390_p12 = scmp.lt.s32.totalorder %s23_s21, %s23_s21 }
  0x1b   :  { %p391_p13 = scmp.lt.s32.totalorder %s389_s16, %s385_s15 }
  0x1d   :  { %p392_p0 = por %p391_p13, %p390_p12 }
  0x1f   :  { %p393_p1 = pnand %p392_p0, %p386_p11 }
  0x21   :  { %396 = shalt.err (!%p393_p1)
}
  0x22   :  { %25 = dma.hbm_to_vmem [thread:$0]  %s551_s2, 16, %s23_s21, [#allocation3]  }
  0x23   :  { %s425_s18 = smov [#allocation6]   ;;  %s397_s23 = scalar_lea.hbm %s553_s4, 16 }
  0x24   :  { %s42_s19 = sshll.u32 %s425_s18, 4  ;;  %p398_p2 = scmp.ne.s32.totalorder %s553_s4, %s397_s23  ;;  %s43_s19 = int_to_ptr.vmem [resolvable:$true] %s42_s19 }
  0x25   :  { %p401_p3 = scmp.lt.u32.totalorder %s397_s23, %s553_s4 }
  0x27   :  { %p403_p4 = pnand %p401_p3, %p398_p2 }
  0x29   :  { %406 = shalt.err (!%p403_p4)
}
  0x2a   :  { %s407_s28 = scalar_lea.vmem %s43_s19, 16  ;;  %s411_s2 = scalar_lea.vmem %s43_s19, 32 }
  0x2b   :  { %p408_p5 = scmp.ne.s32.totalorder %s43_s19, %s407_s28  ;;  %p412_p6 = scmp.lt.s32.totalorder %s43_s19, %s43_s19 }
  0x2c   :  { %p413_p7 = scmp.lt.s32.totalorder %s411_s2, %s407_s28 }
  0x2e   :  { %p414_p8 = por %p413_p7, %p412_p6 }
  0x30   :  { %p415_p9 = pnand %p414_p8, %p408_p5 }
  0x32   :  { %418 = shalt.err (!%p415_p9)
}
  0x33   :  { %45 = dma.hbm_to_vmem [thread:$0]  %s553_s4, 16, %s43_s19, [#allocation5]  }
  0x34   :  { %419 = dma.done.wait [#allocation3], 16  }
  0x35   :  { %420 = vsyncadd [#allocation3], 4294967280 }
  0x36   :  { %421 = dma.done.wait [#allocation5], 32  }
  0x37   :  { %422 = vsyncadd [#allocation5], 4294967264  ;;  %v333_v0 = vld [vmem:[%s550_s1 + $0x40] sm:$0xff]   ;;  %v335_v2 = vld [vmem:[%s550_s1 + $0x48] sm:$0xff]   ;;  %vm239_vm0 = vcmask 261120   ;;  %v264_v45 = vlaneseq }
  0x38   :  { %v334_v1 = vld [vmem:[%s550_s1] sm:$0xff]   ;;  %308 = vmatprep.subr.bf16.mxu0 %v333_v0  ;;  %v336_v3 = vld [vmem:[%s550_s1 + $0x8] sm:$0xff]   ;;  %v337_v4 = vld [vmem:[%s550_s1 + $0x50] sm:$0xff]  }
  0x39   :  { %309 = vmatpush3.bf16.msra.mxu0 %v334_v1  ;;  %v338_v5 = vld [vmem:[%s550_s1 + $0x10] sm:$0xff]   ;;  %v339_v6 = vld [vmem:[%s550_s1 + $0x58] sm:$0xff]   ;;  %v341_v8 = vld [vmem:[%s550_s1 + $0x60] sm:$0xff]   ;;  %v265_v46 = vshrl.u32 %v264_v45, 7 }
  0x3a   :  { %310 = vmatprep.subr.bf16.mxu0 %v335_v2  ;;  %v340_v7 = vld [vmem:[%s550_s1 + $0x18] sm:$0xff]   ;;  %v342_v9 = vld [vmem:[%s550_s1 + $0x20] sm:$0xff]   ;;  %v343_v10 = vld [vmem:[%s550_s1 + $0x68] sm:$0xff]  }
  0x3b   :  { %v56_v11 = vld [vmem:[%s549_s0] sm:$0xff]  ;;  %v344_v13 = vld [vmem:[%s550_s1 + $0x28] sm:$0xff]   ;;  %v345_v14 = vld [vmem:[%s550_s1 + $0x70] sm:$0xff]   ;;  %v266_v48 = vsub.s32 0, %v265_v46 }
  0x3c   :  { %v290_v12 = vcombine.high %v56_v11, %v56_v11  ;;  %v346_v15 = vld [vmem:[%s550_s1 + $0x30] sm:$0xff]   ;;  %v347_v16 = vld [vmem:[%s550_s1 + $0x78] sm:$0xff]   ;;  %v289_v18 = vcombine.low %v56_v11, %v56_v11  ;;  %v288_v20 = vld [vmem:[#allocation2] ss:$0 sm:$0xff] }
  0x3d   :  { %311 = vmatpush3.bf16.msra.mxu0 %v336_v3  ;;  %v348_v17 = vld [vmem:[%s550_s1 + $0x38] sm:$0xff]   ;;  %v259_v47 = vld [vmem:[#allocation4] sm:$0x1]  ;;  %v307_v52 = vld [vmem:[#allocation6] ss:$0 sm:$0xff] }
  0x3e   :  { %312 = vmatprep.subr.bf16.mxu0 %v337_v4  ;;  %231 = vmatprep.mubr.bf16.mxu0 %v290_v12 }
  0x41   :  { %313 = vmatpush3.bf16.msra.mxu0 %v338_v5 }
  0x42   :  { %314 = vmatprep.subr.bf16.mxu0 %v339_v6 }
  0x45   :  { %315 = vmatpush3.bf16.msra.mxu0 %v340_v7 }
  0x46   :  { %316 = vmatprep.subr.bf16.mxu0 %v341_v8 }
  0x49   :  { %317 = vmatpush3.bf16.msra.mxu0 %v342_v9 }
  0x4a   :  { %318 = vmatprep.subr.bf16.mxu0 %v343_v10 }
  0x4d   :  { %319 = vmatpush3.bf16.msra.mxu0 %v344_v13 }
  0x4e   :  { %320 = vmatprep.subr.bf16.mxu0 %v345_v14 }
  0x51   :  { %321 = vmatpush3.bf16.msra.mxu0 %v346_v15 }
  0x52   :  { %322 = vmatprep.subr.bf16.mxu0 %v347_v16 }
  0x55   :  { %323 = vmatpush3.bf16.msra.mxu0 %v348_v17 }
  0x58   :  { %232 = vmatmul.mubr.bf16.vlgmr.msra.gmra.mrb[0].mxu0 %v289_v18 }
 0x12b   :  { %v324_v19 = vpop.f32.mrb[0].mxu0 }
 0x12c   :  { %v325_v21 = vpop.f32.mrb[1].mxu0 }
 0x12d   :  { %v326_v22 = vadd.f32 %v325_v21, %v324_v19  ;;  %v327_v23 = vpop.f32.mrb[2].mxu0 }
 0x12e   :  { %v328_v24 = vpop.f32.mrb[3].mxu0 }
 0x12f   :  { %v234_v25 = vadd.f32 %v326_v22, %v288_v20 }
 0x131   :  { %v240_v26 = vsel %vm239_vm0, %v234_v25, 0.0 }
 0x132   :  { %v241_v27 = vrot.slane %v240_v26, 4 }
 0x134   :  { %v242_v28 = vadd.f32 %v241_v27, %v240_v26 }
 0x136   :  { %v243_v29 = vrot.slane %v242_v28, 2 }
 0x138   :  { %v244_v30 = vadd.f32 %v243_v29, %v242_v28 }
 0x13a   :  { %v245_v31 = vrot.slane %v244_v30, 1 }
 0x13c   :  { %v246_v32 = vadd.f32 %v245_v31, %v244_v30 }
 0x13e   :  { %v248_v33 = vmul.f32 0.125, %v246_v32 }
 0x140   :  { %v249_v34 = vsub.f32 %v234_v25, %v248_v33 }
 0x142   :  { %v250_v35 = vmul.f32 %v249_v34, %v249_v34 }
 0x144   :  { %v251_v36 = vsel %vm239_vm0, %v250_v35, 0.0 }
 0x145   :  { %v252_v37 = vrot.slane %v251_v36, 4 }
 0x147   :  { %v253_v38 = vadd.f32 %v252_v37, %v251_v36 }
 0x149   :  { %v254_v39 = vrot.slane %v253_v38, 2 }
 0x14b   :  { %v255_v40 = vadd.f32 %v254_v39, %v253_v38 }
 0x14d   :  { %v256_v41 = vrot.slane %v255_v40, 1 }
 0x14f   :  { %v257_v42 = vadd.f32 %v256_v41, %v255_v40 }
 0x151   :  { %v258_v43 = vmul.f32 0.125, %v257_v42 }
 0x153   :  { %v260_v44 = vadd.f32 1e-05, %v258_v43 }
 0x155   :  { %351 = vrsqrt.f32 %v260_v44 }
 0x15f   :  { %v352_v49 = vpop.eup %351 }
 0x160   :  { %v262_v50 = vmul.f32 %v352_v49, %v259_v47 }
 0x162   :  { %v267_v51 = vrot.slane %v262_v50, %v266_v48 }
 0x164   :  { %v269_v53 = vmul.f32 %v267_v51, %v249_v34 }
 0x166   :  { %v277_v54 = vadd.f32 %v307_v52, %v269_v53 }
 0x168   :  { %vm278_vm1 = vcmp.ge.f32.partialorder %v277_v54, 0.0  ;;  %v279_v55 = vmul.f32 0.2, %v277_v54 }
 0x16a   :  { %v280_v56 = vsel %vm278_vm1, %v277_v54, %v279_v55 }
 0x16b   :  { %281 = vst.msk [vmem:[%s554_s5] sm:$0xff] %vm239_vm0, %v280_v56 }
 0x16c   :  { %286 = vsyncpa [#allocation3], 1 }
 0x16d   :  { %287 = vsyncpa [#allocation5], 1 }

// kernel: forward_nchw.9
= control target key start
LH: loop header
LB: loop body
LE: loop exit
PB: predicated region body
PF: predicated region fallthrough
CT: control target
= control target key end

     0   :  { %10 = vsyncpa [#allocation3], 0  ;;  %s1548_s0 = inlined_call_operand.vmem [shape: bf16[1,32,512], index: 0, kind: input, shape index: {}]   ;;  %s1549_s1 = inlined_call_operand.vmem [shape: bf16[3,512,16], index: 1, kind: input, shape index: {}]   ;;  %s1550_s2 = inlined_call_operand.hbm [shape: f32[3,1,16], index: 2, kind: input, shape index: {}]   ;;  %s1551_s3 = inlined_call_operand.hbm [shape: f32[3,1,16], index: 3, kind: input, shape index: {}]   ;;  %s1552_s4 = inlined_call_operand.hbm [shape: f32[3,1,16], index: 4, kind: input, shape index: {}]   ;;  %s1553_s5 = inlined_call_operand.vmem [shape: f32[3,32,16], index: 5, kind: output, shape index: {}]  }
   0x1   :  { %12 = vsyncpa [#allocation3 + $0x1], 0 }
   0x2   :  { %13 = vsyncpa [#allocation5], 0 }
   0x3   :  { %15 = vsyncpa [#allocation5 + $0x1], 0  ;;  %s1283_s18 = smov 0   ;;  %s1285_s19 = smov 0  }
   0x4   :  { %s1287_s20 = smov 0   ;;  %s1289_s21 = smov 0  }
   0x5 LB: > { %s1302_s22 = sadd.s32 4294967295, %s1247_s21   ;;  %s1305_s23 = sadd.s32 1, %s1247_s21   ;;  %s1247_s21 = sphi %s1289_s21, %s1569_s21   ;;  %s1243_s20 = sphi %s1287_s20, %s1568_s20   ;;  %s1239_s19 = sphi %s1285_s19, %s1567_s19   ;;  %s1235_s18 = sphi %s1283_s18, %s1566_s18  }
   0x6   : > { %s72_s24 = ssub.s32 %s1247_s21, %s1305_s23  ;;  %s75_s25 = sadd.s32 1, %s1243_s20 }
   0x7   : > { %p73_p0 = scmp.eq.s32.totalorder %s72_s24, 0  ;;  %p82_p1 = scmp.ne.s32.totalorder %s1243_s20, %s1239_s19 }
   0x8   : > { %p83_p2 = scmp.eq.s32.totalorder %s1247_s21, 0  ;;  %p88_p3 = scmp.ne.s32.totalorder %s1239_s19, %s1235_s18 }
   0x9   : > { %s1315_s26 = scalar_select %p73_p0, %s1243_s20, %s75_s25  }
   0xa   : > { %p84_p4 = por %p83_p2, %p82_p1  ;;  %p89_p5 = scmp.eq.s32.totalorder %s1302_s22, 0 }
   0xb   : > { %p1051_p6 = scmp.lt.s32.totalorder %s1247_s21, 3  ;;  %s1324_s28 = sand.u32 1, %s1243_s20  }
   0xc   : > { %p1319_p7 = por %p89_p5, %p88_p3  ;;  %s1327_s29 = sshll.u32 %s1247_s21, 4 }
   0xd   : > { %p1329_p8 = pnand %p1051_p6, %p84_p4  ;;  %s218_s6 = sand.u32 1, %s1247_s21  }
   0xe   : > { %s1557_s27 = scalar_select %p1319_p7, 1, 0 }
   0xf   : > { %s1558_s30 = scalar_select %p1329_p8, 1, 0 }
  0x10   : > { %s1338_s9 = scalar_lea.hbm %s1551_s3, %s1327_s29  ;;  %s221_s10 = scalar_lea.vmem [#allocation4], %s1324_s28 }
  0x11   : > { %s228_s11 = sshll.u32 %s221_s10, 4  ;;  %s1344_s12 = scalar_lea.sflag [#allocation5], %s218_s6  ;;  %s1341_s11 = int_to_ptr.vmem [resolvable:$true] %s228_s11 }
  0x12   : > { %s1119_s13 = scalar_lea.hbm %s1338_s9, 16  ;;  %p1350_p11 = pneg %p1329_p8 }
  0x13   : > { %p1120_p10 = scmp.ne.s32.totalorder %s1338_s9, %s1119_s13  ;;  %s1124_s17 = scalar_lea.hbm %s1551_s3, 48 }
  0x14   : > { %p1125_p0 = scmp.lt.u32.totalorder %s1338_s9, %s1551_s3  ;;  %p1126_p1 = scmp.lt.u32.totalorder %s1124_s17, %s1119_s13 }
  0x15   : > { %p1122_p12 = pnand %p1350_p11, %p1120_p10  ;;  %p1128_p3 = scmp.lt.u32.totalorder %s1119_s13, %s1338_s9 }
  0x16   : > { %p1127_p2 = por %p1126_p1, %p1125_p0 }
  0x17   : > { %p1123_p13 = pneg %p1122_p12 }
  0x18   : > { %p1129_p4 = por %p1128_p3, %p1127_p2 }
  0x1a   : > { %p1130_p5 = pnand %p1129_p4, %p1123_p13 }
  0x1c   : > { %1133 = shalt.err (!%p1130_p5)
}
  0x1d   : > { %s1134_s25 = scalar_lea.vmem %s1341_s11, 16  ;;  %s1249_s6 = smov [#allocation4]  }
  0x1e   : > { %p1135_p6 = scmp.ne.s32.totalorder %s1341_s11, %s1134_s25  ;;  %s1139_s7 = sshll.u32 %s1249_s6, 4  ;;  %s1140_s7 = int_to_ptr.vmem [resolvable:$false] %s1139_s7 }
  0x1f   : > { %s1141_s8 = scalar_lea.vmem %s1140_s7, 32  ;;  %p1142_p9 = scmp.lt.s32.totalorder %s1341_s11, %s1140_s7 }
  0x20   : > { %p1137_p10 = pnand %p1135_p6, %p1350_p11  ;;  %p1143_p7 = scmp.lt.s32.totalorder %s1141_s8, %s1134_s25 }
  0x22   : > { %p1138_p12 = pneg %p1137_p10  ;;  %p1144_p0 = por %p1143_p7, %p1142_p9 }
  0x24   : > { %p1145_p1 = pnand %p1144_p0, %p1138_p12 }
  0x26   : > { %1148 = shalt.err (!%p1145_p1)
}
  0x27   : > { %1047 = dma.hbm_to_vmem [thread:$0]  (!%p1329_p8), %s1338_s9, 16, %s1341_s11, %s1344_s12  }
  0x28   : > { %p250_p13 = scmp.lt.s32.totalorder %s1247_s21, 4  ;;  %s1379_s15 = scalar_lea.hbm %s1550_s2, %s1327_s29 }
  0x29   : > { %p1560_p7 = scmp.ge.s32.totalorder %s1247_s21, 1  ;;  %s204_s17 = scalar_lea.vmem [#allocation2], %s1324_s28 }
  0x2a   : > { %s211_s18 = sshll.u32 %s204_s17, 4  ;;  %s202_s24 = scalar_lea.sflag [#allocation3], %s1324_s28  ;;  %s212_s18 = int_to_ptr.vmem [resolvable:$true] %s211_s18 }
  0x2b   : > { %p1383_p9 = pnand %p1560_p7, %p250_p13  ;;  %s1149_s9 = scalar_lea.hbm %s1379_s15, 16 }
  0x2c   : > { %p1150_p2 = scmp.ne.s32.totalorder %s1379_s15, %s1149_s9  ;;  %s1154_s21 = scalar_lea.hbm %s1550_s2, 48 }
  0x2d   : > { %s1561_s16 = scalar_select %p1383_p9, 1, 0 }
  0x2e   : > { %p1152_p3 = pnand %p1150_p2, %p1350_p11  ;;  %p1155_p5 = scmp.lt.u32.totalorder %s1379_s15, %s1550_s2 }
  0x2f   : > { %p1156_p6 = scmp.lt.u32.totalorder %s1154_s21, %s1149_s9  ;;  %p1158_p12 = scmp.lt.u32.totalorder %s1149_s9, %s1379_s15 }
  0x30   : > { %p1153_p4 = pneg %p1152_p3 }
  0x31   : > { %p1157_p10 = por %p1156_p6, %p1155_p5 }
  0x33   : > { %p1159_p0 = por %p1158_p12, %p1157_p10 }
  0x35   : > { %p1160_p1 = pnand %p1159_p0, %p1153_p4 }
  0x37   : > { %1163 = shalt.err (!%p1160_p1)
}
  0x38   : > { %s1164_s8 = scalar_lea.vmem %s212_s18, 16  ;;  %s1250_s10 = smov [#allocation2]  }
  0x39   : > { %p1165_p13 = scmp.ne.s32.totalorder %s212_s18, %s1164_s8  ;;  %s1169_s13 = sshll.u32 %s1250_s10, 4  ;;  %s1170_s13 = int_to_ptr.vmem [resolvable:$false] %s1169_s13 }
  0x3a   : > { %s1171_s17 = scalar_lea.vmem %s1170_s13, 32  ;;  %p1172_p3 = scmp.lt.s32.totalorder %s212_s18, %s1170_s13 }
  0x3b   : > { %p1167_p7 = pnand %p1165_p13, %p1350_p11  ;;  %p1173_p9 = scmp.lt.s32.totalorder %s1171_s17, %s1164_s8 }
  0x3d   : > { %p1168_p2 = pneg %p1167_p7  ;;  %p1174_p8 = por %p1173_p9, %p1172_p3 }
  0x3f   : > { %p1175_p5 = pnand %p1174_p8, %p1168_p2 }
  0x41   : > { %1178 = shalt.err (!%p1175_p5)
}
  0x42   : > { %p1562_p6 = scmp.ne.s32.totalorder %s1558_s30, 0  ;;  %s1410_s25 = scalar_lea.hbm %s1552_s4, %s1327_s29 }
  0x43   : > { %s238_s21 = scalar_lea.vmem [#allocation6], %s1324_s28  ;;  %s1179_s7 = scalar_lea.hbm %s1410_s25, 16 }
  0x44   : > { %1044 = dma.hbm_to_vmem [thread:$0]  (!%p1562_p6), %s1379_s15, 16, %s212_s18, %s202_s24  }
  0x45   : > { %s245_s6 = sshll.u32 %s238_s21, 4  ;;  %p1180_p8 = scmp.ne.s32.totalorder %s1410_s25, %s1179_s7  ;;  %s246_s6 = int_to_ptr.vmem [resolvable:$true] %s245_s6 }
  0x46   : > { %s1184_s15 = scalar_lea.hbm %s1552_s4, 48  ;;  %p1185_p10 = scmp.lt.u32.totalorder %s1410_s25, %s1552_s4 }
  0x47   : > { %p1182_p9 = pnand %p1180_p8, %p1350_p11  ;;  %p1186_p12 = scmp.lt.u32.totalorder %s1184_s15, %s1179_s7 }
  0x48   : > { %p1188_p1 = scmp.lt.u32.totalorder %s1179_s7, %s1410_s25 }
  0x49   : > { %p1183_p4 = pneg %p1182_p9  ;;  %p1187_p0 = por %p1186_p12, %p1185_p10 }
  0x4b   : > { %p1189_p13 = por %p1188_p1, %p1187_p0 }
  0x4d   : > { %p1190_p7 = pnand %p1189_p13, %p1183_p4 }
  0x4f   : > { %1193 = shalt.err (!%p1190_p7)
}
  0x50   : > { %s1194_s28 = scalar_lea.vmem %s246_s6, 16  ;;  %s1251_s29 = smov [#allocation6]  }
  0x51   : > { %p1195_p2 = scmp.ne.s32.totalorder %s246_s6, %s1194_s28  ;;  %s1199_s13 = sshll.u32 %s1251_s29, 4  ;;  %s1200_s13 = int_to_ptr.vmem [resolvable:$false] %s1199_s13 }
  0x52   : > { %s1201_s17 = scalar_lea.vmem %s1200_s13, 32  ;;  %p1202_p8 = scmp.lt.s32.totalorder %s246_s6, %s1200_s13 }
  0x53   : > { %p1197_p3 = pnand %p1195_p2, %p1350_p11  ;;  %p1203_p9 = scmp.lt.s32.totalorder %s1201_s17, %s1194_s28 }
  0x55   : > { %p1198_p5 = pneg %p1197_p3  ;;  %p1204_p6 = por %p1203_p9, %p1202_p8 }
  0x57   : > { %p1205_p10 = pnand %p1204_p6, %p1198_p5 }
  0x59   : > { %1208 = shalt.err (!%p1205_p10)
}
  0x5a   : > { %p1563_p12 = scmp.ne.s32.totalorder %s1558_s30, 0  ;;  %p1564_p4 = scmp.ne.s32.totalorder %s1561_s16, 0 }
  0x5b   : > { %s1434_s14 = sand.u32 (!%p1564_p4), 1, %s1239_s19   ;;  %p1565_p11 = scmp.ne.s32.totalorder (!%p1564_p4), %s1557_s27, 0 }
  0x5c   : > { %1050 = dma.hbm_to_vmem [thread:$0]  (!%p1563_p12), %s1410_s25, 16, %s246_s6, %s1344_s12  }
  0x5d   : > { %254 = sbr.rel (%p1564_p4) target bundleno = 437 (0x1b5), region = 40  ;;  %s257_s9 = scalar_lea.sflag (!%p1564_p4), [#allocation3], %s1434_s14 }
  0x5e   : > { %s259_s11 = scalar_lea.vmem (!%p1564_p4), [#allocation2], %s1434_s14 }
  0x64   : > { %1226 = dma.done.wait (%p1565_p11), %s257_s9, 16  }
  0x65   : > { %1228 = vsyncadd (%p1565_p11), %s257_s9, 4294967280  ;;  %s264_s30 = sand.u32 1, %s1302_s22   ;;  %s267_s16 = scalar_lea.vmem [#allocation4], %s1434_s14 }
  0x66   : > { %s265_s12 = scalar_lea.sflag [#allocation5], %s264_s30 }
  0x67   : > { %1230 = dma.done.wait (%p1565_p11), %s265_s12, 32  }
  0x68   : > { %1232 = vsyncadd (%p1565_p11), %s265_s12, 4294967264  ;;  %p314_p6 = scmp.lt.s32.totalorder %s1302_s22, 2  ;;  %v325_v32 = vld [vmem:[%s1548_s0] sm:$0xff]  ;;  %v327_v33 = vld [vmem:[%s1548_s0 + $0x10] sm:$0xff]  ;;  %v1252_v35 = vmov 0   ;;  %vm742_vm0 = vcmask 130048  }
  0x69   : > { %v326_v34 = vld [vmem:[%s1548_s0 + $0x8] sm:$0xff]  ;;  %v333_v36 = vmax.bf16 %v1252_v35, %v325_v32  ;;  %v335_v37 = vmax.bf16 %v1252_v35, %v327_v33  ;;  %v328_v38 = vld [vmem:[%s1548_s0 + $0x18] sm:$0xff]  ;;  %v329_v40 = vld [vmem:[%s1548_s0 + $0x20] sm:$0xff] }
  0x6a   : > { %s1571_s22 = smov (!%p314_p6, %s1302_s22), 2  ;;  %v334_v39 = vmax.bf16 %v1252_v35, %v326_v34  ;;  %v331_v41 = vld [vmem:[%s1548_s0 + $0x30] sm:$0xff]  ;;  %v336_v42 = vmax.bf16 %v1252_v35, %v328_v38  ;;  %v337_v43 = vmax.bf16 %v1252_v35, %v329_v40  ;;  %v330_v45 = vld [vmem:[%s1548_s0 + $0x28] sm:$0xff]  ;;  %v332_v46 = vld [vmem:[%s1548_s0 + $0x38] sm:$0xff] }
  0x6b   : > { %s977_s25 = sshll.u32 %s1571_s22, 8  ;;  %v339_v44 = vmax.bf16 %v1252_v35, %v331_v41  ;;  %v935_v47 = vcombine.high %v333_v36, %v335_v37  ;;  %v934_v48 = vcombine.low %v333_v36, %v335_v37  ;;  %v338_v49 = vmax.bf16 %v1252_v35, %v330_v45  ;;  %v933_v59 = vld [vmem:[%s259_s11] ss:$0 sm:$0xff]  ;;  %s978_s11 = sshll.u32 %s1571_s22, 5 }
  0x6c   : > { %s1456_s7 = scalar_lea.vmem %s1549_s1, %s977_s25  ;;  %v340_v50 = vmax.bf16 %v1252_v35, %v332_v46  ;;  %v937_v51 = vcombine.high %v334_v39, %v336_v42  ;;  %v936_v52 = vcombine.low %v334_v39, %v336_v42  ;;  %s323_s10 = scalar_lea.vmem %s1553_s5, %s978_s11 }
  0x6d   : > { %v1085_v0 = vld [vmem:[%s1456_s7 + $0x40] sm:$0xff]   ;;  %v1089_v4 = vld [vmem:[%s1456_s7 + $0x48] sm:$0xff]   ;;  %v1093_v8 = vld [vmem:[%s1456_s7 + $0x50] sm:$0xff]   ;;  %v939_v53 = vcombine.high %v337_v43, %v339_v44  ;;  %676 = vmatprep.mubr.bf16.mxu0 %v935_v47  ;;  %v938_v55 = vcombine.low %v337_v43, %v339_v44 }
  0x6e   : > { %v1086_v1 = vld [vmem:[%s1456_s7 + $0xc0] sm:$0xff]   ;;  %979 = vmatprep.subr.bf16.mxu0 %v1085_v0  ;;  %v1090_v5 = vld [vmem:[%s1456_s7 + $0xc8] sm:$0xff]   ;;  %v1094_v9 = vld [vmem:[%s1456_s7 + $0xd0] sm:$0xff]   ;;  %v941_v54 = vcombine.high %v338_v49, %v340_v50  ;;  %725 = vmatprep.mubr.bf16.mxu1 %v937_v51  ;;  %v940_v56 = vcombine.low %v338_v49, %v340_v50 }
  0x6f   : > { %v1087_v2 = vld [vmem:[%s1456_s7] sm:$0xff]   ;;  %1007 = vmatprep.subr.bf16.mxu1 %v1086_v1  ;;  %v1091_v6 = vld [vmem:[%s1456_s7 + $0x8] sm:$0xff]   ;;  %v1095_v10 = vld [vmem:[%s1456_s7 + $0x10] sm:$0xff]  }
  0x70   : > { %v1088_v3 = vld [vmem:[%s1456_s7 + $0x80] sm:$0xff]   ;;  %980 = vmatpush3.bf16.msra.mxu0 %v1087_v2  ;;  %v1092_v7 = vld [vmem:[%s1456_s7 + $0x88] sm:$0xff]   ;;  %v1096_v11 = vld [vmem:[%s1456_s7 + $0x90] sm:$0xff]  }
  0x71   : > { %1008 = vmatpush3.bf16.msra.mxu1 %v1088_v3  ;;  %981 = vmatprep.subr.bf16.mxu0 %v1089_v4  ;;  %v1097_v12 = vld [vmem:[%s1456_s7 + $0x58] sm:$0xff]   ;;  %v1101_v16 = vld [vmem:[%s1456_s7 + $0x60] sm:$0xff]   ;;  %v1105_v20 = vld [vmem:[%s1456_s7 + $0x68] sm:$0xff]  }
  0x72   : > { %1009 = vmatprep.subr.bf16.mxu1 %v1090_v5  ;;  %v1098_v13 = vld [vmem:[%s1456_s7 + $0xd8] sm:$0xff]   ;;  %v1102_v17 = vld [vmem:[%s1456_s7 + $0xe0] sm:$0xff]   ;;  %v1106_v21 = vld [vmem:[%s1456_s7 + $0xe8] sm:$0xff]  }
  0x73   : > { %v1099_v14 = vld [vmem:[%s1456_s7 + $0x18] sm:$0xff]   ;;  %v1103_v18 = vld [vmem:[%s1456_s7 + $0x20] sm:$0xff]   ;;  %v1107_v22 = vld [vmem:[%s1456_s7 + $0x28] sm:$0xff]  }
  0x74   : > { %982 = vmatpush3.bf16.msra.mxu0 %v1091_v6  ;;  %v1100_v15 = vld [vmem:[%s1456_s7 + $0x98] sm:$0xff]   ;;  %v1104_v19 = vld [vmem:[%s1456_s7 + $0xa0] sm:$0xff]   ;;  %v1108_v23 = vld [vmem:[%s1456_s7 + $0xa8] sm:$0xff]  }
  0x75   : > { %1010 = vmatpush3.bf16.msra.mxu1 %v1092_v7  ;;  %983 = vmatprep.subr.bf16.mxu0 %v1093_v8  ;;  %v1109_v24 = vld [vmem:[%s1456_s7 + $0x70] sm:$0xff]   ;;  %v1113_v28 = vld [vmem:[%s1456_s7 + $0x78] sm:$0xff]  }
  0x76   : > { %1011 = vmatprep.subr.bf16.mxu1 %v1094_v9  ;;  %v1110_v25 = vld [vmem:[%s1456_s7 + $0xf0] sm:$0xff]   ;;  %v1114_v29 = vld [vmem:[%s1456_s7 + $0xf8] sm:$0xff]  }
  0x77   : > { %v1111_v26 = vld [vmem:[%s1456_s7 + $0x30] sm:$0xff]   ;;  %v1115_v30 = vld [vmem:[%s1456_s7 + $0x38] sm:$0xff]  }
  0x78   : > { %984 = vmatpush3.bf16.msra.mxu0 %v1095_v10  ;;  %v1112_v27 = vld [vmem:[%s1456_s7 + $0xb0] sm:$0xff]   ;;  %v1116_v31 = vld [vmem:[%s1456_s7 + $0xb8] sm:$0xff]   ;;  %s275_s7 = scalar_lea.vmem [#allocation6], %s1434_s14 }
  0x79   : > { %1012 = vmatpush3.bf16.msra.mxu1 %v1096_v11  ;;  %985 = vmatprep.subr.bf16.mxu0 %v1097_v12 }
  0x7a   : > { %1013 = vmatprep.subr.bf16.mxu1 %v1098_v13 }
  0x7c   : > { %986 = vmatpush3.bf16.msra.mxu0 %v1099_v14 }
  0x7d   : > { %1014 = vmatpush3.bf16.msra.mxu1 %v1100_v15  ;;  %987 = vmatprep.subr.bf16.mxu0 %v1101_v16 }
  0x7e   : > { %1015 = vmatprep.subr.bf16.mxu1 %v1102_v17 }
  0x80   : > { %988 = vmatpush3.bf16.msra.mxu0 %v1103_v18 }
  0x81   : > { %1016 = vmatpush3.bf16.msra.mxu1 %v1104_v19  ;;  %989 = vmatprep.subr.bf16.mxu0 %v1105_v20 }
  0x82   : > { %1017 = vmatprep.subr.bf16.mxu1 %v1106_v21 }
  0x84   : > { %990 = vmatpush3.bf16.msra.mxu0 %v1107_v22 }
  0x85   : > { %1018 = vmatpush3.bf16.msra.mxu1 %v1108_v23  ;;  %991 = vmatprep.subr.bf16.mxu0 %v1109_v24 }
  0x86   : > { %1019 = vmatprep.subr.bf16.mxu1 %v1110_v25 }
  0x88   : > { %992 = vmatpush3.bf16.msra.mxu0 %v1111_v26 }
  0x89   : > { %1020 = vmatpush3.bf16.msra.mxu1 %v1112_v27  ;;  %993 = vmatprep.subr.bf16.mxu0 %v1113_v28 }
  0x8a   : > { %1021 = vmatprep.subr.bf16.mxu1 %v1114_v29 }
  0x8c   : > { %994 = vmatpush3.bf16.msra.mxu0 %v1115_v30 }
  0x8d   : > { %1022 = vmatpush3.bf16.msra.mxu1 %v1116_v31 }
  0x8f   : > { %677 = vmatmul.mubr.bf16.vlgmr.msra.gmra.mrb[0].mxu0 %v934_v48 }
  0x90   : > { %726 = vmatmul.mubr.bf16.vlgmr.msra.gmra.mrb[0].mxu1 %v936_v52  ;;  %684 = vmatprep.mubr.bf16.mxu0 %v939_v53 }
  0x91   : > { %733 = vmatprep.mubr.bf16.mxu1 %v941_v54 }
  0x97   : > { %685 = vmatmul.mubr.bf16.gmra.mrb[4].mxu0 %v938_v55 }
  0x98   : > { %734 = vmatmul.mubr.bf16.gmra.mrb[4].mxu1 %v940_v56 }
 0x162   : > { %v995_v57 = vpop.f32.mrb[0].mxu0 }
 0x163   : > { %v1023_v58 = vpop.f32.mrb[0].mxu1  ;;  %v996_v60 = vpop.f32.mrb[1].mxu0 }
 0x164   : > { %v997_v61 = vadd.f32 %v996_v60, %v995_v57  ;;  %v1024_v62 = vpop.f32.mrb[1].mxu1  ;;  %v998_v63 = vpop.f32.mrb[2].mxu0 }
 0x165   : > { %v1025_v0 = vadd.f32 %v1024_v62, %v1023_v58  ;;  %v1026_v1 = vpop.f32.mrb[2].mxu1  ;;  %v999_v2 = vpop.f32.mrb[3].mxu0 }
 0x166   : > { %v679_v3 = vadd.f32 %v997_v61, %v933_v59  ;;  %v1000_v4 = vadd.f32 %v999_v2, %v998_v63  ;;  %v1027_v5 = vpop.f32.mrb[3].mxu1  ;;  %v785_v63 = vlaneseq }
 0x167   : > { %v1028_v6 = vadd.f32 %v1027_v5, %v1026_v1  ;;  %v780_v1 = vld [vmem:[%s267_s16] sm:$0x1] }
 0x168   : > { %v728_v7 = vadd.f32 %v1025_v0, %v679_v3  ;;  %v682_v8 = vadd.f32 %v1000_v4, %v933_v59  ;;  %v786_v0 = vshrl.u32 %v785_v63, 7 }
 0x16a   : > { %v731_v9 = vadd.f32 %v1028_v6, %v682_v8  ;;  %v1001_v10 = vpop.f32.mrb[4].mxu0  ;;  %v743_v13 = vsel %vm742_vm0, %v728_v7, 0.0  ;;  %v787_v2 = vsub.s32 0, %v786_v0  ;;  %v974_v6 = vld [vmem:[%s275_s7] ss:$0 sm:$0xff] }
 0x16b   : > { %v1029_v11 = vpop.f32.mrb[4].mxu1  ;;  %v1002_v12 = vpop.f32.mrb[5].mxu0 }
 0x16c   : > { %v744_v14 = vsel %vm742_vm0, %v731_v9, 0.0  ;;  %v1003_v15 = vadd.f32 %v1002_v12, %v1001_v10  ;;  %v1030_v16 = vpop.f32.mrb[5].mxu1  ;;  %v1004_v17 = vpop.f32.mrb[6].mxu0 }
 0x16d   : > { %v745_v18 = vadd.f32 %v744_v14, %v743_v13  ;;  %v1031_v19 = vadd.f32 %v1030_v16, %v1029_v11  ;;  %v1032_v20 = vpop.f32.mrb[6].mxu1  ;;  %v1005_v21 = vpop.f32.mrb[7].mxu0 }
 0x16e   : > { %v687_v22 = vadd.f32 %v1003_v15, %v933_v59  ;;  %v1006_v23 = vadd.f32 %v1005_v21, %v1004_v17  ;;  %v1033_v24 = vpop.f32.mrb[7].mxu1 }
 0x16f   : > { %v1034_v25 = vadd.f32 %v1033_v24, %v1032_v20 }
 0x170   : > { %v736_v26 = vadd.f32 %v1031_v19, %v687_v22  ;;  %v690_v27 = vadd.f32 %v1006_v23, %v933_v59 }
 0x172   : > { %v746_v28 = vsel %vm742_vm0, %v736_v26, 0.0  ;;  %v739_v29 = vadd.f32 %v1034_v25, %v690_v27 }
 0x173   : > { %v747_v30 = vadd.f32 %v746_v28, %v745_v18 }
 0x174   : > { %v748_v31 = vsel %vm742_vm0, %v739_v29, 0.0 }
 0x175   : > { %v749_v32 = vadd.f32 %v748_v31, %v747_v30 }
 0x177   : > { %v750_v33 = vrot.slane %v749_v32, 4 }
 0x179   : > { %v751_v34 = vadd.f32 %v750_v33, %v749_v32 }
 0x17b   : > { %v752_v35 = vrot.slane %v751_v34, 2 }
 0x17d   : > { %v753_v36 = vadd.f32 %v752_v35, %v751_v34 }
 0x17f   : > { %v754_v37 = vrot.slane %v753_v36, 1 }
 0x181   : > { %v755_v38 = vadd.f32 %v754_v37, %v753_v36 }
 0x183   : > { %v757_v39 = vmul.f32 0.03125, %v755_v38 }
 0x185   : > { %v758_v40 = vsub.f32 %v728_v7, %v757_v39  ;;  %v759_v41 = vsub.f32 %v731_v9, %v757_v39  ;;  %v760_v42 = vsub.f32 %v736_v26, %v757_v39  ;;  %v761_v43 = vsub.f32 %v739_v29, %v757_v39 }
 0x187   : > { %v762_v44 = vmul.f32 %v758_v40, %v758_v40  ;;  %v763_v45 = vmul.f32 %v759_v41, %v759_v41  ;;  %v764_v46 = vmul.f32 %v760_v42, %v760_v42  ;;  %v765_v47 = vmul.f32 %v761_v43, %v761_v43 }
 0x189   : > { %v766_v48 = vsel %vm742_vm0, %v762_v44, 0.0  ;;  %v767_v49 = vsel %vm742_vm0, %v763_v45, 0.0  ;;  %v769_v51 = vsel %vm742_vm0, %v764_v46, 0.0  ;;  %v771_v53 = vsel %vm742_vm0, %v765_v47, 0.0 }
 0x18a   : > { %v768_v50 = vadd.f32 %v767_v49, %v766_v48 }
 0x18c   : > { %v770_v52 = vadd.f32 %v769_v51, %v768_v50 }
 0x18e   : > { %v772_v54 = vadd.f32 %v771_v53, %v770_v52 }
 0x190   : > { %v773_v55 = vrot.slane %v772_v54, 4 }
 0x192   : > { %v774_v56 = vadd.f32 %v773_v55, %v772_v54 }
 0x194   : > { %v775_v57 = vrot.slane %v774_v56, 2 }
 0x196   : > { %v776_v58 = vadd.f32 %v775_v57, %v774_v56 }
 0x198   : > { %v777_v59 = vrot.slane %v776_v58, 1 }
 0x19a   : > { %v778_v60 = vadd.f32 %v777_v59, %v776_v58 }
 0x19c   : > { %v779_v61 = vmul.f32 0.03125, %v778_v60 }
 0x19e   : > { %v781_v62 = vadd.f32 1e-05, %v779_v61 }
 0x1a0   : > { %1117 = vrsqrt.f32 %v781_v62 }
 0x1aa   : > { %v1118_v3 = vpop.eup %1117 }
 0x1ab   : > { %v783_v4 = vmul.f32 %v1118_v3, %v780_v1 }
 0x1ad   : > { %v788_v5 = vrot.slane %v783_v4, %v787_v2 }
 0x1af   : > { %v790_v7 = vmul.f32 %v788_v5, %v758_v40  ;;  %v791_v8 = vmul.f32 %v788_v5, %v759_v41  ;;  %v792_v9 = vmul.f32 %v788_v5, %v760_v42  ;;  %v793_v10 = vmul.f32 %v788_v5, %v761_v43 }
 0x1b1   : > { %v801_v11 = vadd.f32 %v974_v6, %v790_v7  ;;  %v802_v12 = vadd.f32 %v974_v6, %v791_v8  ;;  %v803_v13 = vadd.f32 %v974_v6, %v792_v9  ;;  %v804_v14 = vadd.f32 %v974_v6, %v793_v10 }
 0x1b3   : > { %805 = vst.msk [vmem:[%s323_s10] sm:$0xff] %vm742_vm0, %v801_v11  ;;  %806 = vst.msk [vmem:[%s323_s10 + $0x8] sm:$0xff] %vm742_vm0, %v802_v12 }
 0x1b4   : > { %807 = vst.msk [vmem:[%s323_s10 + $0x10] sm:$0xff] %vm742_vm0, %v803_v13  ;;  %808 = vst.msk [vmem:[%s323_s10 + $0x18] sm:$0xff] %vm742_vm0, %v804_v14 }
 0x1b5 PF: > { %p18_p0 = scmp.ge.s32.totalorder %s1305_s23, 5   ;;  %s1566_s18 = smov %s1239_s19 }
 0x1b6   : > { %s1567_s19 = smov %s1243_s20  ;;  %s1568_s20 = smov %s1315_s26 }
 0x1b7   : > { %s1569_s21 = smov %s1305_s23  ;;  %20 = sbr.rel (!%p18_p0) target bundleno = 5 (0x5), region = 107 }
 0x1be   :  { %830 = vsyncpa [#allocation3], 1 }
 0x1bf   :  { %832 = vsyncpa [#allocation3 + $0x1], 1 }
 0x1c0   :  { %833 = vsyncpa [#allocation5], 1 }
 0x1c1   :  { %835 = vsyncpa [#allocation5 + $0x1], 1 }

// kernel: forward_nchw.10
= control target key start
LH: loop header
LB: loop body
LE: loop exit
PB: predicated region body
PF: predicated region fallthrough
CT: control target
= control target key end

     0   :  { %s1530_s18 = smov 0   ;;  %s1878_s0 = inlined_call_operand.vmem [shape: bf16[3,128,512], index: 0, kind: input, shape index: {}]   ;;  %s1879_s1 = inlined_call_operand.vmem [shape: bf16[3,512,8], index: 1, kind: input, shape index: {}]   ;;  %s1880_s2 = inlined_call_operand.vmem [shape: f32[3,1,8], index: 2, kind: input, shape index: {}]   ;;  %s1881_s3 = inlined_call_operand.vmem [shape: f32[3,1,8], index: 3, kind: input, shape index: {}]   ;;  %s1882_s4 = inlined_call_operand.vmem [shape: f32[3,1,8], index: 4, kind: input, shape index: {}]   ;;  %s1883_s5 = inlined_call_operand.vmem [shape: f32[3,128,8], index: 5, kind: output, shape index: {}]  }
   0x1 LB: > { %s1238_s19 = sadd.s32 4294967295, %s1497_s18   ;;  %p1242_p0 = scmp.ge.s32.totalorder %s1497_s18, 1  ;;  %s1497_s18 = sphi %s1530_s18, %s15_s18  }
   0x2   : > { %p221_p1 = scmp.lt.s32.totalorder %s1497_s18, 4 }
   0x4   : > { %p222_p2 = pnand %p1242_p0, %p221_p1 }
   0x5   : > { %p263_p3 = scmp.lt.s32.totalorder (!%p222_p2), %s1238_s19, 2  ;;  %v1499_v35 = vmov (!%p222_p2), 0   ;;  %vm969_vm0 = vcmask (!%p222_p2), 64512  }
   0x6   : > { %225 = sbr.rel (%p222_p2) target bundleno = 427 (0x1ab), region = 40 }
   0xd   : > { %s1885_s19 = smov (!%p263_p3, %s1238_s19), 2 }
   0xe   : > { %s1317_s20 = sshll.u32 %s1885_s19, 8  ;;  %s275_s29 = scalar_lea.vmem %s1880_s2, %s1885_s19 }
   0xf   : > { %s1546_s23 = scalar_lea.vmem %s1879_s1, %s1317_s20  ;;  %s1583_s26 = scalar_lea.vmem %s1878_s0, %s1317_s20 }
  0x10   : > { %v1457_v0 = vld [vmem:[%s1546_s23 + $0x40] sm:$0xff]   ;;  %v1461_v4 = vld [vmem:[%s1546_s23 + $0x48] sm:$0xff]   ;;  %v1465_v8 = vld [vmem:[%s1546_s23 + $0x50] sm:$0xff]   ;;  %s278_s7 = scalar_lea.vmem %s1881_s3, %s1885_s19  ;;  %s281_s10 = scalar_lea.vmem %s1882_s4, %s1885_s19 }
  0x11   : > { %v1458_v1 = vld [vmem:[%s1546_s23 + $0xc0] sm:$0xff]   ;;  %1320 = vmatprep.subr.bf16.mxu0 %v1457_v0  ;;  %v1462_v5 = vld [vmem:[%s1546_s23 + $0xc8] sm:$0xff]   ;;  %v1466_v9 = vld [vmem:[%s1546_s23 + $0xd0] sm:$0xff]   ;;  %s1319_s11 = sshll.u32 %s1885_s19, 7 }
  0x12   : > { %v1459_v2 = vld [vmem:[%s1546_s23] sm:$0xff]   ;;  %1384 = vmatprep.subr.bf16.mxu1 %v1458_v1  ;;  %v1463_v6 = vld [vmem:[%s1546_s23 + $0x8] sm:$0xff]   ;;  %v1467_v10 = vld [vmem:[%s1546_s23 + $0x10] sm:$0xff]   ;;  %s1837_s14 = scalar_lea.vmem %s1883_s5, %s1319_s11 }
  0x13   : > { %v1460_v3 = vld [vmem:[%s1546_s23 + $0x80] sm:$0xff]   ;;  %1321 = vmatpush3.bf16.msra.mxu0 %v1459_v2  ;;  %v1464_v7 = vld [vmem:[%s1546_s23 + $0x88] sm:$0xff]   ;;  %v1468_v11 = vld [vmem:[%s1546_s23 + $0x90] sm:$0xff]  }
  0x14   : > { %1385 = vmatpush3.bf16.msra.mxu1 %v1460_v3  ;;  %1322 = vmatprep.subr.bf16.mxu0 %v1461_v4  ;;  %v1469_v12 = vld [vmem:[%s1546_s23 + $0x58] sm:$0xff]   ;;  %v1473_v16 = vld [vmem:[%s1546_s23 + $0x60] sm:$0xff]   ;;  %v1477_v20 = vld [vmem:[%s1546_s23 + $0x68] sm:$0xff]  }
  0x15   : > { %1386 = vmatprep.subr.bf16.mxu1 %v1462_v5  ;;  %v1470_v13 = vld [vmem:[%s1546_s23 + $0xd8] sm:$0xff]   ;;  %v1474_v17 = vld [vmem:[%s1546_s23 + $0xe0] sm:$0xff]   ;;  %v1478_v21 = vld [vmem:[%s1546_s23 + $0xe8] sm:$0xff]  }
  0x16   : > { %v1471_v14 = vld [vmem:[%s1546_s23 + $0x18] sm:$0xff]   ;;  %v1475_v18 = vld [vmem:[%s1546_s23 + $0x20] sm:$0xff]   ;;  %v1479_v22 = vld [vmem:[%s1546_s23 + $0x28] sm:$0xff]  }
  0x17   : > { %1323 = vmatpush3.bf16.msra.mxu0 %v1463_v6  ;;  %v1472_v15 = vld [vmem:[%s1546_s23 + $0x98] sm:$0xff]   ;;  %v1476_v19 = vld [vmem:[%s1546_s23 + $0xa0] sm:$0xff]   ;;  %v1480_v23 = vld [vmem:[%s1546_s23 + $0xa8] sm:$0xff]  }
  0x18   : > { %1387 = vmatpush3.bf16.msra.mxu1 %v1464_v7  ;;  %1324 = vmatprep.subr.bf16.mxu0 %v1465_v8  ;;  %v1481_v24 = vld [vmem:[%s1546_s23 + $0x70] sm:$0xff]   ;;  %v1485_v28 = vld [vmem:[%s1546_s23 + $0x78] sm:$0xff]   ;;  %v288_v32 = vld [vmem:[%s1583_s26] sm:$0xff] }
  0x19   : > { %1388 = vmatprep.subr.bf16.mxu1 %v1466_v9  ;;  %v1482_v25 = vld [vmem:[%s1546_s23 + $0xf0] sm:$0xff]   ;;  %v1486_v29 = vld [vmem:[%s1546_s23 + $0xf8] sm:$0xff]   ;;  %v289_v34 = vld [vmem:[%s1583_s26 + $0x8] sm:$0xff]  ;;  %v320_v36 = vmax.bf16 %v1499_v35, %v288_v32 }
  0x1a   : > { %v1483_v26 = vld [vmem:[%s1546_s23 + $0x30] sm:$0xff]   ;;  %v1487_v30 = vld [vmem:[%s1546_s23 + $0x38] sm:$0xff]   ;;  %v321_v39 = vmax.bf16 %v1499_v35, %v289_v34  ;;  %v292_v40 = vld [vmem:[%s1583_s26 + $0x20] sm:$0xff] }
  0x1b   : > { %1325 = vmatpush3.bf16.msra.mxu0 %v1467_v10  ;;  %v1484_v27 = vld [vmem:[%s1546_s23 + $0xb0] sm:$0xff]   ;;  %v1488_v31 = vld [vmem:[%s1546_s23 + $0xb8] sm:$0xff]   ;;  %v324_v43 = vmax.bf16 %v1499_v35, %v292_v40  ;;  %v293_v45 = vld [vmem:[%s1583_s26 + $0x28] sm:$0xff] }
  0x1c   : > { %1389 = vmatpush3.bf16.msra.mxu1 %v1468_v11  ;;  %1326 = vmatprep.subr.bf16.mxu0 %v1469_v12  ;;  %v290_v33 = vld [vmem:[%s1583_s26 + $0x10] sm:$0xff]  ;;  %v291_v38 = vld [vmem:[%s1583_s26 + $0x18] sm:$0xff]  ;;  %v325_v49 = vmax.bf16 %v1499_v35, %v293_v45  ;;  %v296_v54 = vld [vmem:[%s1583_s26 + $0x40] sm:$0xff] }
  0x1d   : > { %1390 = vmatprep.subr.bf16.mxu1 %v1470_v13  ;;  %v322_v37 = vmax.bf16 %v1499_v35, %v290_v33  ;;  %v294_v41 = vld [vmem:[%s1583_s26 + $0x30] sm:$0xff]  ;;  %v323_v42 = vmax.bf16 %v1499_v35, %v291_v38  ;;  %v295_v46 = vld [vmem:[%s1583_s26 + $0x38] sm:$0xff]  ;;  %v297_v57 = vld [vmem:[%s1583_s26 + $0x48] sm:$0xff]  ;;  %v328_v59 = vmax.bf16 %v1499_v35, %v296_v54 }
  0x1e   : > { %v326_v44 = vmax.bf16 %v1499_v35, %v294_v41  ;;  %v327_v50 = vmax.bf16 %v1499_v35, %v295_v46  ;;  %v298_v55 = vld [vmem:[%s1583_s26 + $0x50] sm:$0xff]  ;;  %v299_v58 = vld [vmem:[%s1583_s26 + $0x58] sm:$0xff]  ;;  %v329_v61 = vmax.bf16 %v1499_v35, %v297_v57  ;;  %v300_v3 = vld [vmem:[%s1583_s26 + $0x60] sm:$0xff] }
  0x1f   : > { %1327 = vmatpush3.bf16.msra.mxu0 %v1471_v14  ;;  %v1251_v47 = vcombine.high %v320_v36, %v322_v37  ;;  %v1250_v48 = vcombine.low %v320_v36, %v322_v37  ;;  %v1253_v51 = vcombine.high %v321_v39, %v323_v42  ;;  %v1252_v52 = vcombine.low %v321_v39, %v323_v42  ;;  %v302_v4 = vld [vmem:[%s1583_s26 + $0x70] sm:$0xff]  ;;  %v301_v5 = vld [vmem:[%s1583_s26 + $0x68] sm:$0xff]  ;;  %v303_v6 = vld [vmem:[%s1583_s26 + $0x78] sm:$0xff] }
  0x20   : > { %1391 = vmatpush3.bf16.msra.mxu1 %v1472_v15  ;;  %1328 = vmatprep.subr.bf16.mxu0 %v1473_v16  ;;  %v1255_v53 = vcombine.high %v324_v43, %v326_v44  ;;  %v1257_v56 = vcombine.high %v325_v49, %v327_v50  ;;  %v330_v60 = vmax.bf16 %v1499_v35, %v298_v55  ;;  %v304_v15 = vld [vmem:[%s1583_s26 + $0x80] sm:$0xff]  ;;  %v306_v16 = vld [vmem:[%s1583_s26 + $0x90] sm:$0xff]  ;;  %v313_v42 = vld [vmem:[%s1583_s26 + $0xc8] sm:$0xff] }
  0x21   : > { %1392 = vmatprep.subr.bf16.mxu1 %v1474_v17  ;;  %807 = vmatprep.mubr.bf16.mxu0 %v1251_v47  ;;  %v331_v62 = vmax.bf16 %v1499_v35, %v299_v58  ;;  %v1254_v63 = vcombine.low %v324_v43, %v326_v44  ;;  %v1256_v0 = vcombine.low %v325_v49, %v327_v50  ;;  %v305_v17 = vld [vmem:[%s1583_s26 + $0x88] sm:$0xff]  ;;  %v312_v40 = vld [vmem:[%s1583_s26 + $0xc0] sm:$0xff]  ;;  %v314_v41 = vld [vmem:[%s1583_s26 + $0xd0] sm:$0xff] }
  0x22   : > { %904 = vmatprep.mubr.bf16.mxu1 %v1253_v51  ;;  %v1259_v1 = vcombine.high %v328_v59, %v330_v60  ;;  %v332_v7 = vmax.bf16 %v1499_v35, %v300_v3  ;;  %v334_v8 = vmax.bf16 %v1499_v35, %v302_v4  ;;  %v333_v9 = vmax.bf16 %v1499_v35, %v301_v5  ;;  %v315_v43 = vld [vmem:[%s1583_s26 + $0xd8] sm:$0xff]  ;;  %v317_v54 = vld [vmem:[%s1583_s26 + $0xe8] sm:$0xff]  ;;  %v1655_v4 = vld [vmem:[%s275_s29] ss:$0 sm:$0xff] }
  0x23   : > { %1329 = vmatpush3.bf16.msra.mxu0 %v1475_v18  ;;  %v1261_v2 = vcombine.high %v329_v61, %v331_v62  ;;  %v335_v10 = vmax.bf16 %v1499_v35, %v303_v6  ;;  %v1258_v11 = vcombine.low %v328_v59, %v330_v60  ;;  %v1260_v12 = vcombine.low %v329_v61, %v331_v62  ;;  %v307_v18 = vld [vmem:[%s1583_s26 + $0x98] sm:$0xff] }
  0x24   : > { %1393 = vmatpush3.bf16.msra.mxu1 %v1476_v19  ;;  %1330 = vmatprep.subr.bf16.mxu0 %v1477_v20  ;;  %v1263_v13 = vcombine.high %v332_v7, %v334_v8  ;;  %v336_v19 = vmax.bf16 %v1499_v35, %v304_v15  ;;  %v338_v20 = vmax.bf16 %v1499_v35, %v306_v16  ;;  %v319_v55 = vld [vmem:[%s1583_s26 + $0xf8] sm:$0xff] }
  0x25   : > { %1394 = vmatprep.subr.bf16.mxu1 %v1478_v21  ;;  %v1265_v14 = vcombine.high %v333_v9, %v335_v10  ;;  %v337_v21 = vmax.bf16 %v1499_v35, %v305_v17  ;;  %v344_v44 = vmax.bf16 %v1499_v35, %v312_v40  ;;  %v346_v45 = vmax.bf16 %v1499_v35, %v314_v41 }
  0x26   : > { %v1266_v36 = vcombine.low %v336_v19, %v338_v20  ;;  %v345_v46 = vmax.bf16 %v1499_v35, %v313_v42  ;;  %v347_v47 = vmax.bf16 %v1499_v35, %v315_v43  ;;  %v349_v58 = vmax.bf16 %v1499_v35, %v317_v54 }
  0x27   : > { %1331 = vmatpush3.bf16.msra.mxu0 %v1479_v22  ;;  %v339_v22 = vmax.bf16 %v1499_v35, %v307_v18  ;;  %v1275_v50 = vcombine.high %v344_v44, %v346_v45  ;;  %v351_v59 = vmax.bf16 %v1499_v35, %v319_v55  ;;  %v1274_v60 = vcombine.low %v344_v44, %v346_v45 }
  0x28   : > { %1395 = vmatpush3.bf16.msra.mxu1 %v1480_v23  ;;  %1332 = vmatprep.subr.bf16.mxu0 %v1481_v24  ;;  %v1262_v23 = vcombine.low %v332_v7, %v334_v8  ;;  %v1264_v24 = vcombine.low %v333_v9, %v335_v10  ;;  %v1277_v51 = vcombine.high %v345_v46, %v347_v47 }
  0x29   : > { %1396 = vmatprep.subr.bf16.mxu1 %v1482_v25  ;;  %v1267_v25 = vcombine.high %v336_v19, %v338_v20  ;;  %v1268_v37 = vcombine.low %v337_v21, %v339_v22  ;;  %v1276_v61 = vcombine.low %v345_v46, %v347_v47 }
  0x2b   : > { %1333 = vmatpush3.bf16.msra.mxu0 %v1483_v26  ;;  %v1269_v26 = vcombine.high %v337_v21, %v339_v22 }
  0x2c   : > { %1397 = vmatpush3.bf16.msra.mxu1 %v1484_v27  ;;  %1334 = vmatprep.subr.bf16.mxu0 %v1485_v28  ;;  %v308_v27 = vld [vmem:[%s1583_s26 + $0xa0] sm:$0xff]  ;;  %v310_v28 = vld [vmem:[%s1583_s26 + $0xb0] sm:$0xff] }
  0x2d   : > { %1398 = vmatprep.subr.bf16.mxu1 %v1486_v29  ;;  %v309_v29 = vld [vmem:[%s1583_s26 + $0xa8] sm:$0xff]  ;;  %v342_v32 = vmax.bf16 %v1499_v35, %v310_v28 }
  0x2e   : > { %v341_v33 = vmax.bf16 %v1499_v35, %v309_v29 }
  0x2f   : > { %1335 = vmatpush3.bf16.msra.mxu0 %v1487_v30  ;;  %v311_v30 = vld [vmem:[%s1583_s26 + $0xb8] sm:$0xff] }
  0x30   : > { %1399 = vmatpush3.bf16.msra.mxu1 %v1488_v31  ;;  %v340_v31 = vmax.bf16 %v1499_v35, %v308_v27  ;;  %v343_v34 = vmax.bf16 %v1499_v35, %v311_v30 }
  0x32   : > { %808 = vmatmul.mubr.bf16.vlgmr.msra.gmra.mrb[0].mxu0 %v1250_v48  ;;  %v1271_v38 = vcombine.high %v340_v31, %v342_v32  ;;  %v1273_v39 = vcombine.high %v341_v33, %v343_v34  ;;  %v1270_v48 = vcombine.low %v340_v31, %v342_v32  ;;  %v1272_v49 = vcombine.low %v341_v33, %v343_v34 }
  0x33   : > { %905 = vmatmul.mubr.bf16.vlgmr.msra.gmra.mrb[0].mxu1 %v1252_v52  ;;  %815 = vmatprep.mubr.bf16.mxu0 %v1255_v53  ;;  %v316_v52 = vld [vmem:[%s1583_s26 + $0xe0] sm:$0xff]  ;;  %v318_v53 = vld [vmem:[%s1583_s26 + $0xf0] sm:$0xff] }
  0x34   : > { %912 = vmatprep.mubr.bf16.mxu1 %v1257_v56  ;;  %v348_v56 = vmax.bf16 %v1499_v35, %v316_v52  ;;  %v350_v57 = vmax.bf16 %v1499_v35, %v318_v53 }
  0x36   : > { %v1279_v62 = vcombine.high %v348_v56, %v350_v57 }
  0x3a   : > { %816 = vmatmul.mubr.bf16.gmra.mrb[4].mxu0 %v1254_v63  ;;  %v1281_v63 = vcombine.high %v349_v58, %v351_v59 }
  0x3b   : > { %913 = vmatmul.mubr.bf16.gmra.mrb[4].mxu1 %v1256_v0  ;;  %823 = vmatprep.mubr.bf16.mxu0 %v1259_v1  ;;  %v1278_v0 = vcombine.low %v348_v56, %v350_v57  ;;  %v1280_v1 = vcombine.low %v349_v58, %v351_v59 }
  0x3c   : > { %920 = vmatprep.mubr.bf16.mxu1 %v1261_v2 }
  0x42   : > { %824 = vmatmul.mubr.bf16.gmra.mrb[8].mxu0 %v1258_v11 }
  0x43   : > { %921 = vmatmul.mubr.bf16.gmra.mrb[8].mxu1 %v1260_v12  ;;  %831 = vmatprep.mubr.bf16.mxu0 %v1263_v13 }
  0x44   : > { %928 = vmatprep.mubr.bf16.mxu1 %v1265_v14 }
  0x4a   : > { %832 = vmatmul.mubr.bf16.gmra.mrb[12].mxu0 %v1262_v23 }
  0x4b   : > { %929 = vmatmul.mubr.bf16.gmra.mrb[12].mxu1 %v1264_v24  ;;  %839 = vmatprep.mubr.bf16.mxu0 %v1267_v25 }
  0x4c   : > { %936 = vmatprep.mubr.bf16.mxu1 %v1269_v26 }
  0x52   : > { %840 = vmatmul.mubr.bf16.gmra.mrb[16].mxu0 %v1266_v36 }
  0x53   : > { %937 = vmatmul.mubr.bf16.gmra.mrb[16].mxu1 %v1268_v37  ;;  %847 = vmatprep.mubr.bf16.mxu0 %v1271_v38 }
  0x54   : > { %944 = vmatprep.mubr.bf16.mxu1 %v1273_v39 }
  0x5a   : > { %848 = vmatmul.mubr.bf16.gmra.mrb[20].mxu0 %v1270_v48 }
  0x5b   : > { %945 = vmatmul.mubr.bf16.gmra.mrb[20].mxu1 %v1272_v49  ;;  %855 = vmatprep.mubr.bf16.mxu0 %v1275_v50 }
  0x5c   : > { %952 = vmatprep.mubr.bf16.mxu1 %v1277_v51 }
  0x62   : > { %856 = vmatmul.mubr.bf16.gmra.mrb[24].mxu0 %v1274_v60 }
  0x63   : > { %953 = vmatmul.mubr.bf16.gmra.mrb[24].mxu1 %v1276_v61  ;;  %863 = vmatprep.mubr.bf16.mxu0 %v1279_v62 }
  0x64   : > { %960 = vmatprep.mubr.bf16.mxu1 %v1281_v63 }
  0x6a   : > { %864 = vmatmul.mubr.bf16.gmra.mrb[28].mxu0 %v1278_v0 }
  0x6b   : > { %961 = vmatmul.mubr.bf16.gmra.mrb[28].mxu1 %v1280_v1 }
 0x105   : > { %v1336_v2 = vpop.f32.mrb[0].mxu0 }
 0x106   : > { %v1400_v3 = vpop.f32.mrb[0].mxu1  ;;  %v1337_v35 = vpop.f32.mrb[1].mxu0 }
 0x107   : > { %v1338_v5 = vadd.f32 %v1337_v35, %v1336_v2  ;;  %v1401_v6 = vpop.f32.mrb[1].mxu1  ;;  %v1339_v7 = vpop.f32.mrb[2].mxu0 }
 0x108   : > { %v1402_v8 = vadd.f32 %v1401_v6, %v1400_v3  ;;  %v1403_v9 = vpop.f32.mrb[2].mxu1  ;;  %v1340_v10 = vpop.f32.mrb[3].mxu0 }
 0x109   : > { %v810_v11 = vadd.f32 %v1338_v5, %v1655_v4  ;;  %v1341_v12 = vadd.f32 %v1340_v10, %v1339_v7  ;;  %v1404_v13 = vpop.f32.mrb[3].mxu1 }
 0x10a   : > { %v1405_v14 = vadd.f32 %v1404_v13, %v1403_v9 }
 0x10b   : > { %v1658_v15 = vadd.f32 %v1402_v8, %v810_v11  ;;  %v813_v16 = vadd.f32 %v1341_v12, %v1655_v4 }
 0x10d   : > { %v1661_v17 = vadd.f32 %v1405_v14, %v813_v16  ;;  %v1342_v18 = vpop.f32.mrb[4].mxu0  ;;  %v970_v21 = vsel %vm969_vm0, %v1658_v15, 0.0 }
 0x10e   : > { %v1406_v19 = vpop.f32.mrb[4].mxu1  ;;  %v1343_v20 = vpop.f32.mrb[5].mxu0 }
 0x10f   : > { %v971_v22 = vsel %vm969_vm0, %v1661_v17, 0.0  ;;  %v1344_v23 = vadd.f32 %v1343_v20, %v1342_v18  ;;  %v1407_v24 = vpop.f32.mrb[5].mxu1  ;;  %v1345_v25 = vpop.f32.mrb[6].mxu0 }
 0x110   : > { %v972_v26 = vadd.f32 %v971_v22, %v970_v21  ;;  %v1408_v27 = vadd.f32 %v1407_v24, %v1406_v19  ;;  %v1409_v28 = vpop.f32.mrb[6].mxu1  ;;  %v1346_v29 = vpop.f32.mrb[7].mxu0 }
 0x111   : > { %v818_v30 = vadd.f32 %v1344_v23, %v1655_v4  ;;  %v1347_v31 = vadd.f32 %v1346_v29, %v1345_v25  ;;  %v1410_v32 = vpop.f32.mrb[7].mxu1 }
 0x112   : > { %v1411_v33 = vadd.f32 %v1410_v32, %v1409_v28 }
 0x113   : > { %v1668_v34 = vadd.f32 %v1408_v27, %v818_v30  ;;  %v821_v36 = vadd.f32 %v1347_v31, %v1655_v4 }
 0x115   : > { %v973_v37 = vsel %vm969_vm0, %v1668_v34, 0.0  ;;  %v1673_v38 = vadd.f32 %v1411_v33, %v821_v36  ;;  %v1348_v39 = vpop.f32.mrb[8].mxu0 }
 0x116   : > { %v974_v40 = vadd.f32 %v973_v37, %v972_v26  ;;  %v1412_v41 = vpop.f32.mrb[8].mxu1  ;;  %v1349_v42 = vpop.f32.mrb[9].mxu0 }
 0x117   : > { %v975_v43 = vsel %vm969_vm0, %v1673_v38, 0.0  ;;  %v1350_v44 = vadd.f32 %v1349_v42, %v1348_v39  ;;  %v1413_v45 = vpop.f32.mrb[9].mxu1  ;;  %v1351_v46 = vpop.f32.mrb[10].mxu0 }
 0x118   : > { %v976_v47 = vadd.f32 %v975_v43, %v974_v40  ;;  %v1414_v48 = vadd.f32 %v1413_v45, %v1412_v41  ;;  %v1415_v49 = vpop.f32.mrb[10].mxu1  ;;  %v1352_v50 = vpop.f32.mrb[11].mxu0 }
 0x119   : > { %v826_v51 = vadd.f32 %v1350_v44, %v1655_v4  ;;  %v1353_v52 = vadd.f32 %v1352_v50, %v1351_v46  ;;  %v1416_v53 = vpop.f32.mrb[11].mxu1 }
 0x11a   : > { %v1417_v54 = vadd.f32 %v1416_v53, %v1415_v49 }
 0x11b   : > { %v1678_v55 = vadd.f32 %v1414_v48, %v826_v51  ;;  %v829_v56 = vadd.f32 %v1353_v52, %v1655_v4 }
 0x11d   : > { %v977_v57 = vsel %vm969_vm0, %v1678_v55, 0.0  ;;  %v1683_v58 = vadd.f32 %v1417_v54, %v829_v56  ;;  %v1354_v59 = vpop.f32.mrb[12].mxu0 }
 0x11e   : > { %v978_v60 = vadd.f32 %v977_v57, %v976_v47  ;;  %v1418_v61 = vpop.f32.mrb[12].mxu1  ;;  %v1355_v62 = vpop.f32.mrb[13].mxu0 }
 0x11f   : > { %v979_v63 = vsel %vm969_vm0, %v1683_v58, 0.0  ;;  %v1356_v0 = vadd.f32 %v1355_v62, %v1354_v59  ;;  %v1419_v1 = vpop.f32.mrb[13].mxu1  ;;  %v1357_v2 = vpop.f32.mrb[14].mxu0 }
 0x120   : > { %v980_v3 = vadd.f32 %v979_v63, %v978_v60  ;;  %v1420_v35 = vadd.f32 %v1419_v1, %v1418_v61  ;;  %v1421_v5 = vpop.f32.mrb[14].mxu1  ;;  %v1358_v6 = vpop.f32.mrb[15].mxu0 }
 0x121   : > { %v834_v7 = vadd.f32 %v1356_v0, %v1655_v4  ;;  %v1359_v8 = vadd.f32 %v1358_v6, %v1357_v2  ;;  %v1422_v9 = vpop.f32.mrb[15].mxu1 }
 0x122   : > { %v1423_v10 = vadd.f32 %v1422_v9, %v1421_v5 }
 0x123   : > { %v1688_v11 = vadd.f32 %v1420_v35, %v834_v7  ;;  %v837_v12 = vadd.f32 %v1359_v8, %v1655_v4 }
 0x125   : > { %v981_v13 = vsel %vm969_vm0, %v1688_v11, 0.0  ;;  %v1693_v14 = vadd.f32 %v1423_v10, %v837_v12  ;;  %v1360_v16 = vpop.f32.mrb[16].mxu0 }
 0x126   : > { %v982_v18 = vadd.f32 %v981_v13, %v980_v3  ;;  %v1424_v19 = vpop.f32.mrb[16].mxu1  ;;  %v1361_v20 = vpop.f32.mrb[17].mxu0 }
 0x127   : > { %v983_v21 = vsel %vm969_vm0, %v1693_v14, 0.0  ;;  %v1362_v22 = vadd.f32 %v1361_v20, %v1360_v16  ;;  %v1425_v23 = vpop.f32.mrb[17].mxu1  ;;  %v1363_v24 = vpop.f32.mrb[18].mxu0 }
 0x128   : > { %v984_v25 = vadd.f32 %v983_v21, %v982_v18  ;;  %v1426_v26 = vadd.f32 %v1425_v23, %v1424_v19  ;;  %v1427_v27 = vpop.f32.mrb[18].mxu1  ;;  %v1364_v28 = vpop.f32.mrb[19].mxu0 }
 0x129   : > { %v842_v29 = vadd.f32 %v1362_v22, %v1655_v4  ;;  %v1365_v30 = vadd.f32 %v1364_v28, %v1363_v24  ;;  %v1428_v31 = vpop.f32.mrb[19].mxu1 }
 0x12a   : > { %v1429_v32 = vadd.f32 %v1428_v31, %v1427_v27 }
 0x12b   : > { %v1698_v33 = vadd.f32 %v1426_v26, %v842_v29  ;;  %v845_v36 = vadd.f32 %v1365_v30, %v1655_v4 }
 0x12d   : > { %v985_v37 = vsel %vm969_vm0, %v1698_v33, 0.0  ;;  %v1703_v39 = vadd.f32 %v1429_v32, %v845_v36  ;;  %v1366_v40 = vpop.f32.mrb[20].mxu0 }
 0x12e   : > { %v986_v41 = vadd.f32 %v985_v37, %v984_v25  ;;  %v1430_v42 = vpop.f32.mrb[20].mxu1  ;;  %v1367_v43 = vpop.f32.mrb[21].mxu0 }
 0x12f   : > { %v987_v44 = vsel %vm969_vm0, %v1703_v39, 0.0  ;;  %v1368_v45 = vadd.f32 %v1367_v43, %v1366_v40  ;;  %v1431_v46 = vpop.f32.mrb[21].mxu1  ;;  %v1369_v47 = vpop.f32.mrb[22].mxu0 }
 0x130   : > { %v988_v48 = vadd.f32 %v987_v44, %v986_v41  ;;  %v1432_v49 = vadd.f32 %v1431_v46, %v1430_v42  ;;  %v1433_v50 = vpop.f32.mrb[22].mxu1  ;;  %v1370_v51 = vpop.f32.mrb[23].mxu0 }
 0x131   : > { %v850_v52 = vadd.f32 %v1368_v45, %v1655_v4  ;;  %v1371_v53 = vadd.f32 %v1370_v51, %v1369_v47  ;;  %v1434_v54 = vpop.f32.mrb[23].mxu1 }
 0x132   : > { %v1435_v56 = vadd.f32 %v1434_v54, %v1433_v50 }
 0x133   : > { %v1708_v57 = vadd.f32 %v1432_v49, %v850_v52  ;;  %v853_v59 = vadd.f32 %v1371_v53, %v1655_v4 }
 0x135   : > { %v989_v60 = vsel %vm969_vm0, %v1708_v57, 0.0  ;;  %v950_v61 = vadd.f32 %v1435_v56, %v853_v59  ;;  %v1372_v62 = vpop.f32.mrb[24].mxu0 }
 0x136   : > { %v990_v63 = vadd.f32 %v989_v60, %v988_v48  ;;  %v1436_v0 = vpop.f32.mrb[24].mxu1  ;;  %v1373_v1 = vpop.f32.mrb[25].mxu0 }
 0x137   : > { %v991_v2 = vsel %vm969_vm0, %v950_v61, 0.0  ;;  %v1374_v3 = vadd.f32 %v1373_v1, %v1372_v62  ;;  %v1437_v35 = vpop.f32.mrb[25].mxu1  ;;  %v1375_v5 = vpop.f32.mrb[26].mxu0 }
 0x138   : > { %v992_v6 = vadd.f32 %v991_v2, %v990_v63  ;;  %v1438_v7 = vadd.f32 %v1437_v35, %v1436_v0  ;;  %v1439_v8 = vpop.f32.mrb[26].mxu1  ;;  %v1376_v9 = vpop.f32.mrb[27].mxu0 }
 0x139   : > { %v858_v10 = vadd.f32 %v1374_v3, %v1655_v4  ;;  %v1377_v12 = vadd.f32 %v1376_v9, %v1375_v5  ;;  %v1440_v13 = vpop.f32.mrb[27].mxu1 }
 0x13a   : > { %v1441_v16 = vadd.f32 %v1440_v13, %v1439_v8 }
 0x13b   : > { %v955_v18 = vadd.f32 %v1438_v7, %v858_v10  ;;  %v861_v19 = vadd.f32 %v1377_v12, %v1655_v4 }
 0x13d   : > { %v993_v20 = vsel %vm969_vm0, %v955_v18, 0.0  ;;  %v958_v21 = vadd.f32 %v1441_v16, %v861_v19  ;;  %v1378_v22 = vpop.f32.mrb[28].mxu0 }
 0x13e   : > { %v994_v23 = vadd.f32 %v993_v20, %v992_v6  ;;  %v1442_v24 = vpop.f32.mrb[28].mxu1  ;;  %v1379_v25 = vpop.f32.mrb[29].mxu0 }
 0x13f   : > { %v995_v26 = vsel %vm969_vm0, %v958_v21, 0.0  ;;  %v1380_v27 = vadd.f32 %v1379_v25, %v1378_v22  ;;  %v1443_v28 = vpop.f32.mrb[29].mxu1  ;;  %v1381_v29 = vpop.f32.mrb[30].mxu0 }
 0x140   : > { %v996_v30 = vadd.f32 %v995_v26, %v994_v23  ;;  %v1444_v31 = vadd.f32 %v1443_v28, %v1442_v24  ;;  %v1445_v32 = vpop.f32.mrb[30].mxu1  ;;  %v1382_v36 = vpop.f32.mrb[31].mxu0 }
 0x141   : > { %v866_v37 = vadd.f32 %v1380_v27, %v1655_v4  ;;  %v1383_v40 = vadd.f32 %v1382_v36, %v1381_v29  ;;  %v1446_v41 = vpop.f32.mrb[31].mxu1 }
 0x142   : > { %v1447_v42 = vadd.f32 %v1446_v41, %v1445_v32 }
 0x143   : > { %v963_v43 = vadd.f32 %v1444_v31, %v866_v37  ;;  %v869_v44 = vadd.f32 %v1383_v40, %v1655_v4 }
 0x145   : > { %v997_v45 = vsel %vm969_vm0, %v963_v43, 0.0  ;;  %v966_v46 = vadd.f32 %v1447_v42, %v869_v44 }
 0x146   : > { %v998_v47 = vadd.f32 %v997_v45, %v996_v30 }
 0x147   : > { %v999_v48 = vsel %vm969_vm0, %v966_v46, 0.0 }
 0x148   : > { %v1000_v49 = vadd.f32 %v999_v48, %v998_v47 }
 0x14a   : > { %v1001_v50 = vrot.slane %v1000_v49, 4 }
 0x14c   : > { %v1002_v51 = vadd.f32 %v1001_v50, %v1000_v49 }
 0x14e   : > { %v1003_v52 = vrot.slane %v1002_v51, 2 }
 0x150   : > { %v1004_v53 = vadd.f32 %v1003_v52, %v1002_v51 }
 0x152   : > { %v1005_v54 = vrot.slane %v1004_v53, 1 }
 0x154   : > { %v1006_v56 = vadd.f32 %v1005_v54, %v1004_v53 }
 0x156   : > { %v1008_v59 = vmul.f32 0.0078125, %v1006_v56 }
 0x158   : > { %v1723_v60 = vsub.f32 %v1658_v15, %v1008_v59  ;;  %v1726_v62 = vsub.f32 %v1661_v17, %v1008_v59  ;;  %v1729_v4 = vsub.f32 %v1668_v34, %v1008_v59  ;;  %v1732_v63 = vsub.f32 %v1673_v38, %v1008_v59 }
 0x159   : > { %v1735_v0 = vsub.f32 %v1678_v55, %v1008_v59  ;;  %v1738_v1 = vsub.f32 %v1683_v58, %v1008_v59  ;;  %v1741_v2 = vsub.f32 %v1688_v11, %v1008_v59  ;;  %v1744_v15 = vsub.f32 %v1693_v14, %v1008_v59 }
 0x15a   : > { %v1747_v17 = vsub.f32 %v1698_v33, %v1008_v59  ;;  %v1750_v34 = vsub.f32 %v1703_v39, %v1008_v59  ;;  %v1753_v38 = vsub.f32 %v1708_v57, %v1008_v59  ;;  %v1755_v55 = vsub.f32 %v950_v61, %v1008_v59 }
 0x15b   : > { %v1757_v3 = vsub.f32 %v955_v18, %v1008_v59  ;;  %v1759_v58 = vsub.f32 %v958_v21, %v1008_v59  ;;  %v1761_v11 = vsub.f32 %v963_v43, %v1008_v59  ;;  %v1763_v35 = vsub.f32 %v966_v46, %v1008_v59 }
 0x15c   : > { %v1025_v14 = vmul.f32 %v1723_v60, %v1723_v60  ;;  %v1026_v33 = vmul.f32 %v1726_v62, %v1726_v62  ;;  %v1027_v39 = vmul.f32 %v1729_v4, %v1729_v4  ;;  %v1028_v57 = vmul.f32 %v1732_v63, %v1732_v63 }
 0x15d   : > { %v1029_v7 = vmul.f32 %v1735_v0, %v1735_v0  ;;  %v1030_v10 = vmul.f32 %v1738_v1, %v1738_v1  ;;  %v1031_v16 = vmul.f32 %v1741_v2, %v1741_v2  ;;  %v1032_v20 = vmul.f32 %v1744_v15, %v1744_v15 }
 0x15e   : > { %v1041_v61 = vsel %vm969_vm0, %v1025_v14, 0.0  ;;  %v1042_v5 = vsel %vm969_vm0, %v1026_v33, 0.0  ;;  %v1044_v8 = vsel %vm969_vm0, %v1027_v39, 0.0  ;;  %v1046_v12 = vsel %vm969_vm0, %v1028_v57, 0.0 }
 0x15f   : > { %v1043_v6 = vadd.f32 %v1042_v5, %v1041_v61  ;;  %v1048_v18 = vsel %vm969_vm0, %v1029_v7, 0.0  ;;  %v1050_v21 = vsel %vm969_vm0, %v1030_v10, 0.0  ;;  %v1033_v23 = vmul.f32 %v1747_v17, %v1747_v17 }
 0x160   : > { %v1052_v24 = vsel %vm969_vm0, %v1031_v16, 0.0  ;;  %v1034_v26 = vmul.f32 %v1750_v34, %v1750_v34  ;;  %v1054_v27 = vsel %vm969_vm0, %v1032_v20, 0.0  ;;  %v1035_v29 = vmul.f32 %v1753_v38, %v1753_v38 }
 0x161   : > { %v1045_v9 = vadd.f32 %v1044_v8, %v1043_v6  ;;  %v1056_v30 = vsel %vm969_vm0, %v1033_v23, 0.0  ;;  %v1036_v32 = vmul.f32 %v1755_v55, %v1755_v55  ;;  %v1037_v40 = vmul.f32 %v1757_v3, %v1757_v3 }
 0x162   : > { %v1058_v36 = vsel %vm969_vm0, %v1034_v26, 0.0  ;;  %v1060_v41 = vsel %vm969_vm0, %v1035_v29, 0.0  ;;  %v1038_v43 = vmul.f32 %v1759_v58, %v1759_v58  ;;  %v1039_v46 = vmul.f32 %v1761_v11, %v1761_v11  ;;  %v1314_v26 = vld [vmem:[%s281_s10] ss:$0 sm:$0xff] }
 0x163   : > { %v1047_v13 = vadd.f32 %v1046_v12, %v1045_v9  ;;  %v1062_v44 = vsel %vm969_vm0, %v1036_v32, 0.0  ;;  %v1064_v47 = vsel %vm969_vm0, %v1037_v40, 0.0  ;;  %v1040_v49 = vmul.f32 %v1763_v35, %v1763_v35  ;;  %v1079_v9 = vld [vmem:[%s278_s7] sm:$0x1] }
 0x164   : > { %v1066_v50 = vsel %vm969_vm0, %v1038_v43, 0.0  ;;  %v1068_v52 = vsel %vm969_vm0, %v1039_v46, 0.0  ;;  %v1084_v7 = vlaneseq }
 0x165   : > { %v1049_v19 = vadd.f32 %v1048_v18, %v1047_v13  ;;  %v1070_v54 = vsel %vm969_vm0, %v1040_v49, 0.0 }
 0x166   : > { %v1085_v8 = vshrl.u32 %v1084_v7, 7 }
 0x167   : > { %v1051_v22 = vadd.f32 %v1050_v21, %v1049_v19 }
 0x168   : > { %v1086_v10 = vsub.s32 0, %v1085_v8 }
 0x169   : > { %v1053_v25 = vadd.f32 %v1052_v24, %v1051_v22 }
 0x16b   : > { %v1055_v28 = vadd.f32 %v1054_v27, %v1053_v25 }
 0x16d   : > { %v1057_v31 = vadd.f32 %v1056_v30, %v1055_v28 }
 0x16f   : > { %v1059_v37 = vadd.f32 %v1058_v36, %v1057_v31 }
 0x171   : > { %v1061_v42 = vadd.f32 %v1060_v41, %v1059_v37 }
 0x173   : > { %v1063_v45 = vadd.f32 %v1062_v44, %v1061_v42 }
 0x175   : > { %v1065_v48 = vadd.f32 %v1064_v47, %v1063_v45 }
 0x177   : > { %v1067_v51 = vadd.f32 %v1066_v50, %v1065_v48 }
 0x179   : > { %v1069_v53 = vadd.f32 %v1068_v52, %v1067_v51 }
 0x17b   : > { %v1071_v56 = vadd.f32 %v1070_v54, %v1069_v53 }
 0x17d   : > { %v1072_v59 = vrot.slane %v1071_v56, 4 }
 0x17f   : > { %v1073_v14 = vadd.f32 %v1072_v59, %v1071_v56 }
 0x181   : > { %v1074_v33 = vrot.slane %v1073_v14, 2 }
 0x183   : > { %v1075_v39 = vadd.f32 %v1074_v33, %v1073_v14 }
 0x185   : > { %v1076_v57 = vrot.slane %v1075_v39, 1 }
 0x187   : > { %v1077_v61 = vadd.f32 %v1076_v57, %v1075_v39 }
 0x189   : > { %v1078_v5 = vmul.f32 0.0078125, %v1077_v61 }
 0x18b   : > { %v1080_v6 = vadd.f32 1e-05, %v1078_v5 }
 0x18d   : > { %1489 = vrsqrt.f32 %v1080_v6 }
 0x197   : > { %v1490_v12 = vpop.eup %1489 }
 0x198   : > { %v1082_v13 = vmul.f32 %v1490_v12, %v1079_v9 }
 0x19a   : > { %v1087_v16 = vrot.slane %v1082_v13, %v1086_v10 }
 0x19c   : > { %v1089_v18 = vmul.f32 %v1087_v16, %v1723_v60  ;;  %v1090_v19 = vmul.f32 %v1087_v16, %v1726_v62  ;;  %v1091_v20 = vmul.f32 %v1087_v16, %v1729_v4  ;;  %v1092_v21 = vmul.f32 %v1087_v16, %v1732_v63 }
 0x19d   : > { %v1093_v22 = vmul.f32 %v1087_v16, %v1735_v0  ;;  %v1094_v23 = vmul.f32 %v1087_v16, %v1738_v1  ;;  %v1095_v24 = vmul.f32 %v1087_v16, %v1741_v2  ;;  %v1096_v25 = vmul.f32 %v1087_v16, %v1744_v15 }
 0x19e   : > { %v1097_v27 = vmul.f32 %v1087_v16, %v1747_v17  ;;  %v1098_v28 = vmul.f32 %v1087_v16, %v1750_v34  ;;  %v1099_v60 = vmul.f32 %v1087_v16, %v1753_v38  ;;  %v1100_v62 = vmul.f32 %v1087_v16, %v1755_v55 }
 0x19f   : > { %v1101_v4 = vmul.f32 %v1087_v16, %v1757_v3  ;;  %v1102_v63 = vmul.f32 %v1087_v16, %v1759_v58  ;;  %v1103_v0 = vmul.f32 %v1087_v16, %v1761_v11  ;;  %v1104_v1 = vmul.f32 %v1087_v16, %v1763_v35 }
 0x1a0   : > { %v1112_v2 = vadd.f32 %v1314_v26, %v1089_v18  ;;  %v1113_v15 = vadd.f32 %v1314_v26, %v1090_v19  ;;  %v1114_v17 = vadd.f32 %v1314_v26, %v1091_v20  ;;  %v1115_v34 = vadd.f32 %v1314_v26, %v1092_v21 }
 0x1a1   : > { %v1116_v38 = vadd.f32 %v1314_v26, %v1093_v22  ;;  %v1117_v55 = vadd.f32 %v1314_v26, %v1094_v23  ;;  %v1118_v29 = vadd.f32 %v1314_v26, %v1095_v24  ;;  %v1119_v3 = vadd.f32 %v1314_v26, %v1096_v25 }
 0x1a2   : > { %v1120_v58 = vadd.f32 %v1314_v26, %v1097_v27  ;;  %v1121_v30 = vadd.f32 %v1314_v26, %v1098_v28  ;;  %v1122_v11 = vadd.f32 %v1314_v26, %v1099_v60  ;;  %v1123_v35 = vadd.f32 %v1314_v26, %v1100_v62  ;;  %1128 = vst.msk [vmem:[%s1837_s14] sm:$0xff] %vm969_vm0, %v1112_v2 }
 0x1a3   : > { %1129 = vst.msk [vmem:[%s1837_s14 + $0x8] sm:$0xff] %vm969_vm0, %v1113_v15  ;;  %1130 = vst.msk [vmem:[%s1837_s14 + $0x10] sm:$0xff] %vm969_vm0, %v1114_v17  ;;  %v1124_v31 = vadd.f32 %v1314_v26, %v1101_v4  ;;  %v1125_v32 = vadd.f32 %v1314_v26, %v1102_v63  ;;  %v1126_v36 = vadd.f32 %v1314_v26, %v1103_v0 }
 0x1a4   : > { %1131 = vst.msk [vmem:[%s1837_s14 + $0x18] sm:$0xff] %vm969_vm0, %v1115_v34  ;;  %v1127_v37 = vadd.f32 %v1314_v26, %v1104_v1  ;;  %1132 = vst.msk [vmem:[%s1837_s14 + $0x20] sm:$0xff] %vm969_vm0, %v1116_v38 }
 0x1a5   : > { %1133 = vst.msk [vmem:[%s1837_s14 + $0x28] sm:$0xff] %vm969_vm0, %v1117_v55  ;;  %1134 = vst.msk [vmem:[%s1837_s14 + $0x30] sm:$0xff] %vm969_vm0, %v1118_v29 }
 0x1a6   : > { %1135 = vst.msk [vmem:[%s1837_s14 + $0x38] sm:$0xff] %vm969_vm0, %v1119_v3  ;;  %1136 = vst.msk [vmem:[%s1837_s14 + $0x40] sm:$0xff] %vm969_vm0, %v1120_v58 }
 0x1a7   : > { %1137 = vst.msk [vmem:[%s1837_s14 + $0x48] sm:$0xff] %vm969_vm0, %v1121_v30  ;;  %1138 = vst.msk [vmem:[%s1837_s14 + $0x50] sm:$0xff] %vm969_vm0, %v1122_v11 }
 0x1a8   : > { %1139 = vst.msk [vmem:[%s1837_s14 + $0x58] sm:$0xff] %vm969_vm0, %v1123_v35  ;;  %1140 = vst.msk [vmem:[%s1837_s14 + $0x60] sm:$0xff] %vm969_vm0, %v1124_v31 }
 0x1a9   : > { %1141 = vst.msk [vmem:[%s1837_s14 + $0x68] sm:$0xff] %vm969_vm0, %v1125_v32  ;;  %1142 = vst.msk [vmem:[%s1837_s14 + $0x70] sm:$0xff] %vm969_vm0, %v1126_v36 }
 0x1aa   : > { %1143 = vst.msk [vmem:[%s1837_s14 + $0x78] sm:$0xff] %vm969_vm0, %v1127_v37 }
 0x1ab PF: > { %s15_s18 = sadd.s32 1, %s1497_s18  }
 0x1ac   : > { %p12_p4 = scmp.ge.s32.totalorder %s15_s18, 5  }
 0x1ae   :  { %14 = sbr.rel (!%p12_p4) target bundleno = 1 (0x1), region = 82 }

// kernel: forward_nchw.11
= control target key start
LH: loop header
LB: loop body
LE: loop exit
PB: predicated region body
PF: predicated region fallthrough
CT: control target
= control target key end

     0   :  { %s1512_s18 = smov 0   ;;  %s2272_s0 = inlined_call_operand.vmem [shape: bf16[3,512,256], index: 0, kind: input, shape index: {}]   ;;  %s2273_s1 = inlined_call_operand.vmem [shape: bf16[3,256,2], index: 1, kind: input, shape index: {}]   ;;  %s2274_s2 = inlined_call_operand.vmem [shape: f32[3,1,2], index: 2, kind: input, shape index: {}]   ;;  %s2275_s3 = inlined_call_operand.vmem [shape: f32[3,1,2], index: 3, kind: input, shape index: {}]   ;;  %s2276_s4 = inlined_call_operand.vmem [shape: f32[3,1,2], index: 4, kind: input, shape index: {}]   ;;  %s2277_s5 = inlined_call_operand.vmem [shape: f32[3,512,2], index: 5, kind: output, shape index: {}]  }
   0x1 LB: > { %s1319_s19 = sadd.s32 4294967295, %s1479_s18   ;;  %p1323_p0 = scmp.ge.s32.totalorder %s1479_s18, 1  ;;  %s1479_s18 = sphi %s1512_s18, %s15_s18  }
   0x2   : > { %p221_p1 = scmp.lt.s32.totalorder %s1479_s18, 4 }
   0x4   : > { %p222_p2 = pnand %p1323_p0, %p221_p1 }
   0x6   : > { %225 = sbr.rel (%p222_p2) target bundleno = 419 (0x1a3), region = 40 }
   0xd   : > { %p263_p3 = scmp.lt.s32.totalorder %s1319_s19, 2  ;;  %v1481_v0 = vmov 0   ;;  %vm1160_vm0 = vcmask 15360  }
   0xe   : > { %871 = vmatprep.subr.bf16.mxu0 %v1481_v0  ;;  %1416 = vmatprep.subr.bf16.mxu1 %v1481_v0 }
   0xf   : > { %s2363_s19 = smov (!%p263_p3, %s1319_s19), 2 }
  0x10   : > { %s1414_s3 = sshll.u32 %s2363_s19, 7  ;;  %s1413_s22 = sshll.u32 %s2363_s19, 9 }
  0x11   : > { %s1528_s21 = scalar_lea.vmem %s2273_s1, %s1414_s3  ;;  %s1546_s25 = scalar_lea.vmem %s2272_s0, %s1413_s22 }
  0x12   : > { %v1457_v1 = vld [vmem:[%s1528_s21] sm:$0xff]   ;;  %v1458_v2 = vld [vmem:[%s1528_s21 + $0x8] sm:$0xff]   ;;  %v1459_v3 = vld [vmem:[%s1528_s21 + $0x10] sm:$0xff]   ;;  %s275_s28 = scalar_lea.vmem %s2274_s2, %s2363_s19  ;;  %s2075_s6 = scalar_lea.vmem %s2277_s5, %s1413_s22 }
  0x13   : > { %872 = vmatpush1.bf16.msra.mxu0 %v1457_v1  ;;  %1432 = vmatpush1.bf16.msra.mxu1 %v1457_v1  ;;  %v1460_v4 = vld [vmem:[%s1528_s21 + $0x18] sm:$0xff]   ;;  %v1461_v5 = vld [vmem:[%s1528_s21 + $0x20] sm:$0xff]   ;;  %v289_v7 = vld [vmem:[%s1546_s25 + $0x8] sm:$0xff] }
  0x14   : > { %873 = vmatprep.subr.bf16.mxu0 %v1481_v0  ;;  %1417 = vmatprep.subr.bf16.mxu1 %v1481_v0  ;;  %v288_v6 = vld [vmem:[%s1546_s25] sm:$0xff]  ;;  %v1558_v10 = vmax.bf16 %v1481_v0, %v289_v7  ;;  %v321_v11 = vld [vmem:[%s1546_s25 + $0x108] sm:$0xff]  ;;  %v1463_v17 = vld [vmem:[%s1528_s21 + $0x30] sm:$0xff]  }
  0x15   : > { %v320_v8 = vld [vmem:[%s1546_s25 + $0x100] sm:$0xff]  ;;  %v1555_v9 = vmax.bf16 %v1481_v0, %v288_v6  ;;  %v1462_v13 = vld [vmem:[%s1528_s21 + $0x28] sm:$0xff]   ;;  %v1566_v14 = vmax.bf16 %v1481_v0, %v321_v11  ;;  %v1464_v22 = vld [vmem:[%s1528_s21 + $0x38] sm:$0xff]  }
  0x16   : > { %v1562_v12 = vmax.bf16 %v1481_v0, %v320_v8  ;;  %v296_v18 = vld [vmem:[%s1546_s25 + $0x40] sm:$0xff]  ;;  %v297_v19 = vld [vmem:[%s1546_s25 + $0x48] sm:$0xff]  ;;  %v298_v26 = vld [vmem:[%s1546_s25 + $0x50] sm:$0xff] }
  0x17   : > { %874 = vmatpush1.bf16.msra.mxu0 %v1458_v2  ;;  %1433 = vmatpush1.bf16.msra.mxu1 %v1458_v2  ;;  %v1332_v15 = vcombine.high %v1555_v9, %v1558_v10  ;;  %v328_v20 = vld [vmem:[%s1546_s25 + $0x140] sm:$0xff]  ;;  %v329_v21 = vld [vmem:[%s1546_s25 + $0x148] sm:$0xff]  ;;  %v1583_v23 = vmax.bf16 %v1481_v0, %v296_v18  ;;  %v1586_v24 = vmax.bf16 %v1481_v0, %v297_v19  ;;  %v299_v27 = vld [vmem:[%s1546_s25 + $0x58] sm:$0xff] }
  0x18   : > { %875 = vmatprep.subr.bf16.mxu0 %v1481_v0  ;;  %1418 = vmatprep.subr.bf16.mxu1 %v1481_v0  ;;  %v1364_v16 = vcombine.high %v1562_v12, %v1566_v14  ;;  %v1589_v25 = vmax.bf16 %v1481_v0, %v328_v20  ;;  %v1594_v28 = vmax.bf16 %v1481_v0, %v329_v21  ;;  %v330_v29 = vld [vmem:[%s1546_s25 + $0x150] sm:$0xff]  ;;  %v331_v30 = vld [vmem:[%s1546_s25 + $0x158] sm:$0xff]  ;;  %v300_v31 = vld [vmem:[%s1546_s25 + $0x60] sm:$0xff] }
  0x19   : > { %903 = vmatprep.mubr.bf16.mxu0 %v1332_v15  ;;  %v301_v33 = vld [vmem:[%s1546_s25 + $0x68] sm:$0xff]  ;;  %v332_v34 = vld [vmem:[%s1546_s25 + $0x160] sm:$0xff]  ;;  %v1613_v39 = vmax.bf16 %v1481_v0, %v298_v26  ;;  %v1617_v41 = vmax.bf16 %v1481_v0, %v299_v27  ;;  %v1620_v42 = vmax.bf16 %v1481_v0, %v330_v29  ;;  %v1623_v43 = vmax.bf16 %v1481_v0, %v331_v30  ;;  %v302_v48 = vld [vmem:[%s1546_s25 + $0x70] sm:$0xff] }
  0x1a   : > { %1031 = vmatprep.mubr.bf16.mxu1 %v1364_v16  ;;  %v333_v35 = vld [vmem:[%s1546_s25 + $0x168] sm:$0xff]  ;;  %v1465_v40 = vld [vmem:[%s1528_s21 + $0x40] sm:$0xff]   ;;  %v1626_v44 = vmax.bf16 %v1481_v0, %v300_v31  ;;  %v1629_v45 = vmax.bf16 %v1481_v0, %v301_v33  ;;  %v1632_v46 = vmax.bf16 %v1481_v0, %v332_v34  ;;  %v303_v49 = vld [vmem:[%s1546_s25 + $0x78] sm:$0xff]  ;;  %v1664_v1 = vmax.bf16 %v1481_v0, %v302_v48 }
  0x1b   : > { %876 = vmatpush1.bf16.msra.mxu0 %v1459_v3  ;;  %1434 = vmatpush1.bf16.msra.mxu1 %v1459_v3  ;;  %v1635_v47 = vmax.bf16 %v1481_v0, %v333_v35  ;;  %v334_v50 = vld [vmem:[%s1546_s25 + $0x170] sm:$0xff]  ;;  %v335_v54 = vld [vmem:[%s1546_s25 + $0x178] sm:$0xff]  ;;  %v304_v55 = vld [vmem:[%s1546_s25 + $0x80] sm:$0xff]  ;;  %v1667_v2 = vmax.bf16 %v1481_v0, %v303_v49 }
  0x1c   : > { %877 = vmatprep.subr.bf16.mxu0 %v1481_v0  ;;  %1419 = vmatprep.subr.bf16.mxu1 %v1481_v0  ;;  %v305_v56 = vld [vmem:[%s1546_s25 + $0x88] sm:$0xff]  ;;  %v336_v61 = vld [vmem:[%s1546_s25 + $0x180] sm:$0xff]  ;;  %v1670_v3 = vmax.bf16 %v1481_v0, %v334_v50  ;;  %v1677_v6 = vmax.bf16 %v1481_v0, %v304_v55  ;;  %v306_v8 = vld [vmem:[%s1546_s25 + $0x90] sm:$0xff] }
  0x1d   : > { %v1466_v62 = vld [vmem:[%s1528_s21 + $0x48] sm:$0xff]   ;;  %v1680_v7 = vmax.bf16 %v1481_v0, %v305_v56  ;;  %v307_v11 = vld [vmem:[%s1546_s25 + $0x98] sm:$0xff]  ;;  %v1467_v19 = vld [vmem:[%s1528_s21 + $0x50] sm:$0xff]   ;;  %v1709_v30 = vmax.bf16 %v1481_v0, %v306_v8 }
  0x1e   : > { %v339_v18 = vld [vmem:[%s1546_s25 + $0x198] sm:$0xff]  ;;  %v308_v27 = vld [vmem:[%s1546_s25 + $0xa0] sm:$0xff]  ;;  %v1712_v31 = vmax.bf16 %v1481_v0, %v307_v11  ;;  %v309_v34 = vld [vmem:[%s1546_s25 + $0xa8] sm:$0xff] }
  0x1f   : > { %878 = vmatpush1.bf16.msra.mxu0 %v1460_v4  ;;  %1435 = vmatpush1.bf16.msra.mxu1 %v1460_v4  ;;  %v337_v4 = vld [vmem:[%s1546_s25 + $0x188] sm:$0xff]  ;;  %v340_v35 = vld [vmem:[%s1546_s25 + $0x1a0] sm:$0xff]  ;;  %v1725_v50 = vmax.bf16 %v1481_v0, %v339_v18  ;;  %v311_v55 = vld [vmem:[%s1546_s25 + $0xb8] sm:$0xff]  ;;  %v1745_v18 = vmax.bf16 %v1481_v0, %v309_v34 }
  0x20   : > { %879 = vmatprep.subr.bf16.mxu0 %v1481_v0  ;;  %1420 = vmatprep.subr.bf16.mxu1 %v1481_v0  ;;  %v1703_v26 = vmax.bf16 %v1481_v0, %v337_v4  ;;  %v342_v56 = vld [vmem:[%s1546_s25 + $0x1b0] sm:$0xff]  ;;  %v1737_v4 = vmax.bf16 %v1481_v0, %v308_v27  ;;  %v343_v8 = vld [vmem:[%s1546_s25 + $0x1b8] sm:$0xff]  ;;  %v1758_v11 = vmax.bf16 %v1481_v0, %v311_v55  ;;  %v312_v34 = vld [vmem:[%s1546_s25 + $0xc0] sm:$0xff] }
  0x21   : > { %v313_v29 = vld [vmem:[%s1546_s25 + $0xc8] sm:$0xff]  ;;  %v344_v55 = vld [vmem:[%s1546_s25 + $0x1c0] sm:$0xff]  ;;  %v314_v48 = vld [vmem:[%s1546_s25 + $0xd0] sm:$0xff] }
  0x22   : > { %v347_v21 = vld [vmem:[%s1546_s25 + $0x1d8] sm:$0xff]  ;;  %v1469_v15 = vld [vmem:[%s1528_s21 + $0x60] sm:$0xff]   ;;  %v1800_v63 = vmax.bf16 %v1481_v0, %v344_v55  ;;  %v1806_v60 = vmax.bf16 %v1481_v0, %v314_v48  ;;  %v317_v20 = vld [vmem:[%s1546_s25 + $0xe8] sm:$0xff] }
  0x23   : > { %880 = vmatpush1.bf16.msra.mxu0 %v1461_v5  ;;  %1436 = vmatpush1.bf16.msra.mxu1 %v1461_v5  ;;  %v1674_v5 = vmax.bf16 %v1481_v0, %v335_v54  ;;  %v310_v54 = vld [vmem:[%s1546_s25 + $0xb0] sm:$0xff]  ;;  %v316_v55 = vld [vmem:[%s1546_s25 + $0xe0] sm:$0xff]  ;;  %v1843_v57 = vmax.bf16 %v1481_v0, %v317_v20  ;;  %v319_v53 = vld [vmem:[%s1546_s25 + $0xf8] sm:$0xff] }
  0x24   : > { %881 = vmatprep.subr.bf16.mxu0 %v1481_v0  ;;  %1421 = vmatprep.subr.bf16.mxu1 %v1481_v0  ;;  %v1755_v49 = vmax.bf16 %v1481_v0, %v310_v54  ;;  %v1770_v54 = vmax.bf16 %v1481_v0, %v343_v8  ;;  %v346_v8 = vld [vmem:[%s1546_s25 + $0x1d0] sm:$0xff]  ;;  %v348_v59 = vld [vmem:[%s1546_s25 + $0x1e0] sm:$0xff]  ;;  %v1470_v58 = vld [vmem:[%s1528_s21 + $0x68] sm:$0xff]  }
  0x25   : > { %2298 = vst [vmem:[#allocation4_spill] sm:$0xff] %v1843_v57  ;;  %v350_v20 = vld [vmem:[%s1546_s25 + $0x1f0] sm:$0xff]  ;;  %v323_v37 = vld [vmem:[%s1546_s25 + $0x118] sm:$0xff] }
  0x26   : > { %v322_v51 = vld [vmem:[%s1546_s25 + $0x110] sm:$0xff]  ;;  %v387_v32 = vmax.bf16 %v1481_v0, %v323_v37  ;;  %v325_v37 = vld [vmem:[%s1546_s25 + $0x128] sm:$0xff]  ;;  %v295_v57 = vld [vmem:[%s1546_s25 + $0x38] sm:$0xff] }
  0x27   : > { %882 = vmatpush1.bf16.msra.mxu0 %v1462_v13  ;;  %1437 = vmatpush1.bf16.msra.mxu1 %v1462_v13  ;;  %v338_v13 = vld [vmem:[%s1546_s25 + $0x190] sm:$0xff]  ;;  %v386_v36 = vmax.bf16 %v1481_v0, %v322_v51  ;;  %v324_v51 = vld [vmem:[%s1546_s25 + $0x120] sm:$0xff] }
  0x28   : > { %883 = vmatprep.subr.bf16.mxu0 %v1481_v0  ;;  %1422 = vmatprep.subr.bf16.mxu1 %v1481_v0  ;;  %v1715_v33 = vmax.bf16 %v1481_v0, %v338_v13  ;;  %v1761_v13 = vmax.bf16 %v1481_v0, %v342_v56  ;;  %v345_v56 = vld [vmem:[%s1546_s25 + $0x1c8] sm:$0xff] }
  0x29   : > { %v1803_v16 = vmax.bf16 %v1481_v0, %v345_v56  ;;  %v1846_v56 = vmax.bf16 %v1481_v0, %v348_v59  ;;  %v290_v59 = vld [vmem:[%s1546_s25 + $0x10] sm:$0xff] }
  0x2b   : > { %884 = vmatpush1.bf16.msra.mxu0 %v1463_v17  ;;  %1438 = vmatpush1.bf16.msra.mxu1 %v1463_v17  ;;  %v1692_v17 = vmax.bf16 %v1481_v0, %v336_v61  ;;  %v1748_v61 = vmax.bf16 %v1481_v0, %v340_v35  ;;  %v1793_v35 = vmax.bf16 %v1481_v0, %v312_v34 }
  0x2c   : > { %885 = vmatprep.subr.bf16.mxu0 %v1481_v0  ;;  %1423 = vmatprep.subr.bf16.mxu1 %v1481_v0  ;;  %v1812_v34 = vmax.bf16 %v1481_v0, %v346_v8  ;;  %2299 = vst [vmem:[#allocation5_spill] sm:$0xff] %v1846_v56  ;;  %v318_v8 = vld [vmem:[%s1546_s25 + $0xf0] sm:$0xff] }
  0x2d   : > { %v1855_v48 = vmax.bf16 %v1481_v0, %v318_v8  ;;  %v291_v8 = vld [vmem:[%s1546_s25 + $0x18] sm:$0xff]  ;;  %v294_v56 = vld [vmem:[%s1546_s25 + $0x30] sm:$0xff] }
  0x2f   : > { %886 = vmatpush1.bf16.msra.mxu0 %v1464_v22  ;;  %1439 = vmatpush1.bf16.msra.mxu1 %v1464_v22  ;;  %v315_v22 = vld [vmem:[%s1546_s25 + $0xd8] sm:$0xff]  ;;  %2301 = vst [vmem:[#allocation7_spill] sm:$0xff] %v1855_v48 }
  0x30   : > { %887 = vmatprep.subr.bf16.mxu0 %v1481_v0  ;;  %1424 = vmatprep.subr.bf16.mxu1 %v1481_v0 }
  0x33   : > { %888 = vmatpush1.bf16.msra.mxu0 %v1465_v40  ;;  %1440 = vmatpush1.bf16.msra.mxu1 %v1465_v40  ;;  %v341_v40 = vld [vmem:[%s1546_s25 + $0x1a8] sm:$0xff] }
  0x34   : > { %889 = vmatprep.subr.bf16.mxu0 %v1481_v0  ;;  %1425 = vmatprep.subr.bf16.mxu1 %v1481_v0  ;;  %v1752_v27 = vmax.bf16 %v1481_v0, %v341_v40  ;;  %v1797_v40 = vmax.bf16 %v1481_v0, %v313_v29  ;;  %v1815_v29 = vmax.bf16 %v1481_v0, %v347_v21 }
  0x35   : > { %v1840_v21 = vmax.bf16 %v1481_v0, %v316_v55  ;;  %v1858_v55 = vmax.bf16 %v1481_v0, %v319_v53  ;;  %v355_v53 = vmax.bf16 %v1481_v0, %v291_v8  ;;  %v293_v8 = vld [vmem:[%s1546_s25 + $0x28] sm:$0xff] }
  0x36   : > { %2296 = vst [vmem:[#allocation2_spill] sm:$0xff] %v1815_v29  ;;  %v327_v29 = vld [vmem:[%s1546_s25 + $0x138] sm:$0xff] }
  0x37   : > { %890 = vmatpush1.bf16.msra.mxu0 %v1466_v62  ;;  %1441 = vmatpush1.bf16.msra.mxu1 %v1466_v62  ;;  %v1468_v62 = vld [vmem:[%s1528_s21 + $0x58] sm:$0xff]   ;;  %2297 = vst [vmem:[#allocation3_spill] sm:$0xff] %v1840_v21  ;;  %2302 = vst [vmem:[#allocation8_spill] sm:$0xff] %v1858_v55  ;;  %v326_v21 = vld [vmem:[%s1546_s25 + $0x130] sm:$0xff] }
  0x38   : > { %891 = vmatprep.subr.bf16.mxu0 %v1481_v0  ;;  %1426 = vmatprep.subr.bf16.mxu1 %v1481_v0 }
  0x3b   : > { %892 = vmatpush1.bf16.msra.mxu0 %v1467_v19  ;;  %1442 = vmatpush1.bf16.msra.mxu1 %v1467_v19  ;;  %v1809_v19 = vmax.bf16 %v1481_v0, %v315_v22  ;;  %v351_v22 = vld [vmem:[%s1546_s25 + $0x1f8] sm:$0xff] }
  0x3c   : > { %893 = vmatprep.subr.bf16.mxu0 %v1481_v0  ;;  %1427 = vmatprep.subr.bf16.mxu1 %v1481_v0  ;;  %v1878_v38 = vmax.bf16 %v1481_v0, %v351_v22  ;;  %v1331_v22 = vcombine.low %v1555_v9, %v1558_v10  ;;  %v357_v9 = vmax.bf16 %v1481_v0, %v293_v8 }
  0x3d   : > { %v388_v10 = vmax.bf16 %v1481_v0, %v324_v51  ;;  %v2349_v51 = vld [vmem:[#allocation5_spill] sm:$0xff] }
  0x3e   : > { %2304 = vst [vmem:[#allocation10_spill] sm:$0xff] %v1878_v38  ;;  %v1366_v38 = vcombine.high %v386_v36, %v387_v32 }
  0x3f   : > { %894 = vmatpush1.bf16.msra.mxu0 %v1468_v62  ;;  %1443 = vmatpush1.bf16.msra.mxu1 %v1468_v62  ;;  %v349_v62 = vld [vmem:[%s1546_s25 + $0x1e8] sm:$0xff] }
  0x40   : > { %895 = vmatprep.subr.bf16.mxu0 %v1481_v0  ;;  %1428 = vmatprep.subr.bf16.mxu1 %v1481_v0  ;;  %v1852_v52 = vmax.bf16 %v1481_v0, %v349_v62  ;;  %v1869_v62 = vmax.bf16 %v1481_v0, %v350_v20  ;;  %v1471_v20 = vld [vmem:[%s1528_s21 + $0x70] sm:$0xff]  }
  0x42   : > { %2300 = vst [vmem:[#allocation6_spill] sm:$0xff] %v1852_v52  ;;  %2303 = vst [vmem:[#allocation9_spill] sm:$0xff] %v1869_v62  ;;  %v292_v62 = vld [vmem:[%s1546_s25 + $0x20] sm:$0xff] }
  0x43   : > { %896 = vmatpush1.bf16.msra.mxu0 %v1469_v15  ;;  %1444 = vmatpush1.bf16.msra.mxu1 %v1469_v15  ;;  %v354_v15 = vmax.bf16 %v1481_v0, %v290_v59  ;;  %v1363_v59 = vcombine.low %v1562_v12, %v1566_v14  ;;  %v356_v55 = vmax.bf16 %v1481_v0, %v292_v62 }
  0x44   : > { %897 = vmatprep.subr.bf16.mxu0 %v1481_v0  ;;  %1429 = vmatprep.subr.bf16.mxu1 %v1481_v0  ;;  %v389_v12 = vmax.bf16 %v1481_v0, %v325_v37  ;;  %v358_v62 = vmax.bf16 %v1481_v0, %v294_v56  ;;  %v2311_v56 = vcombine.low %v1613_v39, %v1617_v41 }
  0x45   : > { %v1333_v14 = vcombine.low %v354_v15, %v355_v53  ;;  %v1336_v48 = vcombine.high %v356_v55, %v357_v9 }
  0x46   : > { %v1368_v52 = vcombine.high %v388_v10, %v389_v12 }
  0x47   : > { %898 = vmatpush1.bf16.msra.mxu0 %v1470_v58  ;;  %1445 = vmatpush1.bf16.msra.mxu1 %v1470_v58  ;;  %v1472_v58 = vld [vmem:[%s1528_s21 + $0x78] sm:$0xff]  }
  0x48   : > { %899 = vmatprep.subr.bf16.mxu0 %v1481_v0  ;;  %1430 = vmatprep.subr.bf16.mxu1 %v1481_v0 }
  0x49   : > { %v2350_v37 = vld [vmem:[#allocation6_spill] sm:$0xff] }
  0x4b   : > { %900 = vmatpush1.bf16.msra.mxu0 %v1471_v20  ;;  %1446 = vmatpush1.bf16.msra.mxu1 %v1471_v20  ;;  %v1334_v20 = vcombine.high %v354_v15, %v355_v53  ;;  %v1335_v15 = vcombine.low %v356_v55, %v357_v9  ;;  %v2344_v55 = vcombine.low %v1806_v60, %v1809_v19 }
  0x4c   : > { %901 = vmatprep.subr.bf16.mxu0 %v1481_v0  ;;  %1431 = vmatprep.subr.bf16.mxu1 %v1481_v0  ;;  %v2351_v9 = vcombine.high %v2349_v51, %v2350_v37 }
  0x4f   : > { %902 = vmatpush1.bf16.msra.mxu0 %v1472_v58  ;;  %1447 = vmatpush1.bf16.msra.mxu1 %v1472_v58  ;;  %v1365_v58 = vcombine.low %v386_v36, %v387_v32  ;;  %v1367_v32 = vcombine.low %v388_v10, %v389_v12  ;;  %v2355_v12 = vld [vmem:[#allocation8_spill] sm:$0xff] }
  0x52   : > { %904 = vmatmul.mubr.bf16.vlgmr.msra.gmra.mrb[0].mxu0 %v1331_v22  ;;  %1032 = vmatmul.mubr.bf16.vlgmr.msra.gmra.mrb[0].mxu1 %v1363_v59  ;;  %v390_v22 = vmax.bf16 %v1481_v0, %v326_v21  ;;  %v391_v59 = vmax.bf16 %v1481_v0, %v327_v29  ;;  %v2308_v29 = vcombine.low %v1589_v25, %v1594_v28 }
  0x53   : > { %911 = vmatprep.mubr.bf16.mxu0 %v1334_v20  ;;  %1039 = vmatprep.mubr.bf16.mxu1 %v1366_v38  ;;  %v359_v38 = vmax.bf16 %v1481_v0, %v295_v57  ;;  %v2306_v57 = vcombine.high %v1589_v25, %v1594_v28  ;;  %v2307_v0 = vcombine.low %v1583_v23, %v1586_v24 }
  0x54   : > { %v1370_v53 = vcombine.high %v390_v22, %v391_v59  ;;  %v1369_v8 = vcombine.low %v390_v22, %v391_v59  ;;  %v2310_v21 = vcombine.high %v1620_v42, %v1623_v43  ;;  %v2314_v25 = vcombine.high %v1632_v46, %v1635_v47  ;;  %v2068_v59 = vld [vmem:[%s275_s28] ss:$0 sm:$0xff] }
  0x55   : > { %v1338_v36 = vcombine.high %v358_v62, %v359_v38  ;;  %v1337_v20 = vcombine.low %v358_v62, %v359_v38  ;;  %v2315_v28 = vcombine.low %v1626_v44, %v1629_v45 }
  0x5a   : > { %912 = vmatmul.mubr.bf16.gmra.mrb[4].mxu0 %v1333_v14  ;;  %1040 = vmatmul.mubr.bf16.gmra.mrb[4].mxu1 %v1365_v58  ;;  %v2357_v14 = vld [vmem:[#allocation9_spill] sm:$0xff]  ;;  %v2358_v58 = vld [vmem:[#allocation10_spill] sm:$0xff] }
  0x5b   : > { %919 = vmatprep.mubr.bf16.mxu0 %v1336_v48  ;;  %1047 = vmatprep.mubr.bf16.mxu1 %v1368_v52  ;;  %v2305_v52 = vcombine.high %v1583_v23, %v1586_v24  ;;  %v2309_v48 = vcombine.high %v1613_v39, %v1617_v41  ;;  %v2312_v23 = vcombine.low %v1620_v42, %v1623_v43 }
  0x5c   : > { %v2313_v24 = vcombine.high %v1626_v44, %v1629_v45  ;;  %v2316_v39 = vcombine.low %v1632_v46, %v1635_v47  ;;  %v2317_v41 = vcombine.high %v1664_v1, %v1667_v2  ;;  %v2318_v42 = vcombine.high %v1670_v3, %v1674_v5 }
  0x5d   : > { %v2319_v43 = vcombine.low %v1664_v1, %v1667_v2  ;;  %v2320_v44 = vcombine.low %v1670_v3, %v1674_v5  ;;  %v2321_v45 = vcombine.high %v1677_v6, %v1680_v7  ;;  %v2322_v46 = vcombine.high %v1692_v17, %v1703_v26 }
  0x5e   : > { %v2323_v47 = vcombine.low %v1677_v6, %v1680_v7  ;;  %v2324_v1 = vcombine.low %v1692_v17, %v1703_v26  ;;  %v2325_v2 = vcombine.high %v1709_v30, %v1712_v31  ;;  %v2326_v3 = vcombine.high %v1715_v33, %v1725_v50 }
  0x5f   : > { %v2327_v5 = vcombine.low %v1709_v30, %v1712_v31  ;;  %v2328_v6 = vcombine.low %v1715_v33, %v1725_v50  ;;  %v2329_v7 = vcombine.high %v1737_v4, %v1745_v18  ;;  %v2330_v17 = vcombine.high %v1748_v61, %v1752_v27 }
  0x60   : > { %v2331_v26 = vcombine.low %v1737_v4, %v1745_v18  ;;  %v2332_v30 = vcombine.low %v1748_v61, %v1752_v27  ;;  %v2333_v31 = vcombine.high %v1755_v49, %v1758_v11  ;;  %v2334_v33 = vcombine.high %v1761_v13, %v1770_v54 }
  0x61   : > { %v2335_v50 = vcombine.low %v1755_v49, %v1758_v11  ;;  %v2336_v4 = vcombine.low %v1761_v13, %v1770_v54  ;;  %v2337_v61 = vcombine.high %v1793_v35, %v1797_v40  ;;  %v2338_v18 = vcombine.high %v1800_v63, %v1803_v16  ;;  %v2342_v13 = vld [vmem:[#allocation2_spill] sm:$0xff] }
  0x62   : > { %920 = vmatmul.mubr.bf16.gmra.mrb[8].mxu0 %v1335_v15  ;;  %1048 = vmatmul.mubr.bf16.gmra.mrb[8].mxu1 %v1367_v32  ;;  %v2339_v27 = vcombine.low %v1793_v35, %v1797_v40  ;;  %v2340_v49 = vcombine.low %v1800_v63, %v1803_v16  ;;  %v2341_v11 = vcombine.high %v1806_v60, %v1809_v19  ;;  %v2346_v40 = vld [vmem:[#allocation3_spill] sm:$0xff]  ;;  %v2347_v63 = vld [vmem:[#allocation4_spill] sm:$0xff] }
  0x63   : > { %927 = vmatprep.mubr.bf16.mxu0 %v1338_v36  ;;  %1055 = vmatprep.mubr.bf16.mxu1 %v1370_v53  ;;  %v2343_v54 = vcombine.high %v1812_v34, %v2342_v13  ;;  %v2345_v35 = vcombine.low %v1812_v34, %v2342_v13  ;;  %v2348_v16 = vcombine.high %v2346_v40, %v2347_v63  ;;  %v2354_v19 = vld [vmem:[#allocation7_spill] sm:$0xff] }
  0x64   : > { %v2352_v10 = vcombine.low %v2346_v40, %v2347_v63  ;;  %v2353_v60 = vcombine.low %v2349_v51, %v2350_v37  ;;  %v2356_v34 = vcombine.high %v2354_v19, %v2355_v12  ;;  %v2359_v62 = vcombine.high %v2357_v14, %v2358_v58 }
  0x65   : > { %v2360_v38 = vcombine.low %v2354_v19, %v2355_v12  ;;  %v2361_v22 = vcombine.low %v2357_v14, %v2358_v58 }
  0x6a   : > { %928 = vmatmul.mubr.bf16.gmra.mrb[12].mxu0 %v1337_v20  ;;  %1056 = vmatmul.mubr.bf16.gmra.mrb[12].mxu1 %v1369_v8 }
  0x6b   : > { %935 = vmatprep.mubr.bf16.mxu0 %v2305_v52  ;;  %1063 = vmatprep.mubr.bf16.mxu1 %v2306_v57 }
  0x72   : > { %936 = vmatmul.mubr.bf16.gmra.mrb[16].mxu0 %v2307_v0  ;;  %1064 = vmatmul.mubr.bf16.gmra.mrb[16].mxu1 %v2308_v29 }
  0x73   : > { %943 = vmatprep.mubr.bf16.mxu0 %v2309_v48  ;;  %1071 = vmatprep.mubr.bf16.mxu1 %v2310_v21 }
  0x7a   : > { %944 = vmatmul.mubr.bf16.gmra.mrb[20].mxu0 %v2311_v56  ;;  %1072 = vmatmul.mubr.bf16.gmra.mrb[20].mxu1 %v2312_v23 }
  0x7b   : > { %951 = vmatprep.mubr.bf16.mxu0 %v2313_v24  ;;  %1079 = vmatprep.mubr.bf16.mxu1 %v2314_v25 }
  0x82   : > { %952 = vmatmul.mubr.bf16.gmra.mrb[24].mxu0 %v2315_v28  ;;  %1080 = vmatmul.mubr.bf16.gmra.mrb[24].mxu1 %v2316_v39 }
  0x83   : > { %959 = vmatprep.mubr.bf16.mxu0 %v2317_v41  ;;  %1087 = vmatprep.mubr.bf16.mxu1 %v2318_v42 }
  0x8a   : > { %960 = vmatmul.mubr.bf16.gmra.mrb[28].mxu0 %v2319_v43  ;;  %1088 = vmatmul.mubr.bf16.gmra.mrb[28].mxu1 %v2320_v44 }
  0x8b   : > { %967 = vmatprep.mubr.bf16.mxu0 %v2321_v45  ;;  %1095 = vmatprep.mubr.bf16.mxu1 %v2322_v46 }
  0x92   : > { %968 = vmatmul.mubr.bf16.gmra.mrb[32].mxu0 %v2323_v47  ;;  %1096 = vmatmul.mubr.bf16.gmra.mrb[32].mxu1 %v2324_v1 }
  0x93   : > { %975 = vmatprep.mubr.bf16.mxu0 %v2325_v2  ;;  %1103 = vmatprep.mubr.bf16.mxu1 %v2326_v3 }
  0x9a   : > { %976 = vmatmul.mubr.bf16.gmra.mrb[36].mxu0 %v2327_v5  ;;  %1104 = vmatmul.mubr.bf16.gmra.mrb[36].mxu1 %v2328_v6 }
  0x9b   : > { %983 = vmatprep.mubr.bf16.mxu0 %v2329_v7  ;;  %1111 = vmatprep.mubr.bf16.mxu1 %v2330_v17 }
  0xa2   : > { %984 = vmatmul.mubr.bf16.gmra.mrb[40].mxu0 %v2331_v26  ;;  %1112 = vmatmul.mubr.bf16.gmra.mrb[40].mxu1 %v2332_v30 }
  0xa3   : > { %991 = vmatprep.mubr.bf16.mxu0 %v2333_v31  ;;  %1119 = vmatprep.mubr.bf16.mxu1 %v2334_v33 }
  0xaa   : > { %992 = vmatmul.mubr.bf16.gmra.mrb[44].mxu0 %v2335_v50  ;;  %1120 = vmatmul.mubr.bf16.gmra.mrb[44].mxu1 %v2336_v4 }
  0xab   : > { %999 = vmatprep.mubr.bf16.mxu0 %v2337_v61  ;;  %1127 = vmatprep.mubr.bf16.mxu1 %v2338_v18 }
  0xb2   : > { %1000 = vmatmul.mubr.bf16.gmra.mrb[48].mxu0 %v2339_v27  ;;  %1128 = vmatmul.mubr.bf16.gmra.mrb[48].mxu1 %v2340_v49 }
  0xb3   : > { %1007 = vmatprep.mubr.bf16.mxu0 %v2341_v11  ;;  %1135 = vmatprep.mubr.bf16.mxu1 %v2343_v54 }
  0xba   : > { %1008 = vmatmul.mubr.bf16.gmra.mrb[52].mxu0 %v2344_v55  ;;  %1136 = vmatmul.mubr.bf16.gmra.mrb[52].mxu1 %v2345_v35 }
  0xbb   : > { %1015 = vmatprep.mubr.bf16.mxu0 %v2348_v16  ;;  %1143 = vmatprep.mubr.bf16.mxu1 %v2351_v9 }
  0xc2   : > { %1016 = vmatmul.mubr.bf16.gmra.mrb[56].mxu0 %v2352_v10  ;;  %1144 = vmatmul.mubr.bf16.gmra.mrb[56].mxu1 %v2353_v60 }
  0xc3   : > { %1023 = vmatprep.mubr.bf16.mxu0 %v2356_v34  ;;  %1151 = vmatprep.mubr.bf16.mxu1 %v2359_v62 }
  0xca   : > { %1024 = vmatmul.mubr.bf16.gmra.mrb[60].mxu0 %v2360_v38  ;;  %1152 = vmatmul.mubr.bf16.gmra.mrb[60].mxu1 %v2361_v22 }
 0x125   : > { %v905_v15 = vpop.f32.mrb[0].mxu0  ;;  %v1033_v32 = vpop.f32.mrb[0].mxu1 }
 0x126   : > { %v906_v36 = vadd.f32 %v2068_v59, %v905_v15  ;;  %v1034_v53 = vadd.f32 %v2068_v59, %v1033_v32  ;;  %v907_v20 = vpop.f32.mrb[1].mxu0  ;;  %v1035_v8 = vpop.f32.mrb[1].mxu1 }
 0x127   : > { %v908_v52 = vpop.f32.mrb[2].mxu0  ;;  %v1036_v57 = vpop.f32.mrb[2].mxu1 }
 0x128   : > { %1161 = vst.msk [vmem:[%s2075_s6] sm:$0xff] %vm1160_vm0, %v906_v36  ;;  %1193 = vst.msk [vmem:[%s2075_s6 + $0x100] sm:$0xff] %vm1160_vm0, %v1034_v53  ;;  %v909_v0 = vadd.f32 %v2068_v59, %v908_v52  ;;  %v1037_v29 = vadd.f32 %v2068_v59, %v1036_v57  ;;  %v910_v48 = vpop.f32.mrb[3].mxu0  ;;  %v1038_v21 = vpop.f32.mrb[3].mxu1 }
 0x12a   : > { %1162 = vst.msk [vmem:[%s2075_s6 + $0x8] sm:$0xff] %vm1160_vm0, %v909_v0  ;;  %1194 = vst.msk [vmem:[%s2075_s6 + $0x108] sm:$0xff] %vm1160_vm0, %v1037_v29 }
 0x12d   : > { %v913_v56 = vpop.f32.mrb[4].mxu0  ;;  %v1041_v23 = vpop.f32.mrb[4].mxu1 }
 0x12e   : > { %v914_v24 = vadd.f32 %v2068_v59, %v913_v56  ;;  %v1042_v25 = vadd.f32 %v2068_v59, %v1041_v23  ;;  %v915_v28 = vpop.f32.mrb[5].mxu0  ;;  %v1043_v39 = vpop.f32.mrb[5].mxu1 }
 0x12f   : > { %v916_v41 = vpop.f32.mrb[6].mxu0  ;;  %v1044_v42 = vpop.f32.mrb[6].mxu1 }
 0x130   : > { %1163 = vst.msk [vmem:[%s2075_s6 + $0x10] sm:$0xff] %vm1160_vm0, %v914_v24  ;;  %1195 = vst.msk [vmem:[%s2075_s6 + $0x110] sm:$0xff] %vm1160_vm0, %v1042_v25  ;;  %v917_v43 = vadd.f32 %v2068_v59, %v916_v41  ;;  %v1045_v44 = vadd.f32 %v2068_v59, %v1044_v42  ;;  %v918_v45 = vpop.f32.mrb[7].mxu0  ;;  %v1046_v46 = vpop.f32.mrb[7].mxu1 }
 0x132   : > { %1164 = vst.msk [vmem:[%s2075_s6 + $0x18] sm:$0xff] %vm1160_vm0, %v917_v43  ;;  %1196 = vst.msk [vmem:[%s2075_s6 + $0x118] sm:$0xff] %vm1160_vm0, %v1045_v44 }
 0x135   : > { %v921_v47 = vpop.f32.mrb[8].mxu0  ;;  %v1049_v1 = vpop.f32.mrb[8].mxu1 }
 0x136   : > { %v922_v2 = vadd.f32 %v2068_v59, %v921_v47  ;;  %v1050_v3 = vadd.f32 %v2068_v59, %v1049_v1  ;;  %v923_v5 = vpop.f32.mrb[9].mxu0  ;;  %v1051_v6 = vpop.f32.mrb[9].mxu1 }
 0x137   : > { %v924_v7 = vpop.f32.mrb[10].mxu0  ;;  %v1052_v17 = vpop.f32.mrb[10].mxu1 }
 0x138   : > { %1165 = vst.msk [vmem:[%s2075_s6 + $0x20] sm:$0xff] %vm1160_vm0, %v922_v2  ;;  %1197 = vst.msk [vmem:[%s2075_s6 + $0x120] sm:$0xff] %vm1160_vm0, %v1050_v3  ;;  %v925_v26 = vadd.f32 %v2068_v59, %v924_v7  ;;  %v1053_v30 = vadd.f32 %v2068_v59, %v1052_v17  ;;  %v926_v31 = vpop.f32.mrb[11].mxu0  ;;  %v1054_v33 = vpop.f32.mrb[11].mxu1 }
 0x13a   : > { %1166 = vst.msk [vmem:[%s2075_s6 + $0x28] sm:$0xff] %vm1160_vm0, %v925_v26  ;;  %1198 = vst.msk [vmem:[%s2075_s6 + $0x128] sm:$0xff] %vm1160_vm0, %v1053_v30 }
 0x13d   : > { %v929_v50 = vpop.f32.mrb[12].mxu0  ;;  %v1057_v4 = vpop.f32.mrb[12].mxu1 }
 0x13e   : > { %v930_v61 = vadd.f32 %v2068_v59, %v929_v50  ;;  %v1058_v18 = vadd.f32 %v2068_v59, %v1057_v4  ;;  %v931_v27 = vpop.f32.mrb[13].mxu0  ;;  %v1059_v49 = vpop.f32.mrb[13].mxu1 }
 0x13f   : > { %v932_v11 = vpop.f32.mrb[14].mxu0  ;;  %v1060_v13 = vpop.f32.mrb[14].mxu1 }
 0x140   : > { %1167 = vst.msk [vmem:[%s2075_s6 + $0x30] sm:$0xff] %vm1160_vm0, %v930_v61  ;;  %1199 = vst.msk [vmem:[%s2075_s6 + $0x130] sm:$0xff] %vm1160_vm0, %v1058_v18  ;;  %v933_v54 = vadd.f32 %v2068_v59, %v932_v11  ;;  %v1061_v55 = vadd.f32 %v2068_v59, %v1060_v13  ;;  %v934_v35 = vpop.f32.mrb[15].mxu0  ;;  %v1062_v40 = vpop.f32.mrb[15].mxu1 }
 0x142   : > { %1168 = vst.msk [vmem:[%s2075_s6 + $0x38] sm:$0xff] %vm1160_vm0, %v933_v54  ;;  %1200 = vst.msk [vmem:[%s2075_s6 + $0x138] sm:$0xff] %vm1160_vm0, %v1061_v55 }
 0x145   : > { %v937_v63 = vpop.f32.mrb[16].mxu0  ;;  %v1065_v16 = vpop.f32.mrb[16].mxu1 }
 0x146   : > { %v938_v51 = vadd.f32 %v2068_v59, %v937_v63  ;;  %v1066_v37 = vadd.f32 %v2068_v59, %v1065_v16  ;;  %v939_v9 = vpop.f32.mrb[17].mxu0  ;;  %v1067_v10 = vpop.f32.mrb[17].mxu1 }
 0x147   : > { %v940_v60 = vpop.f32.mrb[18].mxu0  ;;  %v1068_v19 = vpop.f32.mrb[18].mxu1 }
 0x148   : > { %1169 = vst.msk [vmem:[%s2075_s6 + $0x40] sm:$0xff] %vm1160_vm0, %v938_v51  ;;  %1201 = vst.msk [vmem:[%s2075_s6 + $0x140] sm:$0xff] %vm1160_vm0, %v1066_v37  ;;  %v941_v12 = vadd.f32 %v2068_v59, %v940_v60  ;;  %v1069_v34 = vadd.f32 %v2068_v59, %v1068_v19  ;;  %v942_v14 = vpop.f32.mrb[19].mxu0  ;;  %v1070_v58 = vpop.f32.mrb[19].mxu1 }
 0x14a   : > { %1170 = vst.msk [vmem:[%s2075_s6 + $0x48] sm:$0xff] %vm1160_vm0, %v941_v12  ;;  %1202 = vst.msk [vmem:[%s2075_s6 + $0x148] sm:$0xff] %vm1160_vm0, %v1069_v34 }
 0x14d   : > { %v945_v62 = vpop.f32.mrb[20].mxu0  ;;  %v1073_v38 = vpop.f32.mrb[20].mxu1 }
 0x14e   : > { %v946_v22 = vadd.f32 %v2068_v59, %v945_v62  ;;  %v1074_v15 = vadd.f32 %v2068_v59, %v1073_v38  ;;  %v947_v32 = vpop.f32.mrb[21].mxu0  ;;  %v1075_v36 = vpop.f32.mrb[21].mxu1 }
 0x14f   : > { %v948_v53 = vpop.f32.mrb[22].mxu0  ;;  %v1076_v20 = vpop.f32.mrb[22].mxu1 }
 0x150   : > { %1171 = vst.msk [vmem:[%s2075_s6 + $0x50] sm:$0xff] %vm1160_vm0, %v946_v22  ;;  %1203 = vst.msk [vmem:[%s2075_s6 + $0x150] sm:$0xff] %vm1160_vm0, %v1074_v15  ;;  %v949_v8 = vadd.f32 %v2068_v59, %v948_v53  ;;  %v1077_v52 = vadd.f32 %v2068_v59, %v1076_v20  ;;  %v950_v57 = vpop.f32.mrb[23].mxu0  ;;  %v1078_v0 = vpop.f32.mrb[23].mxu1 }
 0x152   : > { %1172 = vst.msk [vmem:[%s2075_s6 + $0x58] sm:$0xff] %vm1160_vm0, %v949_v8  ;;  %1204 = vst.msk [vmem:[%s2075_s6 + $0x158] sm:$0xff] %vm1160_vm0, %v1077_v52 }
 0x155   : > { %v953_v29 = vpop.f32.mrb[24].mxu0  ;;  %v1081_v48 = vpop.f32.mrb[24].mxu1 }
 0x156   : > { %v954_v21 = vadd.f32 %v2068_v59, %v953_v29  ;;  %v1082_v56 = vadd.f32 %v2068_v59, %v1081_v48  ;;  %v955_v23 = vpop.f32.mrb[25].mxu0  ;;  %v1083_v24 = vpop.f32.mrb[25].mxu1 }
 0x157   : > { %v956_v25 = vpop.f32.mrb[26].mxu0  ;;  %v1084_v28 = vpop.f32.mrb[26].mxu1 }
 0x158   : > { %1173 = vst.msk [vmem:[%s2075_s6 + $0x60] sm:$0xff] %vm1160_vm0, %v954_v21  ;;  %1205 = vst.msk [vmem:[%s2075_s6 + $0x160] sm:$0xff] %vm1160_vm0, %v1082_v56  ;;  %v957_v39 = vadd.f32 %v2068_v59, %v956_v25  ;;  %v1085_v41 = vadd.f32 %v2068_v59, %v1084_v28  ;;  %v958_v42 = vpop.f32.mrb[27].mxu0  ;;  %v1086_v43 = vpop.f32.mrb[27].mxu1 }
 0x15a   : > { %1174 = vst.msk [vmem:[%s2075_s6 + $0x68] sm:$0xff] %vm1160_vm0, %v957_v39  ;;  %1206 = vst.msk [vmem:[%s2075_s6 + $0x168] sm:$0xff] %vm1160_vm0, %v1085_v41 }
 0x15d   : > { %v961_v44 = vpop.f32.mrb[28].mxu0  ;;  %v1089_v45 = vpop.f32.mrb[28].mxu1 }
 0x15e   : > { %v962_v46 = vadd.f32 %v2068_v59, %v961_v44  ;;  %v1090_v47 = vadd.f32 %v2068_v59, %v1089_v45  ;;  %v963_v1 = vpop.f32.mrb[29].mxu0  ;;  %v1091_v2 = vpop.f32.mrb[29].mxu1 }
 0x15f   : > { %v964_v3 = vpop.f32.mrb[30].mxu0  ;;  %v1092_v5 = vpop.f32.mrb[30].mxu1 }
 0x160   : > { %1175 = vst.msk [vmem:[%s2075_s6 + $0x70] sm:$0xff] %vm1160_vm0, %v962_v46  ;;  %1207 = vst.msk [vmem:[%s2075_s6 + $0x170] sm:$0xff] %vm1160_vm0, %v1090_v47  ;;  %v965_v6 = vadd.f32 %v2068_v59, %v964_v3  ;;  %v1093_v7 = vadd.f32 %v2068_v59, %v1092_v5  ;;  %v966_v17 = vpop.f32.mrb[31].mxu0  ;;  %v1094_v26 = vpop.f32.mrb[31].mxu1 }
 0x162   : > { %1176 = vst.msk [vmem:[%s2075_s6 + $0x78] sm:$0xff] %vm1160_vm0, %v965_v6  ;;  %1208 = vst.msk [vmem:[%s2075_s6 + $0x178] sm:$0xff] %vm1160_vm0, %v1093_v7 }
 0x165   : > { %v969_v30 = vpop.f32.mrb[32].mxu0  ;;  %v1097_v31 = vpop.f32.mrb[32].mxu1 }
 0x166   : > { %v970_v33 = vadd.f32 %v2068_v59, %v969_v30  ;;  %v1098_v50 = vadd.f32 %v2068_v59, %v1097_v31  ;;  %v971_v4 = vpop.f32.mrb[33].mxu0  ;;  %v1099_v61 = vpop.f32.mrb[33].mxu1 }
 0x167   : > { %v972_v18 = vpop.f32.mrb[34].mxu0  ;;  %v1100_v27 = vpop.f32.mrb[34].mxu1 }
 0x168   : > { %1177 = vst.msk [vmem:[%s2075_s6 + $0x80] sm:$0xff] %vm1160_vm0, %v970_v33  ;;  %1209 = vst.msk [vmem:[%s2075_s6 + $0x180] sm:$0xff] %vm1160_vm0, %v1098_v50  ;;  %v973_v49 = vadd.f32 %v2068_v59, %v972_v18  ;;  %v1101_v11 = vadd.f32 %v2068_v59, %v1100_v27  ;;  %v974_v13 = vpop.f32.mrb[35].mxu0  ;;  %v1102_v54 = vpop.f32.mrb[35].mxu1 }
 0x16a   : > { %1178 = vst.msk [vmem:[%s2075_s6 + $0x88] sm:$0xff] %vm1160_vm0, %v973_v49  ;;  %1210 = vst.msk [vmem:[%s2075_s6 + $0x188] sm:$0xff] %vm1160_vm0, %v1101_v11 }
 0x16d   : > { %v977_v55 = vpop.f32.mrb[36].mxu0  ;;  %v1105_v35 = vpop.f32.mrb[36].mxu1 }
 0x16e   : > { %v978_v40 = vadd.f32 %v2068_v59, %v977_v55  ;;  %v1106_v63 = vadd.f32 %v2068_v59, %v1105_v35  ;;  %v979_v16 = vpop.f32.mrb[37].mxu0  ;;  %v1107_v51 = vpop.f32.mrb[37].mxu1 }
 0x16f   : > { %v980_v37 = vpop.f32.mrb[38].mxu0  ;;  %v1108_v9 = vpop.f32.mrb[38].mxu1 }
 0x170   : > { %1179 = vst.msk [vmem:[%s2075_s6 + $0x90] sm:$0xff] %vm1160_vm0, %v978_v40  ;;  %1211 = vst.msk [vmem:[%s2075_s6 + $0x190] sm:$0xff] %vm1160_vm0, %v1106_v63  ;;  %v981_v10 = vadd.f32 %v2068_v59, %v980_v37  ;;  %v1109_v60 = vadd.f32 %v2068_v59, %v1108_v9  ;;  %v982_v19 = vpop.f32.mrb[39].mxu0  ;;  %v1110_v12 = vpop.f32.mrb[39].mxu1 }
 0x172   : > { %1180 = vst.msk [vmem:[%s2075_s6 + $0x98] sm:$0xff] %vm1160_vm0, %v981_v10  ;;  %1212 = vst.msk [vmem:[%s2075_s6 + $0x198] sm:$0xff] %vm1160_vm0, %v1109_v60 }
 0x175   : > { %v985_v34 = vpop.f32.mrb[40].mxu0  ;;  %v1113_v14 = vpop.f32.mrb[40].mxu1 }
 0x176   : > { %v986_v58 = vadd.f32 %v2068_v59, %v985_v34  ;;  %v1114_v62 = vadd.f32 %v2068_v59, %v1113_v14  ;;  %v987_v38 = vpop.f32.mrb[41].mxu0  ;;  %v1115_v22 = vpop.f32.mrb[41].mxu1 }
 0x177   : > { %v988_v15 = vpop.f32.mrb[42].mxu0  ;;  %v1116_v32 = vpop.f32.mrb[42].mxu1 }
 0x178   : > { %1181 = vst.msk [vmem:[%s2075_s6 + $0xa0] sm:$0xff] %vm1160_vm0, %v986_v58  ;;  %1213 = vst.msk [vmem:[%s2075_s6 + $0x1a0] sm:$0xff] %vm1160_vm0, %v1114_v62  ;;  %v989_v36 = vadd.f32 %v2068_v59, %v988_v15  ;;  %v1117_v53 = vadd.f32 %v2068_v59, %v1116_v32  ;;  %v990_v20 = vpop.f32.mrb[43].mxu0  ;;  %v1118_v8 = vpop.f32.mrb[43].mxu1 }
 0x17a   : > { %1182 = vst.msk [vmem:[%s2075_s6 + $0xa8] sm:$0xff] %vm1160_vm0, %v989_v36  ;;  %1214 = vst.msk [vmem:[%s2075_s6 + $0x1a8] sm:$0xff] %vm1160_vm0, %v1117_v53 }
 0x17d   : > { %v993_v52 = vpop.f32.mrb[44].mxu0  ;;  %v1121_v57 = vpop.f32.mrb[44].mxu1 }
 0x17e   : > { %v994_v0 = vadd.f32 %v2068_v59, %v993_v52  ;;  %v1122_v29 = vadd.f32 %v2068_v59, %v1121_v57  ;;  %v995_v48 = vpop.f32.mrb[45].mxu0  ;;  %v1123_v21 = vpop.f32.mrb[45].mxu1 }
 0x17f   : > { %v996_v56 = vpop.f32.mrb[46].mxu0  ;;  %v1124_v23 = vpop.f32.mrb[46].mxu1 }
 0x180   : > { %1183 = vst.msk [vmem:[%s2075_s6 + $0xb0] sm:$0xff] %vm1160_vm0, %v994_v0  ;;  %1215 = vst.msk [vmem:[%s2075_s6 + $0x1b0] sm:$0xff] %vm1160_vm0, %v1122_v29  ;;  %v997_v24 = vadd.f32 %v2068_v59, %v996_v56  ;;  %v1125_v25 = vadd.f32 %v2068_v59, %v1124_v23  ;;  %v998_v28 = vpop.f32.mrb[47].mxu0  ;;  %v1126_v39 = vpop.f32.mrb[47].mxu1 }
 0x182   : > { %1184 = vst.msk [vmem:[%s2075_s6 + $0xb8] sm:$0xff] %vm1160_vm0, %v997_v24  ;;  %1216 = vst.msk [vmem:[%s2075_s6 + $0x1b8] sm:$0xff] %vm1160_vm0, %v1125_v25 }
 0x185   : > { %v1001_v41 = vpop.f32.mrb[48].mxu0  ;;  %v1129_v42 = vpop.f32.mrb[48].mxu1 }
 0x186   : > { %v1002_v43 = vadd.f32 %v2068_v59, %v1001_v41  ;;  %v1130_v44 = vadd.f32 %v2068_v59, %v1129_v42  ;;  %v1003_v45 = vpop.f32.mrb[49].mxu0  ;;  %v1131_v46 = vpop.f32.mrb[49].mxu1 }
 0x187   : > { %v1004_v47 = vpop.f32.mrb[50].mxu0  ;;  %v1132_v1 = vpop.f32.mrb[50].mxu1 }
 0x188   : > { %1185 = vst.msk [vmem:[%s2075_s6 + $0xc0] sm:$0xff] %vm1160_vm0, %v1002_v43  ;;  %1217 = vst.msk [vmem:[%s2075_s6 + $0x1c0] sm:$0xff] %vm1160_vm0, %v1130_v44  ;;  %v1005_v2 = vadd.f32 %v2068_v59, %v1004_v47  ;;  %v1133_v3 = vadd.f32 %v2068_v59, %v1132_v1  ;;  %v1006_v5 = vpop.f32.mrb[51].mxu0  ;;  %v1134_v6 = vpop.f32.mrb[51].mxu1 }
 0x18a   : > { %1186 = vst.msk [vmem:[%s2075_s6 + $0xc8] sm:$0xff] %vm1160_vm0, %v1005_v2  ;;  %1218 = vst.msk [vmem:[%s2075_s6 + $0x1c8] sm:$0xff] %vm1160_vm0, %v1133_v3 }
 0x18d   : > { %v1009_v7 = vpop.f32.mrb[52].mxu0  ;;  %v1137_v17 = vpop.f32.mrb[52].mxu1 }
 0x18e   : > { %v1010_v26 = vadd.f32 %v2068_v59, %v1009_v7  ;;  %v1138_v30 = vadd.f32 %v2068_v59, %v1137_v17  ;;  %v1011_v31 = vpop.f32.mrb[53].mxu0  ;;  %v1139_v33 = vpop.f32.mrb[53].mxu1 }
 0x18f   : > { %v1012_v50 = vpop.f32.mrb[54].mxu0  ;;  %v1140_v4 = vpop.f32.mrb[54].mxu1 }
 0x190   : > { %1187 = vst.msk [vmem:[%s2075_s6 + $0xd0] sm:$0xff] %vm1160_vm0, %v1010_v26  ;;  %1219 = vst.msk [vmem:[%s2075_s6 + $0x1d0] sm:$0xff] %vm1160_vm0, %v1138_v30  ;;  %v1013_v61 = vadd.f32 %v2068_v59, %v1012_v50  ;;  %v1141_v18 = vadd.f32 %v2068_v59, %v1140_v4  ;;  %v1014_v27 = vpop.f32.mrb[55].mxu0  ;;  %v1142_v49 = vpop.f32.mrb[55].mxu1 }
 0x192   : > { %1188 = vst.msk [vmem:[%s2075_s6 + $0xd8] sm:$0xff] %vm1160_vm0, %v1013_v61  ;;  %1220 = vst.msk [vmem:[%s2075_s6 + $0x1d8] sm:$0xff] %vm1160_vm0, %v1141_v18 }
 0x195   : > { %v1017_v11 = vpop.f32.mrb[56].mxu0  ;;  %v1145_v13 = vpop.f32.mrb[56].mxu1 }
 0x196   : > { %v1018_v54 = vadd.f32 %v2068_v59, %v1017_v11  ;;  %v1146_v55 = vadd.f32 %v2068_v59, %v1145_v13  ;;  %v1019_v35 = vpop.f32.mrb[57].mxu0  ;;  %v1147_v40 = vpop.f32.mrb[57].mxu1 }
 0x197   : > { %v1020_v63 = vpop.f32.mrb[58].mxu0  ;;  %v1148_v16 = vpop.f32.mrb[58].mxu1 }
 0x198   : > { %1189 = vst.msk [vmem:[%s2075_s6 + $0xe0] sm:$0xff] %vm1160_vm0, %v1018_v54  ;;  %1221 = vst.msk [vmem:[%s2075_s6 + $0x1e0] sm:$0xff] %vm1160_vm0, %v1146_v55  ;;  %v1021_v51 = vadd.f32 %v2068_v59, %v1020_v63  ;;  %v1149_v37 = vadd.f32 %v2068_v59, %v1148_v16  ;;  %v1022_v9 = vpop.f32.mrb[59].mxu0  ;;  %v1150_v10 = vpop.f32.mrb[59].mxu1 }
 0x19a   : > { %1190 = vst.msk [vmem:[%s2075_s6 + $0xe8] sm:$0xff] %vm1160_vm0, %v1021_v51  ;;  %1222 = vst.msk [vmem:[%s2075_s6 + $0x1e8] sm:$0xff] %vm1160_vm0, %v1149_v37 }
 0x19d   : > { %v1025_v60 = vpop.f32.mrb[60].mxu0  ;;  %v1153_v19 = vpop.f32.mrb[60].mxu1 }
 0x19e   : > { %v1026_v12 = vadd.f32 %v2068_v59, %v1025_v60  ;;  %v1154_v34 = vadd.f32 %v2068_v59, %v1153_v19  ;;  %v1027_v14 = vpop.f32.mrb[61].mxu0  ;;  %v1155_v58 = vpop.f32.mrb[61].mxu1 }
 0x19f   : > { %v1028_v62 = vpop.f32.mrb[62].mxu0  ;;  %v1156_v38 = vpop.f32.mrb[62].mxu1 }
 0x1a0   : > { %1191 = vst.msk [vmem:[%s2075_s6 + $0xf0] sm:$0xff] %vm1160_vm0, %v1026_v12  ;;  %1223 = vst.msk [vmem:[%s2075_s6 + $0x1f0] sm:$0xff] %vm1160_vm0, %v1154_v34  ;;  %v1029_v22 = vadd.f32 %v2068_v59, %v1028_v62  ;;  %v1157_v15 = vadd.f32 %v2068_v59, %v1156_v38  ;;  %v1030_v32 = vpop.f32.mrb[63].mxu0  ;;  %v1158_v36 = vpop.f32.mrb[63].mxu1 }
 0x1a2   : > { %1192 = vst.msk [vmem:[%s2075_s6 + $0xf8] sm:$0xff] %vm1160_vm0, %v1029_v22  ;;  %1224 = vst.msk [vmem:[%s2075_s6 + $0x1f8] sm:$0xff] %vm1160_vm0, %v1157_v15 }
 0x1a3 PF: > { %s15_s18 = sadd.s32 1, %s1479_s18  }
 0x1a4   : > { %p12_p4 = scmp.ge.s32.totalorder %s15_s18, 5  }
 0x1a6   :  { %14 = sbr.rel (!%p12_p4) target bundleno = 1 (0x1), region = 82 }

</bundles_post_ra>
